<compile_context>
chip_gen: v6e
topology: v6e:2x2x1
jax: 0.10.0
libtpu: 0.0.40
codegen_flags: <defaults>
</compile_context>

<pallas_src>
import functools
import math

import jax
import jax.numpy as jnp
from jax.experimental import pallas as pl
from jax.experimental.pallas import tpu as pltpu


# ----------------------------------------------------------------------------
# Fused forward kernel: one batch element per grid step, (C, N) layout, N=H*W
# ----------------------------------------------------------------------------
def _fused_kernel(cur_ref, prev_ref,
                  wf1_ref, bf1_ref, wf2_ref, bf2_ref, wf3_ref, bf3_ref,
                  wh_ref, bh_ref, wx_ref, bx_ref, wo_ref, bo_ref,
                  out_ref, *, H, W):
    N = H * W

    cur = cur_ref[0].astype(jnp.float32)    # (C, N)
    prev = prev_ref[0].astype(jnp.float32)  # (C, N)

    # Per-lane pixel coordinates (x = n % W, y = n // W), exact in f32.
    colf = jax.lax.broadcasted_iota(jnp.int32, (1, N), 1).astype(jnp.float32)
    ycf = jnp.floor((colf + 0.5) * (1.0 / W))   # (1, N)
    xcf = colf - ycf * W                        # (1, N)

    # 3x3 conv taps: flattened-lane shift + validity mask (shared by all convs).
    taps = []
    for ky in range(3):
        dy = ky - 1
        for kx in range(3):
            dx = kx - 1
            valid = ((xcf + dx > -0.5) & (xcf + dx < W - 0.5)
                     & (ycf + dy > -0.5) & (ycf + dy < H - 0.5))
            mask = jnp.where(valid, 1.0, 0.0).astype(jnp.float32)
            taps.append((dy * W + dx, mask))

    def shift_cols(x, off):
        # out[:, n] = x[:, (n + off) % N]   (wrapped values get masked to 0)
        offm = off % N
        if offm == 0:
            return x
        return jnp.concatenate([x[:, offm:], x[:, :offm]], axis=1)

    def conv3x3(x, w_ref, b_ref, relu):
        # x: (Cin, N); w_ref: (Cout, 9*Cin); b_ref: (Cout, 1) -> (Cout, N)
        patches = jnp.concatenate(
            [shift_cols(x, off) * mask for off, mask in taps], axis=0)
        out = jnp.dot(w_ref[...], patches,
                      preferred_element_type=jnp.float32) + b_ref[...]
        if relu:
            out = jnp.maximum(out, 0.0)
        return out

    # ---- flow estimation ----
    flow_in = jnp.concatenate([cur, prev], axis=0)            # (2C, N)
    f = conv3x3(flow_in, wf1_ref, bf1_ref, relu=True)         # (24, N)
    f = conv3x3(f, wf2_ref, bf2_ref, relu=True)               # (24, N)
    flow = conv3x3(f, wf3_ref, bf3_ref, relu=False)           # (2, N)
    fx = flow[0:1, :]
    fy = flow[1:2, :]

    # ---- bilinear warp (grid_sample, border padding, align_corners=True) ----
    ix = jnp.clip(xcf + fx, 0.0, float(W - 1))
    iy = jnp.clip(ycf + fy, 0.0, float(H - 1))
    x0 = jnp.floor(ix)
    y0 = jnp.floor(iy)
    wx1 = ix - x0
    wx0 = 1.0 - wx1
    wy1 = iy - y0
    wy0 = 1.0 - wy1
    x1 = jnp.minimum(x0 + 1.0, float(W - 1))
    y1 = jnp.minimum(y0 + 1.0, float(H - 1))

    # Source-pixel index along sublanes; compared against per-output src index.
    src_iota = jax.lax.broadcasted_iota(jnp.int32, (N, N), 0).astype(jnp.float32)

    def gather_tap(ys, xs, wgt):
        src = ys * W + xs                                     # (1, N), exact ints
        sel = jnp.where(src_iota == src, wgt, 0.0)            # (N, N), one tap only
        return jnp.dot(prev, sel, preferred_element_type=jnp.float32)  # (C, N)

    warped = gather_tap(y0, x0, wy0 * wx0)
    warped = warped + gather_tap(y0, x1, wy0 * wx1)
    warped = warped + gather_tap(y1, x0, wy1 * wx0)
    warped = warped + gather_tap(y1, x1, wy1 * wx1)

    # ---- ConvGRU-style fusion (add+ReLU fused in) ----
    h_state = conv3x3(warped, wh_ref, bh_ref, relu=False)     # (hidden, N)
    x_state = conv3x3(cur, wx_ref, bx_ref, relu=False)        # (hidden, N)
    combined = jnp.maximum(h_state + x_state, 0.0)
    out = conv3x3(combined, wo_ref, bo_ref, relu=False)       # (C, N)

    out_ref[0] = out.astype(out_ref.dtype)


# ----------------------------------------------------------------------------
# Wrapper: NCHW in / NCHW out (matches the PyTorch module)
# ----------------------------------------------------------------------------
def _flatten_w(w_hwio):
    # HWIO (3,3,Cin,Cout) -> (Cout, 9*Cin), tap-major (ky, kx), cin innermost.
    kh, kw, cin, cout = w_hwio.shape
    return jnp.transpose(w_hwio, (3, 0, 1, 2)).reshape(cout, kh * kw * cin)


def temporal_consistency_forward(params, current_nchw, previous_nchw=None):
    if previous_nchw is None:
        return current_nchw

    B, C, H, W = current_nchw.shape
    N = H * W
    cur = current_nchw.reshape(B, C, N).astype(jnp.float32)
    prev = previous_nchw.reshape(B, C, N).astype(jnp.float32)

    weight_args = []
    for name in ("f1", "f2", "f3", "h", "x", "o"):
        weight_args.append(_flatten_w(params["w_" + name]))
        weight_args.append(params["b_" + name].reshape(-1, 1))

    def const_spec(a):
        nd = a.ndim
        return pl.BlockSpec(a.shape, lambda i, nd=nd: (0,) * nd)

    in_specs = ([pl.BlockSpec((1, C, N), lambda i: (i, 0, 0)),
                 pl.BlockSpec((1, C, N), lambda i: (i, 0, 0))]
                + [const_spec(a) for a in weight_args])

    kernel = functools.partial(_fused_kernel, H=H, W=W)

    out = pl.pallas_call(
        kernel,
        out_shape=jax.ShapeDtypeStruct((B, C, N), jnp.float32),
        grid=(B,),
        in_specs=in_specs,
        out_specs=pl.BlockSpec((1, C, N), lambda i: (i, 0, 0)),
        compiler_params=pltpu.CompilerParams(
            dimension_semantics=("parallel",)),
    )(cur, prev, *weight_args)

    # TODO(synk): for B == 1 on v7x (2 TensorCores) add a spatial grid split so
    # both cores get work; neutral on v5e/v6e.
    return out.reshape(B, C, H, W)


# ----------------------------------------------------------------------------
# Parameters (HWIO weights, (Cout,) biases)
# ----------------------------------------------------------------------------
def _conv_params(key, cin, cout, kh=3, kw=3):
    kw_, kb_ = jax.random.split(key)
    fan_in = cin * kh * kw
    bound = 1.0 / math.sqrt(fan_in)
    w = jax.random.uniform(kw_, (kh, kw, cin, cout), jnp.float32, -bound, bound)
    b = jax.random.uniform(kb_, (cout,), jnp.float32, -bound, bound)
    return w, b


def init_params(key, in_channels, hidden_dim):
    keys = jax.random.split(key, 6)
    p = {}
    p["w_h"], p["b_h"] = _conv_params(keys[0], in_channels, hidden_dim)
    p["w_x"], p["b_x"] = _conv_params(keys[1], in_channels, hidden_dim)
    p["w_o"], p["b_o"] = _conv_params(keys[2], hidden_dim, in_channels)
    p["w_f1"], p["b_f1"] = _conv_params(keys[3], in_channels * 2, 24)
    p["w_f2"], p["b_f2"] = _conv_params(keys[4], 24, 24)
    p["w_f3"], p["b_f3"] = _conv_params(keys[5], 24, 2)
    return p


# ----------------------------------------------------------------------------
# Pure-JAX reference (correctness check of the Pallas path)
# ----------------------------------------------------------------------------
def _ref_forward(params, current_nchw, previous_nchw):
    cur = jnp.transpose(current_nchw, (0, 2, 3, 1)).astype(jnp.float32)
    prev = jnp.transpose(previous_nchw, (0, 2, 3, 1)).astype(jnp.float32)

    def conv(x, w, b):
        y = jax.lax.conv_general_dilated(
            x, w, (1, 1), "SAME",
            dimension_numbers=("NHWC", "HWIO", "NHWC"))
        return y + b

    f = jax.nn.relu(conv(jnp.concatenate([cur, prev], -1),
                         params["w_f1"], params["b_f1"]))
    f = jax.nn.relu(conv(f, params["w_f2"], params["b_f2"]))
    flow = conv(f, params["w_f3"], params["b_f3"])

    B, H, W, C = prev.shape
    gy, gx = jnp.meshgrid(jnp.arange(H, dtype=jnp.float32),
                          jnp.arange(W, dtype=jnp.float32), indexing="ij")
    ix = jnp.clip(gx[None] + flow[..., 0], 0.0, W - 1.0)
    iy = jnp.clip(gy[None] + flow[..., 1], 0.0, H - 1.0)
    x0 = jnp.floor(ix); y0 = jnp.floor(iy)
    wx1 = ix - x0; wx0 = 1.0 - wx1
    wy1 = iy - y0; wy0 = 1.0 - wy1
    x0i = x0.astype(jnp.int32); y0i = y0.astype(jnp.int32)
    x1i = jnp.minimum(x0i + 1, W - 1); y1i = jnp.minimum(y0i + 1, H - 1)

    prev_flat = prev.reshape(B, H * W, C)

    def gather(yi, xi):
        idx = (yi * W + xi).reshape(B, H * W, 1)
        idx3 = jnp.broadcast_to(idx, (B, H * W, C))
        return jnp.take_along_axis(prev_flat, idx3, axis=1).reshape(B, H, W, C)

    warped = (gather(y0i, x0i) * (wy0 * wx0)[..., None]
              + gather(y0i, x1i) * (wy0 * wx1)[..., None]
              + gather(y1i, x0i) * (wy1 * wx0)[..., None]
              + gather(y1i, x1i) * (wy1 * wx1)[..., None])

    h = conv(warped, params["w_h"], params["b_h"])
    xs = conv(cur, params["w_x"], params["b_x"])
    comb = jax.nn.relu(h + xs)
    out = conv(comb, params["w_o"], params["b_o"])
    return jnp.transpose(out, (0, 3, 1, 2))


if __name__ == "__main__":
    B, C, H, W = 2, 4, 16, 16
    hidden_dim = 32

    key = jax.random.PRNGKey(0)
    k_par, k_cur, k_prev = jax.random.split(key, 3)
    params = init_params(k_par, C, hidden_dim)
    current = jax.random.normal(k_cur, (B, C, H, W), jnp.float32)
    previous = jax.random.normal(k_prev, (B, C, H, W), jnp.float32)

    out = temporal_consistency_forward(params, current, previous)
    out = jax.block_until_ready(out)
    assert out.shape == (B, C, H, W)

    ref = jax.block_until_ready(_ref_forward(params, current, previous))
    if not bool(jnp.allclose(out, ref, atol=2e-3, rtol=2e-3)):
        raise AssertionError("Pallas output mismatch vs reference")

    # previous=None path returns current unchanged
    passthrough = temporal_consistency_forward(params, current, None)
    assert bool(jnp.array_equal(passthrough, current))

    print("KERNEL_OK")
</pallas_src>

<mosaic_0001>
module attributes {stable_mosaic.version = 11 : i64} {
  func.func @_fused_kernel(%arg0: i32, %arg1: memref<1x4x256xf32, #tpu.memory_space<vmem>>, %arg2: memref<1x4x256xf32, #tpu.memory_space<vmem>>, %arg3: memref<24x72xf32, #tpu.memory_space<vmem>>, %arg4: memref<24x1xf32, #tpu.memory_space<vmem>>, %arg5: memref<24x216xf32, #tpu.memory_space<vmem>>, %arg6: memref<24x1xf32, #tpu.memory_space<vmem>>, %arg7: memref<2x216xf32, #tpu.memory_space<vmem>>, %arg8: memref<2x1xf32, #tpu.memory_space<vmem>>, %arg9: memref<32x36xf32, #tpu.memory_space<vmem>>, %arg10: memref<32x1xf32, #tpu.memory_space<vmem>>, %arg11: memref<32x36xf32, #tpu.memory_space<vmem>>, %arg12: memref<32x1xf32, #tpu.memory_space<vmem>>, %arg13: memref<4x288xf32, #tpu.memory_space<vmem>>, %arg14: memref<4x1xf32, #tpu.memory_space<vmem>>, %arg15: memref<1x4x256xf32, #tpu.memory_space<vmem>>) attributes {dimension_semantics = [#tpu.dimension_semantics<parallel>], iteration_bounds = array<i64: 2>, scalar_prefetch = 0 : i64, scratch_operands = 0 : i64, tpu.core_type = #tpu.core_type<tc>, window_params = [{transform_indices = @transform_0, window_bounds = array<i64: 1, 4, 256>}, {transform_indices = @transform_1, window_bounds = array<i64: 1, 4, 256>}, {pipeline_mode = #tpu.pipeline_mode<synchronous>, transform_indices = @transform_2, window_bounds = array<i64: 24, 72>}, {pipeline_mode = #tpu.pipeline_mode<synchronous>, transform_indices = @transform_3, window_bounds = array<i64: 24, 1>}, {pipeline_mode = #tpu.pipeline_mode<synchronous>, transform_indices = @transform_4, window_bounds = array<i64: 24, 216>}, {pipeline_mode = #tpu.pipeline_mode<synchronous>, transform_indices = @transform_5, window_bounds = array<i64: 24, 1>}, {pipeline_mode = #tpu.pipeline_mode<synchronous>, transform_indices = @transform_6, window_bounds = array<i64: 2, 216>}, {pipeline_mode = #tpu.pipeline_mode<synchronous>, transform_indices = @transform_7, window_bounds = array<i64: 2, 1>}, {pipeline_mode = #tpu.pipeline_mode<synchronous>, transform_indices = @transform_8, window_bounds = array<i64: 32, 36>}, {pipeline_mode = #tpu.pipeline_mode<synchronous>, transform_indices = @transform_9, window_bounds = array<i64: 32, 1>}, {pipeline_mode = #tpu.pipeline_mode<synchronous>, transform_indices = @transform_10, window_bounds = array<i64: 32, 36>}, {pipeline_mode = #tpu.pipeline_mode<synchronous>, transform_indices = @transform_11, window_bounds = array<i64: 32, 1>}, {pipeline_mode = #tpu.pipeline_mode<synchronous>, transform_indices = @transform_12, window_bounds = array<i64: 4, 288>}, {pipeline_mode = #tpu.pipeline_mode<synchronous>, transform_indices = @transform_13, window_bounds = array<i64: 4, 1>}, {transform_indices = @transform_14, window_bounds = array<i64: 1, 4, 256>}]} {
    %c0 = arith.constant 0 : index
    %c0_0 = arith.constant 0 : index
    %c0_1 = arith.constant 0 : index
    %0 = vector.load %arg1[%c0, %c0_0, %c0_1] : memref<1x4x256xf32, #tpu.memory_space<vmem>>, vector<1x4x256xf32>
    %1 = vector.shape_cast %0 : vector<1x4x256xf32> to vector<4x256xf32>
    %c0_2 = arith.constant 0 : index
    %c0_3 = arith.constant 0 : index
    %c0_4 = arith.constant 0 : index
    %2 = vector.load %arg2[%c0_2, %c0_3, %c0_4] : memref<1x4x256xf32, #tpu.memory_space<vmem>>, vector<1x4x256xf32>
    %3 = vector.shape_cast %2 : vector<1x4x256xf32> to vector<4x256xf32>
    %4 = tpu.iota {dimensions = array<i32: 1>} : vector<1x256xi32>
    %5 = arith.sitofp %4 : vector<1x256xi32> to vector<1x256xf32>
    %cst = arith.constant 5.000000e-01 : f32
    %6 = vector.broadcast %cst : f32 to vector<1x256xf32>
    %7 = arith.addf %5, %6 : vector<1x256xf32>
    %cst_5 = arith.constant 6.250000e-02 : f32
    %8 = vector.broadcast %cst_5 : f32 to vector<1x256xf32>
    %9 = arith.mulf %7, %8 : vector<1x256xf32>
    %10 = math.floor %9 : vector<1x256xf32>
    %cst_6 = arith.constant 1.600000e+01 : f32
    %11 = vector.broadcast %cst_6 : f32 to vector<1x256xf32>
    %12 = arith.mulf %10, %11 : vector<1x256xf32>
    %13 = arith.subf %5, %12 : vector<1x256xf32>
    %cst_7 = arith.constant -1.000000e+00 : f32
    %14 = vector.broadcast %cst_7 : f32 to vector<1x256xf32>
    %15 = arith.addf %13, %14 : vector<1x256xf32>
    %cst_8 = arith.constant -5.000000e-01 : f32
    %16 = vector.broadcast %cst_8 : f32 to vector<1x256xf32>
    %17 = arith.cmpf ogt, %15, %16 : vector<1x256xf32>
    %cst_9 = arith.constant -1.000000e+00 : f32
    %18 = vector.broadcast %cst_9 : f32 to vector<1x256xf32>
    %19 = arith.addf %13, %18 : vector<1x256xf32>
    %cst_10 = arith.constant 1.550000e+01 : f32
    %20 = vector.broadcast %cst_10 : f32 to vector<1x256xf32>
    %21 = arith.cmpf olt, %19, %20 : vector<1x256xf32>
    %22 = arith.andi %17, %21 : vector<1x256xi1>
    %cst_11 = arith.constant -1.000000e+00 : f32
    %23 = vector.broadcast %cst_11 : f32 to vector<1x256xf32>
    %24 = arith.addf %10, %23 : vector<1x256xf32>
    %cst_12 = arith.constant -5.000000e-01 : f32
    %25 = vector.broadcast %cst_12 : f32 to vector<1x256xf32>
    %26 = arith.cmpf ogt, %24, %25 : vector<1x256xf32>
    %27 = arith.andi %22, %26 : vector<1x256xi1>
    %cst_13 = arith.constant -1.000000e+00 : f32
    %28 = vector.broadcast %cst_13 : f32 to vector<1x256xf32>
    %29 = arith.addf %10, %28 : vector<1x256xf32>
    %cst_14 = arith.constant 1.550000e+01 : f32
    %30 = vector.broadcast %cst_14 : f32 to vector<1x256xf32>
    %31 = arith.cmpf olt, %29, %30 : vector<1x256xf32>
    %32 = arith.andi %27, %31 : vector<1x256xi1>
    %cst_15 = arith.constant 1.000000e+00 : f32
    %cst_16 = arith.constant 0.000000e+00 : f32
    %33 = vector.broadcast %cst_15 : f32 to vector<1x256xf32>
    %34 = vector.broadcast %cst_16 : f32 to vector<1x256xf32>
    %35 = arith.select %32, %33, %34 : vector<1x256xi1>, vector<1x256xf32>
    %cst_17 = arith.constant 0.000000e+00 : f32
    %36 = vector.broadcast %cst_17 : f32 to vector<1x256xf32>
    %37 = arith.addf %13, %36 : vector<1x256xf32>
    %cst_18 = arith.constant -5.000000e-01 : f32
    %38 = vector.broadcast %cst_18 : f32 to vector<1x256xf32>
    %39 = arith.cmpf ogt, %37, %38 : vector<1x256xf32>
    %cst_19 = arith.constant 0.000000e+00 : f32
    %40 = vector.broadcast %cst_19 : f32 to vector<1x256xf32>
    %41 = arith.addf %13, %40 : vector<1x256xf32>
    %cst_20 = arith.constant 1.550000e+01 : f32
    %42 = vector.broadcast %cst_20 : f32 to vector<1x256xf32>
    %43 = arith.cmpf olt, %41, %42 : vector<1x256xf32>
    %44 = arith.andi %39, %43 : vector<1x256xi1>
    %cst_21 = arith.constant -1.000000e+00 : f32
    %45 = vector.broadcast %cst_21 : f32 to vector<1x256xf32>
    %46 = arith.addf %10, %45 : vector<1x256xf32>
    %cst_22 = arith.constant -5.000000e-01 : f32
    %47 = vector.broadcast %cst_22 : f32 to vector<1x256xf32>
    %48 = arith.cmpf ogt, %46, %47 : vector<1x256xf32>
    %49 = arith.andi %44, %48 : vector<1x256xi1>
    %cst_23 = arith.constant -1.000000e+00 : f32
    %50 = vector.broadcast %cst_23 : f32 to vector<1x256xf32>
    %51 = arith.addf %10, %50 : vector<1x256xf32>
    %cst_24 = arith.constant 1.550000e+01 : f32
    %52 = vector.broadcast %cst_24 : f32 to vector<1x256xf32>
    %53 = arith.cmpf olt, %51, %52 : vector<1x256xf32>
    %54 = arith.andi %49, %53 : vector<1x256xi1>
    %cst_25 = arith.constant 1.000000e+00 : f32
    %cst_26 = arith.constant 0.000000e+00 : f32
    %55 = vector.broadcast %cst_25 : f32 to vector<1x256xf32>
    %56 = vector.broadcast %cst_26 : f32 to vector<1x256xf32>
    %57 = arith.select %54, %55, %56 : vector<1x256xi1>, vector<1x256xf32>
    %cst_27 = arith.constant 1.000000e+00 : f32
    %58 = vector.broadcast %cst_27 : f32 to vector<1x256xf32>
    %59 = arith.addf %13, %58 : vector<1x256xf32>
    %cst_28 = arith.constant -5.000000e-01 : f32
    %60 = vector.broadcast %cst_28 : f32 to vector<1x256xf32>
    %61 = arith.cmpf ogt, %59, %60 : vector<1x256xf32>
    %cst_29 = arith.constant 1.000000e+00 : f32
    %62 = vector.broadcast %cst_29 : f32 to vector<1x256xf32>
    %63 = arith.addf %13, %62 : vector<1x256xf32>
    %cst_30 = arith.constant 1.550000e+01 : f32
    %64 = vector.broadcast %cst_30 : f32 to vector<1x256xf32>
    %65 = arith.cmpf olt, %63, %64 : vector<1x256xf32>
    %66 = arith.andi %61, %65 : vector<1x256xi1>
    %cst_31 = arith.constant -1.000000e+00 : f32
    %67 = vector.broadcast %cst_31 : f32 to vector<1x256xf32>
    %68 = arith.addf %10, %67 : vector<1x256xf32>
    %cst_32 = arith.constant -5.000000e-01 : f32
    %69 = vector.broadcast %cst_32 : f32 to vector<1x256xf32>
    %70 = arith.cmpf ogt, %68, %69 : vector<1x256xf32>
    %71 = arith.andi %66, %70 : vector<1x256xi1>
    %cst_33 = arith.constant -1.000000e+00 : f32
    %72 = vector.broadcast %cst_33 : f32 to vector<1x256xf32>
    %73 = arith.addf %10, %72 : vector<1x256xf32>
    %cst_34 = arith.constant 1.550000e+01 : f32
    %74 = vector.broadcast %cst_34 : f32 to vector<1x256xf32>
    %75 = arith.cmpf olt, %73, %74 : vector<1x256xf32>
    %76 = arith.andi %71, %75 : vector<1x256xi1>
    %cst_35 = arith.constant 1.000000e+00 : f32
    %cst_36 = arith.constant 0.000000e+00 : f32
    %77 = vector.broadcast %cst_35 : f32 to vector<1x256xf32>
    %78 = vector.broadcast %cst_36 : f32 to vector<1x256xf32>
    %79 = arith.select %76, %77, %78 : vector<1x256xi1>, vector<1x256xf32>
    %cst_37 = arith.constant -1.000000e+00 : f32
    %80 = vector.broadcast %cst_37 : f32 to vector<1x256xf32>
    %81 = arith.addf %13, %80 : vector<1x256xf32>
    %cst_38 = arith.constant -5.000000e-01 : f32
    %82 = vector.broadcast %cst_38 : f32 to vector<1x256xf32>
    %83 = arith.cmpf ogt, %81, %82 : vector<1x256xf32>
    %cst_39 = arith.constant -1.000000e+00 : f32
    %84 = vector.broadcast %cst_39 : f32 to vector<1x256xf32>
    %85 = arith.addf %13, %84 : vector<1x256xf32>
    %cst_40 = arith.constant 1.550000e+01 : f32
    %86 = vector.broadcast %cst_40 : f32 to vector<1x256xf32>
    %87 = arith.cmpf olt, %85, %86 : vector<1x256xf32>
    %88 = arith.andi %83, %87 : vector<1x256xi1>
    %cst_41 = arith.constant 0.000000e+00 : f32
    %89 = vector.broadcast %cst_41 : f32 to vector<1x256xf32>
    %90 = arith.addf %10, %89 : vector<1x256xf32>
    %cst_42 = arith.constant -5.000000e-01 : f32
    %91 = vector.broadcast %cst_42 : f32 to vector<1x256xf32>
    %92 = arith.cmpf ogt, %90, %91 : vector<1x256xf32>
    %93 = arith.andi %88, %92 : vector<1x256xi1>
    %cst_43 = arith.constant 0.000000e+00 : f32
    %94 = vector.broadcast %cst_43 : f32 to vector<1x256xf32>
    %95 = arith.addf %10, %94 : vector<1x256xf32>
    %cst_44 = arith.constant 1.550000e+01 : f32
    %96 = vector.broadcast %cst_44 : f32 to vector<1x256xf32>
    %97 = arith.cmpf olt, %95, %96 : vector<1x256xf32>
    %98 = arith.andi %93, %97 : vector<1x256xi1>
    %cst_45 = arith.constant 1.000000e+00 : f32
    %cst_46 = arith.constant 0.000000e+00 : f32
    %99 = vector.broadcast %cst_45 : f32 to vector<1x256xf32>
    %100 = vector.broadcast %cst_46 : f32 to vector<1x256xf32>
    %101 = arith.select %98, %99, %100 : vector<1x256xi1>, vector<1x256xf32>
    %cst_47 = arith.constant 0.000000e+00 : f32
    %102 = vector.broadcast %cst_47 : f32 to vector<1x256xf32>
    %103 = arith.addf %13, %102 : vector<1x256xf32>
    %cst_48 = arith.constant -5.000000e-01 : f32
    %104 = vector.broadcast %cst_48 : f32 to vector<1x256xf32>
    %105 = arith.cmpf ogt, %103, %104 : vector<1x256xf32>
    %cst_49 = arith.constant 0.000000e+00 : f32
    %106 = vector.broadcast %cst_49 : f32 to vector<1x256xf32>
    %107 = arith.addf %13, %106 : vector<1x256xf32>
    %cst_50 = arith.constant 1.550000e+01 : f32
    %108 = vector.broadcast %cst_50 : f32 to vector<1x256xf32>
    %109 = arith.cmpf olt, %107, %108 : vector<1x256xf32>
    %110 = arith.andi %105, %109 : vector<1x256xi1>
    %cst_51 = arith.constant 0.000000e+00 : f32
    %111 = vector.broadcast %cst_51 : f32 to vector<1x256xf32>
    %112 = arith.addf %10, %111 : vector<1x256xf32>
    %cst_52 = arith.constant -5.000000e-01 : f32
    %113 = vector.broadcast %cst_52 : f32 to vector<1x256xf32>
    %114 = arith.cmpf ogt, %112, %113 : vector<1x256xf32>
    %115 = arith.andi %110, %114 : vector<1x256xi1>
    %cst_53 = arith.constant 0.000000e+00 : f32
    %116 = vector.broadcast %cst_53 : f32 to vector<1x256xf32>
    %117 = arith.addf %10, %116 : vector<1x256xf32>
    %cst_54 = arith.constant 1.550000e+01 : f32
    %118 = vector.broadcast %cst_54 : f32 to vector<1x256xf32>
    %119 = arith.cmpf olt, %117, %118 : vector<1x256xf32>
    %120 = arith.andi %115, %119 : vector<1x256xi1>
    %cst_55 = arith.constant 1.000000e+00 : f32
    %cst_56 = arith.constant 0.000000e+00 : f32
    %121 = vector.broadcast %cst_55 : f32 to vector<1x256xf32>
    %122 = vector.broadcast %cst_56 : f32 to vector<1x256xf32>
    %123 = arith.select %120, %121, %122 : vector<1x256xi1>, vector<1x256xf32>
    %cst_57 = arith.constant 1.000000e+00 : f32
    %124 = vector.broadcast %cst_57 : f32 to vector<1x256xf32>
    %125 = arith.addf %13, %124 : vector<1x256xf32>
    %cst_58 = arith.constant -5.000000e-01 : f32
    %126 = vector.broadcast %cst_58 : f32 to vector<1x256xf32>
    %127 = arith.cmpf ogt, %125, %126 : vector<1x256xf32>
    %cst_59 = arith.constant 1.000000e+00 : f32
    %128 = vector.broadcast %cst_59 : f32 to vector<1x256xf32>
    %129 = arith.addf %13, %128 : vector<1x256xf32>
    %cst_60 = arith.constant 1.550000e+01 : f32
    %130 = vector.broadcast %cst_60 : f32 to vector<1x256xf32>
    %131 = arith.cmpf olt, %129, %130 : vector<1x256xf32>
    %132 = arith.andi %127, %131 : vector<1x256xi1>
    %cst_61 = arith.constant 0.000000e+00 : f32
    %133 = vector.broadcast %cst_61 : f32 to vector<1x256xf32>
    %134 = arith.addf %10, %133 : vector<1x256xf32>
    %cst_62 = arith.constant -5.000000e-01 : f32
    %135 = vector.broadcast %cst_62 : f32 to vector<1x256xf32>
    %136 = arith.cmpf ogt, %134, %135 : vector<1x256xf32>
    %137 = arith.andi %132, %136 : vector<1x256xi1>
    %cst_63 = arith.constant 0.000000e+00 : f32
    %138 = vector.broadcast %cst_63 : f32 to vector<1x256xf32>
    %139 = arith.addf %10, %138 : vector<1x256xf32>
    %cst_64 = arith.constant 1.550000e+01 : f32
    %140 = vector.broadcast %cst_64 : f32 to vector<1x256xf32>
    %141 = arith.cmpf olt, %139, %140 : vector<1x256xf32>
    %142 = arith.andi %137, %141 : vector<1x256xi1>
    %cst_65 = arith.constant 1.000000e+00 : f32
    %cst_66 = arith.constant 0.000000e+00 : f32
    %143 = vector.broadcast %cst_65 : f32 to vector<1x256xf32>
    %144 = vector.broadcast %cst_66 : f32 to vector<1x256xf32>
    %145 = arith.select %142, %143, %144 : vector<1x256xi1>, vector<1x256xf32>
    %cst_67 = arith.constant -1.000000e+00 : f32
    %146 = vector.broadcast %cst_67 : f32 to vector<1x256xf32>
    %147 = arith.addf %13, %146 : vector<1x256xf32>
    %cst_68 = arith.constant -5.000000e-01 : f32
    %148 = vector.broadcast %cst_68 : f32 to vector<1x256xf32>
    %149 = arith.cmpf ogt, %147, %148 : vector<1x256xf32>
    %cst_69 = arith.constant -1.000000e+00 : f32
    %150 = vector.broadcast %cst_69 : f32 to vector<1x256xf32>
    %151 = arith.addf %13, %150 : vector<1x256xf32>
    %cst_70 = arith.constant 1.550000e+01 : f32
    %152 = vector.broadcast %cst_70 : f32 to vector<1x256xf32>
    %153 = arith.cmpf olt, %151, %152 : vector<1x256xf32>
    %154 = arith.andi %149, %153 : vector<1x256xi1>
    %cst_71 = arith.constant 1.000000e+00 : f32
    %155 = vector.broadcast %cst_71 : f32 to vector<1x256xf32>
    %156 = arith.addf %10, %155 : vector<1x256xf32>
    %cst_72 = arith.constant -5.000000e-01 : f32
    %157 = vector.broadcast %cst_72 : f32 to vector<1x256xf32>
    %158 = arith.cmpf ogt, %156, %157 : vector<1x256xf32>
    %159 = arith.andi %154, %158 : vector<1x256xi1>
    %cst_73 = arith.constant 1.000000e+00 : f32
    %160 = vector.broadcast %cst_73 : f32 to vector<1x256xf32>
    %161 = arith.addf %10, %160 : vector<1x256xf32>
    %cst_74 = arith.constant 1.550000e+01 : f32
    %162 = vector.broadcast %cst_74 : f32 to vector<1x256xf32>
    %163 = arith.cmpf olt, %161, %162 : vector<1x256xf32>
    %164 = arith.andi %159, %163 : vector<1x256xi1>
    %cst_75 = arith.constant 1.000000e+00 : f32
    %cst_76 = arith.constant 0.000000e+00 : f32
    %165 = vector.broadcast %cst_75 : f32 to vector<1x256xf32>
    %166 = vector.broadcast %cst_76 : f32 to vector<1x256xf32>
    %167 = arith.select %164, %165, %166 : vector<1x256xi1>, vector<1x256xf32>
    %cst_77 = arith.constant 0.000000e+00 : f32
    %168 = vector.broadcast %cst_77 : f32 to vector<1x256xf32>
    %169 = arith.addf %13, %168 : vector<1x256xf32>
    %cst_78 = arith.constant -5.000000e-01 : f32
    %170 = vector.broadcast %cst_78 : f32 to vector<1x256xf32>
    %171 = arith.cmpf ogt, %169, %170 : vector<1x256xf32>
    %cst_79 = arith.constant 0.000000e+00 : f32
    %172 = vector.broadcast %cst_79 : f32 to vector<1x256xf32>
    %173 = arith.addf %13, %172 : vector<1x256xf32>
    %cst_80 = arith.constant 1.550000e+01 : f32
    %174 = vector.broadcast %cst_80 : f32 to vector<1x256xf32>
    %175 = arith.cmpf olt, %173, %174 : vector<1x256xf32>
    %176 = arith.andi %171, %175 : vector<1x256xi1>
    %cst_81 = arith.constant 1.000000e+00 : f32
    %177 = vector.broadcast %cst_81 : f32 to vector<1x256xf32>
    %178 = arith.addf %10, %177 : vector<1x256xf32>
    %cst_82 = arith.constant -5.000000e-01 : f32
    %179 = vector.broadcast %cst_82 : f32 to vector<1x256xf32>
    %180 = arith.cmpf ogt, %178, %179 : vector<1x256xf32>
    %181 = arith.andi %176, %180 : vector<1x256xi1>
    %cst_83 = arith.constant 1.000000e+00 : f32
    %182 = vector.broadcast %cst_83 : f32 to vector<1x256xf32>
    %183 = arith.addf %10, %182 : vector<1x256xf32>
    %cst_84 = arith.constant 1.550000e+01 : f32
    %184 = vector.broadcast %cst_84 : f32 to vector<1x256xf32>
    %185 = arith.cmpf olt, %183, %184 : vector<1x256xf32>
    %186 = arith.andi %181, %185 : vector<1x256xi1>
    %cst_85 = arith.constant 1.000000e+00 : f32
    %cst_86 = arith.constant 0.000000e+00 : f32
    %187 = vector.broadcast %cst_85 : f32 to vector<1x256xf32>
    %188 = vector.broadcast %cst_86 : f32 to vector<1x256xf32>
    %189 = arith.select %186, %187, %188 : vector<1x256xi1>, vector<1x256xf32>
    %cst_87 = arith.constant 1.000000e+00 : f32
    %190 = vector.broadcast %cst_87 : f32 to vector<1x256xf32>
    %191 = arith.addf %13, %190 : vector<1x256xf32>
    %cst_88 = arith.constant -5.000000e-01 : f32
    %192 = vector.broadcast %cst_88 : f32 to vector<1x256xf32>
    %193 = arith.cmpf ogt, %191, %192 : vector<1x256xf32>
    %cst_89 = arith.constant 1.000000e+00 : f32
    %194 = vector.broadcast %cst_89 : f32 to vector<1x256xf32>
    %195 = arith.addf %13, %194 : vector<1x256xf32>
    %cst_90 = arith.constant 1.550000e+01 : f32
    %196 = vector.broadcast %cst_90 : f32 to vector<1x256xf32>
    %197 = arith.cmpf olt, %195, %196 : vector<1x256xf32>
    %198 = arith.andi %193, %197 : vector<1x256xi1>
    %cst_91 = arith.constant 1.000000e+00 : f32
    %199 = vector.broadcast %cst_91 : f32 to vector<1x256xf32>
    %200 = arith.addf %10, %199 : vector<1x256xf32>
    %cst_92 = arith.constant -5.000000e-01 : f32
    %201 = vector.broadcast %cst_92 : f32 to vector<1x256xf32>
    %202 = arith.cmpf ogt, %200, %201 : vector<1x256xf32>
    %203 = arith.andi %198, %202 : vector<1x256xi1>
    %cst_93 = arith.constant 1.000000e+00 : f32
    %204 = vector.broadcast %cst_93 : f32 to vector<1x256xf32>
    %205 = arith.addf %10, %204 : vector<1x256xf32>
    %cst_94 = arith.constant 1.550000e+01 : f32
    %206 = vector.broadcast %cst_94 : f32 to vector<1x256xf32>
    %207 = arith.cmpf olt, %205, %206 : vector<1x256xf32>
    %208 = arith.andi %203, %207 : vector<1x256xi1>
    %cst_95 = arith.constant 1.000000e+00 : f32
    %cst_96 = arith.constant 0.000000e+00 : f32
    %209 = vector.broadcast %cst_95 : f32 to vector<1x256xf32>
    %210 = vector.broadcast %cst_96 : f32 to vector<1x256xf32>
    %211 = arith.select %208, %209, %210 : vector<1x256xi1>, vector<1x256xf32>
    %212 = tpu.concatenate %1, %3 in 0 : vector<4x256xf32>, vector<4x256xf32> -> vector<8x256xf32>
    %213 = vector.extract_strided_slice %212 {offsets = [0, 239], sizes = [8, 17], strides = [1, 1]} : vector<8x256xf32> to vector<8x17xf32>
    %214 = vector.extract_strided_slice %212 {offsets = [0, 0], sizes = [8, 239], strides = [1, 1]} : vector<8x256xf32> to vector<8x239xf32>
    %215 = tpu.concatenate %213, %214 in 1 : vector<8x17xf32>, vector<8x239xf32> -> vector<8x256xf32>
    %216 = vector.broadcast %35 : vector<1x256xf32> to vector<8x256xf32>
    %217 = arith.mulf %215, %216 : vector<8x256xf32>
    %218 = vector.extract_strided_slice %212 {offsets = [0, 240], sizes = [8, 16], strides = [1, 1]} : vector<8x256xf32> to vector<8x16xf32>
    %219 = vector.extract_strided_slice %212 {offsets = [0, 0], sizes = [8, 240], strides = [1, 1]} : vector<8x256xf32> to vector<8x240xf32>
    %220 = tpu.concatenate %218, %219 in 1 : vector<8x16xf32>, vector<8x240xf32> -> vector<8x256xf32>
    %221 = vector.broadcast %57 : vector<1x256xf32> to vector<8x256xf32>
    %222 = arith.mulf %220, %221 : vector<8x256xf32>
    %223 = vector.extract_strided_slice %212 {offsets = [0, 241], sizes = [8, 15], strides = [1, 1]} : vector<8x256xf32> to vector<8x15xf32>
    %224 = vector.extract_strided_slice %212 {offsets = [0, 0], sizes = [8, 241], strides = [1, 1]} : vector<8x256xf32> to vector<8x241xf32>
    %225 = tpu.concatenate %223, %224 in 1 : vector<8x15xf32>, vector<8x241xf32> -> vector<8x256xf32>
    %226 = vector.broadcast %79 : vector<1x256xf32> to vector<8x256xf32>
    %227 = arith.mulf %225, %226 : vector<8x256xf32>
    %228 = vector.extract_strided_slice %212 {offsets = [0, 255], sizes = [8, 1], strides = [1, 1]} : vector<8x256xf32> to vector<8x1xf32>
    %229 = vector.extract_strided_slice %212 {offsets = [0, 0], sizes = [8, 255], strides = [1, 1]} : vector<8x256xf32> to vector<8x255xf32>
    %230 = tpu.concatenate %228, %229 in 1 : vector<8x1xf32>, vector<8x255xf32> -> vector<8x256xf32>
    %231 = vector.broadcast %101 : vector<1x256xf32> to vector<8x256xf32>
    %232 = arith.mulf %230, %231 : vector<8x256xf32>
    %233 = vector.broadcast %123 : vector<1x256xf32> to vector<8x256xf32>
    %234 = arith.mulf %212, %233 : vector<8x256xf32>
    %235 = vector.extract_strided_slice %212 {offsets = [0, 1], sizes = [8, 255], strides = [1, 1]} : vector<8x256xf32> to vector<8x255xf32>
    %236 = vector.extract_strided_slice %212 {offsets = [0, 0], sizes = [8, 1], strides = [1, 1]} : vector<8x256xf32> to vector<8x1xf32>
    %237 = tpu.concatenate %235, %236 in 1 : vector<8x255xf32>, vector<8x1xf32> -> vector<8x256xf32>
    %238 = vector.broadcast %145 : vector<1x256xf32> to vector<8x256xf32>
    %239 = arith.mulf %237, %238 : vector<8x256xf32>
    %240 = vector.extract_strided_slice %212 {offsets = [0, 15], sizes = [8, 241], strides = [1, 1]} : vector<8x256xf32> to vector<8x241xf32>
    %241 = vector.extract_strided_slice %212 {offsets = [0, 0], sizes = [8, 15], strides = [1, 1]} : vector<8x256xf32> to vector<8x15xf32>
    %242 = tpu.concatenate %240, %241 in 1 : vector<8x241xf32>, vector<8x15xf32> -> vector<8x256xf32>
    %243 = vector.broadcast %167 : vector<1x256xf32> to vector<8x256xf32>
    %244 = arith.mulf %242, %243 : vector<8x256xf32>
    %245 = vector.extract_strided_slice %212 {offsets = [0, 16], sizes = [8, 240], strides = [1, 1]} : vector<8x256xf32> to vector<8x240xf32>
    %246 = vector.extract_strided_slice %212 {offsets = [0, 0], sizes = [8, 16], strides = [1, 1]} : vector<8x256xf32> to vector<8x16xf32>
    %247 = tpu.concatenate %245, %246 in 1 : vector<8x240xf32>, vector<8x16xf32> -> vector<8x256xf32>
    %248 = vector.broadcast %189 : vector<1x256xf32> to vector<8x256xf32>
    %249 = arith.mulf %247, %248 : vector<8x256xf32>
    %250 = vector.extract_strided_slice %212 {offsets = [0, 17], sizes = [8, 239], strides = [1, 1]} : vector<8x256xf32> to vector<8x239xf32>
    %251 = vector.extract_strided_slice %212 {offsets = [0, 0], sizes = [8, 17], strides = [1, 1]} : vector<8x256xf32> to vector<8x17xf32>
    %252 = tpu.concatenate %250, %251 in 1 : vector<8x239xf32>, vector<8x17xf32> -> vector<8x256xf32>
    %253 = vector.broadcast %211 : vector<1x256xf32> to vector<8x256xf32>
    %254 = arith.mulf %252, %253 : vector<8x256xf32>
    %255 = tpu.concatenate %217, %222, %227, %232, %234, %239, %244, %249, %254 in 0 : vector<8x256xf32>, vector<8x256xf32>, vector<8x256xf32>, vector<8x256xf32>, vector<8x256xf32>, vector<8x256xf32>, vector<8x256xf32>, vector<8x256xf32>, vector<8x256xf32> -> vector<72x256xf32>
    %c0_97 = arith.constant 0 : index
    %c0_98 = arith.constant 0 : index
    %256 = vector.load %arg3[%c0_97, %c0_98] : memref<24x72xf32, #tpu.memory_space<vmem>>, vector<24x72xf32>
    %cst_99 = arith.constant dense<0.000000e+00> : vector<24x256xf32>
    %257 = tpu.matmul %256, %255, %cst_99 {dimension_numbers = #tpu.dot_dimension_numbers<[1], [0], [0], [1], [0, 0, 1, 1], [], []>} : vector<24x72xf32>, vector<72x256xf32>, vector<24x256xf32> -> vector<24x256xf32>
    %c0_100 = arith.constant 0 : index
    %c0_101 = arith.constant 0 : index
    %258 = vector.load %arg4[%c0_100, %c0_101] : memref<24x1xf32, #tpu.memory_space<vmem>>, vector<24x1xf32>
    %259 = vector.broadcast %258 : vector<24x1xf32> to vector<24x256xf32>
    %260 = arith.addf %257, %259 : vector<24x256xf32>
    %cst_102 = arith.constant 0.000000e+00 : f32
    %261 = vector.broadcast %cst_102 : f32 to vector<24x256xf32>
    %262 = arith.maximumf %260, %261 : vector<24x256xf32>
    %263 = vector.extract_strided_slice %262 {offsets = [0, 239], sizes = [24, 17], strides = [1, 1]} : vector<24x256xf32> to vector<24x17xf32>
    %264 = vector.extract_strided_slice %262 {offsets = [0, 0], sizes = [24, 239], strides = [1, 1]} : vector<24x256xf32> to vector<24x239xf32>
    %265 = tpu.concatenate %263, %264 in 1 : vector<24x17xf32>, vector<24x239xf32> -> vector<24x256xf32>
    %266 = vector.broadcast %35 : vector<1x256xf32> to vector<24x256xf32>
    %267 = arith.mulf %265, %266 : vector<24x256xf32>
    %268 = vector.extract_strided_slice %262 {offsets = [0, 240], sizes = [24, 16], strides = [1, 1]} : vector<24x256xf32> to vector<24x16xf32>
    %269 = vector.extract_strided_slice %262 {offsets = [0, 0], sizes = [24, 240], strides = [1, 1]} : vector<24x256xf32> to vector<24x240xf32>
    %270 = tpu.concatenate %268, %269 in 1 : vector<24x16xf32>, vector<24x240xf32> -> vector<24x256xf32>
    %271 = vector.broadcast %57 : vector<1x256xf32> to vector<24x256xf32>
    %272 = arith.mulf %270, %271 : vector<24x256xf32>
    %273 = vector.extract_strided_slice %262 {offsets = [0, 241], sizes = [24, 15], strides = [1, 1]} : vector<24x256xf32> to vector<24x15xf32>
    %274 = vector.extract_strided_slice %262 {offsets = [0, 0], sizes = [24, 241], strides = [1, 1]} : vector<24x256xf32> to vector<24x241xf32>
    %275 = tpu.concatenate %273, %274 in 1 : vector<24x15xf32>, vector<24x241xf32> -> vector<24x256xf32>
    %276 = vector.broadcast %79 : vector<1x256xf32> to vector<24x256xf32>
    %277 = arith.mulf %275, %276 : vector<24x256xf32>
    %278 = vector.extract_strided_slice %262 {offsets = [0, 255], sizes = [24, 1], strides = [1, 1]} : vector<24x256xf32> to vector<24x1xf32>
    %279 = vector.extract_strided_slice %262 {offsets = [0, 0], sizes = [24, 255], strides = [1, 1]} : vector<24x256xf32> to vector<24x255xf32>
    %280 = tpu.concatenate %278, %279 in 1 : vector<24x1xf32>, vector<24x255xf32> -> vector<24x256xf32>
    %281 = vector.broadcast %101 : vector<1x256xf32> to vector<24x256xf32>
    %282 = arith.mulf %280, %281 : vector<24x256xf32>
    %283 = vector.broadcast %123 : vector<1x256xf32> to vector<24x256xf32>
    %284 = arith.mulf %262, %283 : vector<24x256xf32>
    %285 = vector.extract_strided_slice %262 {offsets = [0, 1], sizes = [24, 255], strides = [1, 1]} : vector<24x256xf32> to vector<24x255xf32>
    %286 = vector.extract_strided_slice %262 {offsets = [0, 0], sizes = [24, 1], strides = [1, 1]} : vector<24x256xf32> to vector<24x1xf32>
    %287 = tpu.concatenate %285, %286 in 1 : vector<24x255xf32>, vector<24x1xf32> -> vector<24x256xf32>
    %288 = vector.broadcast %145 : vector<1x256xf32> to vector<24x256xf32>
    %289 = arith.mulf %287, %288 : vector<24x256xf32>
    %290 = vector.extract_strided_slice %262 {offsets = [0, 15], sizes = [24, 241], strides = [1, 1]} : vector<24x256xf32> to vector<24x241xf32>
    %291 = vector.extract_strided_slice %262 {offsets = [0, 0], sizes = [24, 15], strides = [1, 1]} : vector<24x256xf32> to vector<24x15xf32>
    %292 = tpu.concatenate %290, %291 in 1 : vector<24x241xf32>, vector<24x15xf32> -> vector<24x256xf32>
    %293 = vector.broadcast %167 : vector<1x256xf32> to vector<24x256xf32>
    %294 = arith.mulf %292, %293 : vector<24x256xf32>
    %295 = vector.extract_strided_slice %262 {offsets = [0, 16], sizes = [24, 240], strides = [1, 1]} : vector<24x256xf32> to vector<24x240xf32>
    %296 = vector.extract_strided_slice %262 {offsets = [0, 0], sizes = [24, 16], strides = [1, 1]} : vector<24x256xf32> to vector<24x16xf32>
    %297 = tpu.concatenate %295, %296 in 1 : vector<24x240xf32>, vector<24x16xf32> -> vector<24x256xf32>
    %298 = vector.broadcast %189 : vector<1x256xf32> to vector<24x256xf32>
    %299 = arith.mulf %297, %298 : vector<24x256xf32>
    %300 = vector.extract_strided_slice %262 {offsets = [0, 17], sizes = [24, 239], strides = [1, 1]} : vector<24x256xf32> to vector<24x239xf32>
    %301 = vector.extract_strided_slice %262 {offsets = [0, 0], sizes = [24, 17], strides = [1, 1]} : vector<24x256xf32> to vector<24x17xf32>
    %302 = tpu.concatenate %300, %301 in 1 : vector<24x239xf32>, vector<24x17xf32> -> vector<24x256xf32>
    %303 = vector.broadcast %211 : vector<1x256xf32> to vector<24x256xf32>
    %304 = arith.mulf %302, %303 : vector<24x256xf32>
    %305 = tpu.concatenate %267, %272, %277, %282, %284, %289, %294, %299, %304 in 0 : vector<24x256xf32>, vector<24x256xf32>, vector<24x256xf32>, vector<24x256xf32>, vector<24x256xf32>, vector<24x256xf32>, vector<24x256xf32>, vector<24x256xf32>, vector<24x256xf32> -> vector<216x256xf32>
    %c0_103 = arith.constant 0 : index
    %c0_104 = arith.constant 0 : index
    %306 = vector.load %arg5[%c0_103, %c0_104] : memref<24x216xf32, #tpu.memory_space<vmem>>, vector<24x216xf32>
    %cst_105 = arith.constant dense<0.000000e+00> : vector<24x256xf32>
    %307 = tpu.matmul %306, %305, %cst_105 {dimension_numbers = #tpu.dot_dimension_numbers<[1], [0], [0], [1], [0, 0, 1, 1], [], []>} : vector<24x216xf32>, vector<216x256xf32>, vector<24x256xf32> -> vector<24x256xf32>
    %c0_106 = arith.constant 0 : index
    %c0_107 = arith.constant 0 : index
    %308 = vector.load %arg6[%c0_106, %c0_107] : memref<24x1xf32, #tpu.memory_space<vmem>>, vector<24x1xf32>
    %309 = vector.broadcast %308 : vector<24x1xf32> to vector<24x256xf32>
    %310 = arith.addf %307, %309 : vector<24x256xf32>
    %cst_108 = arith.constant 0.000000e+00 : f32
    %311 = vector.broadcast %cst_108 : f32 to vector<24x256xf32>
    %312 = arith.maximumf %310, %311 : vector<24x256xf32>
    %313 = vector.extract_strided_slice %312 {offsets = [0, 239], sizes = [24, 17], strides = [1, 1]} : vector<24x256xf32> to vector<24x17xf32>
    %314 = vector.extract_strided_slice %312 {offsets = [0, 0], sizes = [24, 239], strides = [1, 1]} : vector<24x256xf32> to vector<24x239xf32>
    %315 = tpu.concatenate %313, %314 in 1 : vector<24x17xf32>, vector<24x239xf32> -> vector<24x256xf32>
    %316 = vector.broadcast %35 : vector<1x256xf32> to vector<24x256xf32>
    %317 = arith.mulf %315, %316 : vector<24x256xf32>
    %318 = vector.extract_strided_slice %312 {offsets = [0, 240], sizes = [24, 16], strides = [1, 1]} : vector<24x256xf32> to vector<24x16xf32>
    %319 = vector.extract_strided_slice %312 {offsets = [0, 0], sizes = [24, 240], strides = [1, 1]} : vector<24x256xf32> to vector<24x240xf32>
    %320 = tpu.concatenate %318, %319 in 1 : vector<24x16xf32>, vector<24x240xf32> -> vector<24x256xf32>
    %321 = vector.broadcast %57 : vector<1x256xf32> to vector<24x256xf32>
    %322 = arith.mulf %320, %321 : vector<24x256xf32>
    %323 = vector.extract_strided_slice %312 {offsets = [0, 241], sizes = [24, 15], strides = [1, 1]} : vector<24x256xf32> to vector<24x15xf32>
    %324 = vector.extract_strided_slice %312 {offsets = [0, 0], sizes = [24, 241], strides = [1, 1]} : vector<24x256xf32> to vector<24x241xf32>
    %325 = tpu.concatenate %323, %324 in 1 : vector<24x15xf32>, vector<24x241xf32> -> vector<24x256xf32>
    %326 = vector.broadcast %79 : vector<1x256xf32> to vector<24x256xf32>
    %327 = arith.mulf %325, %326 : vector<24x256xf32>
    %328 = vector.extract_strided_slice %312 {offsets = [0, 255], sizes = [24, 1], strides = [1, 1]} : vector<24x256xf32> to vector<24x1xf32>
    %329 = vector.extract_strided_slice %312 {offsets = [0, 0], sizes = [24, 255], strides = [1, 1]} : vector<24x256xf32> to vector<24x255xf32>
    %330 = tpu.concatenate %328, %329 in 1 : vector<24x1xf32>, vector<24x255xf32> -> vector<24x256xf32>
    %331 = vector.broadcast %101 : vector<1x256xf32> to vector<24x256xf32>
    %332 = arith.mulf %330, %331 : vector<24x256xf32>
    %333 = vector.broadcast %123 : vector<1x256xf32> to vector<24x256xf32>
    %334 = arith.mulf %312, %333 : vector<24x256xf32>
    %335 = vector.extract_strided_slice %312 {offsets = [0, 1], sizes = [24, 255], strides = [1, 1]} : vector<24x256xf32> to vector<24x255xf32>
    %336 = vector.extract_strided_slice %312 {offsets = [0, 0], sizes = [24, 1], strides = [1, 1]} : vector<24x256xf32> to vector<24x1xf32>
    %337 = tpu.concatenate %335, %336 in 1 : vector<24x255xf32>, vector<24x1xf32> -> vector<24x256xf32>
    %338 = vector.broadcast %145 : vector<1x256xf32> to vector<24x256xf32>
    %339 = arith.mulf %337, %338 : vector<24x256xf32>
    %340 = vector.extract_strided_slice %312 {offsets = [0, 15], sizes = [24, 241], strides = [1, 1]} : vector<24x256xf32> to vector<24x241xf32>
    %341 = vector.extract_strided_slice %312 {offsets = [0, 0], sizes = [24, 15], strides = [1, 1]} : vector<24x256xf32> to vector<24x15xf32>
    %342 = tpu.concatenate %340, %341 in 1 : vector<24x241xf32>, vector<24x15xf32> -> vector<24x256xf32>
    %343 = vector.broadcast %167 : vector<1x256xf32> to vector<24x256xf32>
    %344 = arith.mulf %342, %343 : vector<24x256xf32>
    %345 = vector.extract_strided_slice %312 {offsets = [0, 16], sizes = [24, 240], strides = [1, 1]} : vector<24x256xf32> to vector<24x240xf32>
    %346 = vector.extract_strided_slice %312 {offsets = [0, 0], sizes = [24, 16], strides = [1, 1]} : vector<24x256xf32> to vector<24x16xf32>
    %347 = tpu.concatenate %345, %346 in 1 : vector<24x240xf32>, vector<24x16xf32> -> vector<24x256xf32>
    %348 = vector.broadcast %189 : vector<1x256xf32> to vector<24x256xf32>
    %349 = arith.mulf %347, %348 : vector<24x256xf32>
    %350 = vector.extract_strided_slice %312 {offsets = [0, 17], sizes = [24, 239], strides = [1, 1]} : vector<24x256xf32> to vector<24x239xf32>
    %351 = vector.extract_strided_slice %312 {offsets = [0, 0], sizes = [24, 17], strides = [1, 1]} : vector<24x256xf32> to vector<24x17xf32>
    %352 = tpu.concatenate %350, %351 in 1 : vector<24x239xf32>, vector<24x17xf32> -> vector<24x256xf32>
    %353 = vector.broadcast %211 : vector<1x256xf32> to vector<24x256xf32>
    %354 = arith.mulf %352, %353 : vector<24x256xf32>
    %355 = tpu.concatenate %317, %322, %327, %332, %334, %339, %344, %349, %354 in 0 : vector<24x256xf32>, vector<24x256xf32>, vector<24x256xf32>, vector<24x256xf32>, vector<24x256xf32>, vector<24x256xf32>, vector<24x256xf32>, vector<24x256xf32>, vector<24x256xf32> -> vector<216x256xf32>
    %c0_109 = arith.constant 0 : index
    %c0_110 = arith.constant 0 : index
    %356 = vector.load %arg7[%c0_109, %c0_110] : memref<2x216xf32, #tpu.memory_space<vmem>>, vector<2x216xf32>
    %cst_111 = arith.constant dense<0.000000e+00> : vector<2x256xf32>
    %357 = tpu.matmul %356, %355, %cst_111 {dimension_numbers = #tpu.dot_dimension_numbers<[1], [0], [0], [1], [0, 0, 1, 1], [], []>} : vector<2x216xf32>, vector<216x256xf32>, vector<2x256xf32> -> vector<2x256xf32>
    %c0_112 = arith.constant 0 : index
    %c0_113 = arith.constant 0 : index
    %358 = vector.load %arg8[%c0_112, %c0_113] : memref<2x1xf32, #tpu.memory_space<vmem>>, vector<2x1xf32>
    %359 = vector.broadcast %358 : vector<2x1xf32> to vector<2x256xf32>
    %360 = arith.addf %357, %359 : vector<2x256xf32>
    %361 = vector.extract_strided_slice %360 {offsets = [0, 0], sizes = [1, 256], strides = [1, 1]} : vector<2x256xf32> to vector<1x256xf32>
    %362 = vector.extract_strided_slice %360 {offsets = [1, 0], sizes = [1, 256], strides = [1, 1]} : vector<2x256xf32> to vector<1x256xf32>
    %363 = arith.addf %13, %361 : vector<1x256xf32>
    %cst_114 = arith.constant 0.000000e+00 : f32
    %cst_115 = arith.constant 1.500000e+01 : f32
    %364 = vector.broadcast %cst_114 : f32 to vector<1x256xf32>
    %365 = arith.maximumf %364, %363 : vector<1x256xf32>
    %366 = vector.broadcast %cst_115 : f32 to vector<1x256xf32>
    %367 = arith.minimumf %366, %365 : vector<1x256xf32>
    %368 = arith.addf %10, %362 : vector<1x256xf32>
    %cst_116 = arith.constant 0.000000e+00 : f32
    %cst_117 = arith.constant 1.500000e+01 : f32
    %369 = vector.broadcast %cst_116 : f32 to vector<1x256xf32>
    %370 = arith.maximumf %369, %368 : vector<1x256xf32>
    %371 = vector.broadcast %cst_117 : f32 to vector<1x256xf32>
    %372 = arith.minimumf %371, %370 : vector<1x256xf32>
    %373 = math.floor %367 : vector<1x256xf32>
    %374 = math.floor %372 : vector<1x256xf32>
    %375 = arith.subf %367, %373 : vector<1x256xf32>
    %cst_118 = arith.constant 1.000000e+00 : f32
    %376 = vector.broadcast %cst_118 : f32 to vector<1x256xf32>
    %377 = arith.subf %376, %375 : vector<1x256xf32>
    %378 = arith.subf %372, %374 : vector<1x256xf32>
    %cst_119 = arith.constant 1.000000e+00 : f32
    %379 = vector.broadcast %cst_119 : f32 to vector<1x256xf32>
    %380 = arith.subf %379, %378 : vector<1x256xf32>
    %cst_120 = arith.constant 1.000000e+00 : f32
    %381 = vector.broadcast %cst_120 : f32 to vector<1x256xf32>
    %382 = arith.addf %373, %381 : vector<1x256xf32>
    %cst_121 = arith.constant 1.500000e+01 : f32
    %383 = vector.broadcast %cst_121 : f32 to vector<1x256xf32>
    %384 = arith.minimumf %382, %383 : vector<1x256xf32>
    %cst_122 = arith.constant 1.000000e+00 : f32
    %385 = vector.broadcast %cst_122 : f32 to vector<1x256xf32>
    %386 = arith.addf %374, %385 : vector<1x256xf32>
    %cst_123 = arith.constant 1.500000e+01 : f32
    %387 = vector.broadcast %cst_123 : f32 to vector<1x256xf32>
    %388 = arith.minimumf %386, %387 : vector<1x256xf32>
    %389 = tpu.iota {dimensions = array<i32: 0>} : vector<256x256xi32>
    %390 = arith.sitofp %389 : vector<256x256xi32> to vector<256x256xf32>
    %391 = arith.mulf %380, %377 : vector<1x256xf32>
    %cst_124 = arith.constant 1.600000e+01 : f32
    %392 = vector.broadcast %cst_124 : f32 to vector<1x256xf32>
    %393 = arith.mulf %374, %392 : vector<1x256xf32>
    %394 = arith.addf %393, %373 : vector<1x256xf32>
    %395 = vector.broadcast %394 : vector<1x256xf32> to vector<256x256xf32>
    %396 = arith.cmpf oeq, %390, %395 : vector<256x256xf32>
    %cst_125 = arith.constant 0.000000e+00 : f32
    %397 = vector.shape_cast %391 : vector<1x256xf32> to vector<1x256xf32>
    %398 = vector.broadcast %397 : vector<1x256xf32> to vector<256x256xf32>
    %399 = vector.broadcast %cst_125 : f32 to vector<256x256xf32>
    %400 = arith.select %396, %398, %399 : vector<256x256xi1>, vector<256x256xf32>
    %cst_126 = arith.constant dense<0.000000e+00> : vector<4x256xf32>
    %401 = tpu.matmul %3, %400, %cst_126 {dimension_numbers = #tpu.dot_dimension_numbers<[1], [0], [0], [1], [0, 0, 1, 1], [], []>} : vector<4x256xf32>, vector<256x256xf32>, vector<4x256xf32> -> vector<4x256xf32>
    %402 = arith.mulf %380, %375 : vector<1x256xf32>
    %cst_127 = arith.constant 1.600000e+01 : f32
    %403 = vector.broadcast %cst_127 : f32 to vector<1x256xf32>
    %404 = arith.mulf %374, %403 : vector<1x256xf32>
    %405 = arith.addf %404, %384 : vector<1x256xf32>
    %406 = vector.broadcast %405 : vector<1x256xf32> to vector<256x256xf32>
    %407 = arith.cmpf oeq, %390, %406 : vector<256x256xf32>
    %cst_128 = arith.constant 0.000000e+00 : f32
    %408 = vector.shape_cast %402 : vector<1x256xf32> to vector<1x256xf32>
    %409 = vector.broadcast %408 : vector<1x256xf32> to vector<256x256xf32>
    %410 = vector.broadcast %cst_128 : f32 to vector<256x256xf32>
    %411 = arith.select %407, %409, %410 : vector<256x256xi1>, vector<256x256xf32>
    %cst_129 = arith.constant dense<0.000000e+00> : vector<4x256xf32>
    %412 = tpu.matmul %3, %411, %cst_129 {dimension_numbers = #tpu.dot_dimension_numbers<[1], [0], [0], [1], [0, 0, 1, 1], [], []>} : vector<4x256xf32>, vector<256x256xf32>, vector<4x256xf32> -> vector<4x256xf32>
    %413 = arith.addf %401, %412 : vector<4x256xf32>
    %414 = arith.mulf %378, %377 : vector<1x256xf32>
    %cst_130 = arith.constant 1.600000e+01 : f32
    %415 = vector.broadcast %cst_130 : f32 to vector<1x256xf32>
    %416 = arith.mulf %388, %415 : vector<1x256xf32>
    %417 = arith.addf %416, %373 : vector<1x256xf32>
    %418 = vector.broadcast %417 : vector<1x256xf32> to vector<256x256xf32>
    %419 = arith.cmpf oeq, %390, %418 : vector<256x256xf32>
    %cst_131 = arith.constant 0.000000e+00 : f32
    %420 = vector.shape_cast %414 : vector<1x256xf32> to vector<1x256xf32>
    %421 = vector.broadcast %420 : vector<1x256xf32> to vector<256x256xf32>
    %422 = vector.broadcast %cst_131 : f32 to vector<256x256xf32>
    %423 = arith.select %419, %421, %422 : vector<256x256xi1>, vector<256x256xf32>
    %cst_132 = arith.constant dense<0.000000e+00> : vector<4x256xf32>
    %424 = tpu.matmul %3, %423, %cst_132 {dimension_numbers = #tpu.dot_dimension_numbers<[1], [0], [0], [1], [0, 0, 1, 1], [], []>} : vector<4x256xf32>, vector<256x256xf32>, vector<4x256xf32> -> vector<4x256xf32>
    %425 = arith.addf %413, %424 : vector<4x256xf32>
    %426 = arith.mulf %378, %375 : vector<1x256xf32>
    %cst_133 = arith.constant 1.600000e+01 : f32
    %427 = vector.broadcast %cst_133 : f32 to vector<1x256xf32>
    %428 = arith.mulf %388, %427 : vector<1x256xf32>
    %429 = arith.addf %428, %384 : vector<1x256xf32>
    %430 = vector.broadcast %429 : vector<1x256xf32> to vector<256x256xf32>
    %431 = arith.cmpf oeq, %390, %430 : vector<256x256xf32>
    %cst_134 = arith.constant 0.000000e+00 : f32
    %432 = vector.shape_cast %426 : vector<1x256xf32> to vector<1x256xf32>
    %433 = vector.broadcast %432 : vector<1x256xf32> to vector<256x256xf32>
    %434 = vector.broadcast %cst_134 : f32 to vector<256x256xf32>
    %435 = arith.select %431, %433, %434 : vector<256x256xi1>, vector<256x256xf32>
    %cst_135 = arith.constant dense<0.000000e+00> : vector<4x256xf32>
    %436 = tpu.matmul %3, %435, %cst_135 {dimension_numbers = #tpu.dot_dimension_numbers<[1], [0], [0], [1], [0, 0, 1, 1], [], []>} : vector<4x256xf32>, vector<256x256xf32>, vector<4x256xf32> -> vector<4x256xf32>
    %437 = arith.addf %425, %436 : vector<4x256xf32>
    %438 = vector.extract_strided_slice %437 {offsets = [0, 239], sizes = [4, 17], strides = [1, 1]} : vector<4x256xf32> to vector<4x17xf32>
    %439 = vector.extract_strided_slice %437 {offsets = [0, 0], sizes = [4, 239], strides = [1, 1]} : vector<4x256xf32> to vector<4x239xf32>
    %440 = tpu.concatenate %438, %439 in 1 : vector<4x17xf32>, vector<4x239xf32> -> vector<4x256xf32>
    %441 = vector.broadcast %35 : vector<1x256xf32> to vector<4x256xf32>
    %442 = arith.mulf %440, %441 : vector<4x256xf32>
    %443 = vector.extract_strided_slice %437 {offsets = [0, 240], sizes = [4, 16], strides = [1, 1]} : vector<4x256xf32> to vector<4x16xf32>
    %444 = vector.extract_strided_slice %437 {offsets = [0, 0], sizes = [4, 240], strides = [1, 1]} : vector<4x256xf32> to vector<4x240xf32>
    %445 = tpu.concatenate %443, %444 in 1 : vector<4x16xf32>, vector<4x240xf32> -> vector<4x256xf32>
    %446 = vector.broadcast %57 : vector<1x256xf32> to vector<4x256xf32>
    %447 = arith.mulf %445, %446 : vector<4x256xf32>
    %448 = vector.extract_strided_slice %437 {offsets = [0, 241], sizes = [4, 15], strides = [1, 1]} : vector<4x256xf32> to vector<4x15xf32>
    %449 = vector.extract_strided_slice %437 {offsets = [0, 0], sizes = [4, 241], strides = [1, 1]} : vector<4x256xf32> to vector<4x241xf32>
    %450 = tpu.concatenate %448, %449 in 1 : vector<4x15xf32>, vector<4x241xf32> -> vector<4x256xf32>
    %451 = vector.broadcast %79 : vector<1x256xf32> to vector<4x256xf32>
    %452 = arith.mulf %450, %451 : vector<4x256xf32>
    %453 = vector.extract_strided_slice %437 {offsets = [0, 255], sizes = [4, 1], strides = [1, 1]} : vector<4x256xf32> to vector<4x1xf32>
    %454 = vector.extract_strided_slice %437 {offsets = [0, 0], sizes = [4, 255], strides = [1, 1]} : vector<4x256xf32> to vector<4x255xf32>
    %455 = tpu.concatenate %453, %454 in 1 : vector<4x1xf32>, vector<4x255xf32> -> vector<4x256xf32>
    %456 = vector.broadcast %101 : vector<1x256xf32> to vector<4x256xf32>
    %457 = arith.mulf %455, %456 : vector<4x256xf32>
    %458 = vector.broadcast %123 : vector<1x256xf32> to vector<4x256xf32>
    %459 = arith.mulf %437, %458 : vector<4x256xf32>
    %460 = vector.extract_strided_slice %437 {offsets = [0, 1], sizes = [4, 255], strides = [1, 1]} : vector<4x256xf32> to vector<4x255xf32>
    %461 = vector.extract_strided_slice %437 {offsets = [0, 0], sizes = [4, 1], strides = [1, 1]} : vector<4x256xf32> to vector<4x1xf32>
    %462 = tpu.concatenate %460, %461 in 1 : vector<4x255xf32>, vector<4x1xf32> -> vector<4x256xf32>
    %463 = vector.broadcast %145 : vector<1x256xf32> to vector<4x256xf32>
    %464 = arith.mulf %462, %463 : vector<4x256xf32>
    %465 = vector.extract_strided_slice %437 {offsets = [0, 15], sizes = [4, 241], strides = [1, 1]} : vector<4x256xf32> to vector<4x241xf32>
    %466 = vector.extract_strided_slice %437 {offsets = [0, 0], sizes = [4, 15], strides = [1, 1]} : vector<4x256xf32> to vector<4x15xf32>
    %467 = tpu.concatenate %465, %466 in 1 : vector<4x241xf32>, vector<4x15xf32> -> vector<4x256xf32>
    %468 = vector.broadcast %167 : vector<1x256xf32> to vector<4x256xf32>
    %469 = arith.mulf %467, %468 : vector<4x256xf32>
    %470 = vector.extract_strided_slice %437 {offsets = [0, 16], sizes = [4, 240], strides = [1, 1]} : vector<4x256xf32> to vector<4x240xf32>
    %471 = vector.extract_strided_slice %437 {offsets = [0, 0], sizes = [4, 16], strides = [1, 1]} : vector<4x256xf32> to vector<4x16xf32>
    %472 = tpu.concatenate %470, %471 in 1 : vector<4x240xf32>, vector<4x16xf32> -> vector<4x256xf32>
    %473 = vector.broadcast %189 : vector<1x256xf32> to vector<4x256xf32>
    %474 = arith.mulf %472, %473 : vector<4x256xf32>
    %475 = vector.extract_strided_slice %437 {offsets = [0, 17], sizes = [4, 239], strides = [1, 1]} : vector<4x256xf32> to vector<4x239xf32>
    %476 = vector.extract_strided_slice %437 {offsets = [0, 0], sizes = [4, 17], strides = [1, 1]} : vector<4x256xf32> to vector<4x17xf32>
    %477 = tpu.concatenate %475, %476 in 1 : vector<4x239xf32>, vector<4x17xf32> -> vector<4x256xf32>
    %478 = vector.broadcast %211 : vector<1x256xf32> to vector<4x256xf32>
    %479 = arith.mulf %477, %478 : vector<4x256xf32>
    %480 = tpu.concatenate %442, %447, %452, %457, %459, %464, %469, %474, %479 in 0 : vector<4x256xf32>, vector<4x256xf32>, vector<4x256xf32>, vector<4x256xf32>, vector<4x256xf32>, vector<4x256xf32>, vector<4x256xf32>, vector<4x256xf32>, vector<4x256xf32> -> vector<36x256xf32>
    %c0_136 = arith.constant 0 : index
    %c0_137 = arith.constant 0 : index
    %481 = vector.load %arg9[%c0_136, %c0_137] : memref<32x36xf32, #tpu.memory_space<vmem>>, vector<32x36xf32>
    %cst_138 = arith.constant dense<0.000000e+00> : vector<32x256xf32>
    %482 = tpu.matmul %481, %480, %cst_138 {dimension_numbers = #tpu.dot_dimension_numbers<[1], [0], [0], [1], [0, 0, 1, 1], [], []>} : vector<32x36xf32>, vector<36x256xf32>, vector<32x256xf32> -> vector<32x256xf32>
    %c0_139 = arith.constant 0 : index
    %c0_140 = arith.constant 0 : index
    %483 = vector.load %arg10[%c0_139, %c0_140] : memref<32x1xf32, #tpu.memory_space<vmem>>, vector<32x1xf32>
    %484 = vector.broadcast %483 : vector<32x1xf32> to vector<32x256xf32>
    %485 = arith.addf %482, %484 : vector<32x256xf32>
    %486 = vector.extract_strided_slice %1 {offsets = [0, 239], sizes = [4, 17], strides = [1, 1]} : vector<4x256xf32> to vector<4x17xf32>
    %487 = vector.extract_strided_slice %1 {offsets = [0, 0], sizes = [4, 239], strides = [1, 1]} : vector<4x256xf32> to vector<4x239xf32>
    %488 = tpu.concatenate %486, %487 in 1 : vector<4x17xf32>, vector<4x239xf32> -> vector<4x256xf32>
    %489 = vector.broadcast %35 : vector<1x256xf32> to vector<4x256xf32>
    %490 = arith.mulf %488, %489 : vector<4x256xf32>
    %491 = vector.extract_strided_slice %1 {offsets = [0, 240], sizes = [4, 16], strides = [1, 1]} : vector<4x256xf32> to vector<4x16xf32>
    %492 = vector.extract_strided_slice %1 {offsets = [0, 0], sizes = [4, 240], strides = [1, 1]} : vector<4x256xf32> to vector<4x240xf32>
    %493 = tpu.concatenate %491, %492 in 1 : vector<4x16xf32>, vector<4x240xf32> -> vector<4x256xf32>
    %494 = vector.broadcast %57 : vector<1x256xf32> to vector<4x256xf32>
    %495 = arith.mulf %493, %494 : vector<4x256xf32>
    %496 = vector.extract_strided_slice %1 {offsets = [0, 241], sizes = [4, 15], strides = [1, 1]} : vector<4x256xf32> to vector<4x15xf32>
    %497 = vector.extract_strided_slice %1 {offsets = [0, 0], sizes = [4, 241], strides = [1, 1]} : vector<4x256xf32> to vector<4x241xf32>
    %498 = tpu.concatenate %496, %497 in 1 : vector<4x15xf32>, vector<4x241xf32> -> vector<4x256xf32>
    %499 = vector.broadcast %79 : vector<1x256xf32> to vector<4x256xf32>
    %500 = arith.mulf %498, %499 : vector<4x256xf32>
    %501 = vector.extract_strided_slice %1 {offsets = [0, 255], sizes = [4, 1], strides = [1, 1]} : vector<4x256xf32> to vector<4x1xf32>
    %502 = vector.extract_strided_slice %1 {offsets = [0, 0], sizes = [4, 255], strides = [1, 1]} : vector<4x256xf32> to vector<4x255xf32>
    %503 = tpu.concatenate %501, %502 in 1 : vector<4x1xf32>, vector<4x255xf32> -> vector<4x256xf32>
    %504 = vector.broadcast %101 : vector<1x256xf32> to vector<4x256xf32>
    %505 = arith.mulf %503, %504 : vector<4x256xf32>
    %506 = vector.broadcast %123 : vector<1x256xf32> to vector<4x256xf32>
    %507 = arith.mulf %1, %506 : vector<4x256xf32>
    %508 = vector.extract_strided_slice %1 {offsets = [0, 1], sizes = [4, 255], strides = [1, 1]} : vector<4x256xf32> to vector<4x255xf32>
    %509 = vector.extract_strided_slice %1 {offsets = [0, 0], sizes = [4, 1], strides = [1, 1]} : vector<4x256xf32> to vector<4x1xf32>
    %510 = tpu.concatenate %508, %509 in 1 : vector<4x255xf32>, vector<4x1xf32> -> vector<4x256xf32>
    %511 = vector.broadcast %145 : vector<1x256xf32> to vector<4x256xf32>
    %512 = arith.mulf %510, %511 : vector<4x256xf32>
    %513 = vector.extract_strided_slice %1 {offsets = [0, 15], sizes = [4, 241], strides = [1, 1]} : vector<4x256xf32> to vector<4x241xf32>
    %514 = vector.extract_strided_slice %1 {offsets = [0, 0], sizes = [4, 15], strides = [1, 1]} : vector<4x256xf32> to vector<4x15xf32>
    %515 = tpu.concatenate %513, %514 in 1 : vector<4x241xf32>, vector<4x15xf32> -> vector<4x256xf32>
    %516 = vector.broadcast %167 : vector<1x256xf32> to vector<4x256xf32>
    %517 = arith.mulf %515, %516 : vector<4x256xf32>
    %518 = vector.extract_strided_slice %1 {offsets = [0, 16], sizes = [4, 240], strides = [1, 1]} : vector<4x256xf32> to vector<4x240xf32>
    %519 = vector.extract_strided_slice %1 {offsets = [0, 0], sizes = [4, 16], strides = [1, 1]} : vector<4x256xf32> to vector<4x16xf32>
    %520 = tpu.concatenate %518, %519 in 1 : vector<4x240xf32>, vector<4x16xf32> -> vector<4x256xf32>
    %521 = vector.broadcast %189 : vector<1x256xf32> to vector<4x256xf32>
    %522 = arith.mulf %520, %521 : vector<4x256xf32>
    %523 = vector.extract_strided_slice %1 {offsets = [0, 17], sizes = [4, 239], strides = [1, 1]} : vector<4x256xf32> to vector<4x239xf32>
    %524 = vector.extract_strided_slice %1 {offsets = [0, 0], sizes = [4, 17], strides = [1, 1]} : vector<4x256xf32> to vector<4x17xf32>
    %525 = tpu.concatenate %523, %524 in 1 : vector<4x239xf32>, vector<4x17xf32> -> vector<4x256xf32>
    %526 = vector.broadcast %211 : vector<1x256xf32> to vector<4x256xf32>
    %527 = arith.mulf %525, %526 : vector<4x256xf32>
    %528 = tpu.concatenate %490, %495, %500, %505, %507, %512, %517, %522, %527 in 0 : vector<4x256xf32>, vector<4x256xf32>, vector<4x256xf32>, vector<4x256xf32>, vector<4x256xf32>, vector<4x256xf32>, vector<4x256xf32>, vector<4x256xf32>, vector<4x256xf32> -> vector<36x256xf32>
    %c0_141 = arith.constant 0 : index
    %c0_142 = arith.constant 0 : index
    %529 = vector.load %arg11[%c0_141, %c0_142] : memref<32x36xf32, #tpu.memory_space<vmem>>, vector<32x36xf32>
    %cst_143 = arith.constant dense<0.000000e+00> : vector<32x256xf32>
    %530 = tpu.matmul %529, %528, %cst_143 {dimension_numbers = #tpu.dot_dimension_numbers<[1], [0], [0], [1], [0, 0, 1, 1], [], []>} : vector<32x36xf32>, vector<36x256xf32>, vector<32x256xf32> -> vector<32x256xf32>
    %c0_144 = arith.constant 0 : index
    %c0_145 = arith.constant 0 : index
    %531 = vector.load %arg12[%c0_144, %c0_145] : memref<32x1xf32, #tpu.memory_space<vmem>>, vector<32x1xf32>
    %532 = vector.broadcast %531 : vector<32x1xf32> to vector<32x256xf32>
    %533 = arith.addf %530, %532 : vector<32x256xf32>
    %534 = arith.addf %485, %533 : vector<32x256xf32>
    %cst_146 = arith.constant 0.000000e+00 : f32
    %535 = vector.broadcast %cst_146 : f32 to vector<32x256xf32>
    %536 = arith.maximumf %534, %535 : vector<32x256xf32>
    %537 = vector.extract_strided_slice %536 {offsets = [0, 239], sizes = [32, 17], strides = [1, 1]} : vector<32x256xf32> to vector<32x17xf32>
    %538 = vector.extract_strided_slice %536 {offsets = [0, 0], sizes = [32, 239], strides = [1, 1]} : vector<32x256xf32> to vector<32x239xf32>
    %539 = tpu.concatenate %537, %538 in 1 : vector<32x17xf32>, vector<32x239xf32> -> vector<32x256xf32>
    %540 = vector.broadcast %35 : vector<1x256xf32> to vector<32x256xf32>
    %541 = arith.mulf %539, %540 : vector<32x256xf32>
    %542 = vector.extract_strided_slice %536 {offsets = [0, 240], sizes = [32, 16], strides = [1, 1]} : vector<32x256xf32> to vector<32x16xf32>
    %543 = vector.extract_strided_slice %536 {offsets = [0, 0], sizes = [32, 240], strides = [1, 1]} : vector<32x256xf32> to vector<32x240xf32>
    %544 = tpu.concatenate %542, %543 in 1 : vector<32x16xf32>, vector<32x240xf32> -> vector<32x256xf32>
    %545 = vector.broadcast %57 : vector<1x256xf32> to vector<32x256xf32>
    %546 = arith.mulf %544, %545 : vector<32x256xf32>
    %547 = vector.extract_strided_slice %536 {offsets = [0, 241], sizes = [32, 15], strides = [1, 1]} : vector<32x256xf32> to vector<32x15xf32>
    %548 = vector.extract_strided_slice %536 {offsets = [0, 0], sizes = [32, 241], strides = [1, 1]} : vector<32x256xf32> to vector<32x241xf32>
    %549 = tpu.concatenate %547, %548 in 1 : vector<32x15xf32>, vector<32x241xf32> -> vector<32x256xf32>
    %550 = vector.broadcast %79 : vector<1x256xf32> to vector<32x256xf32>
    %551 = arith.mulf %549, %550 : vector<32x256xf32>
    %552 = vector.extract_strided_slice %536 {offsets = [0, 255], sizes = [32, 1], strides = [1, 1]} : vector<32x256xf32> to vector<32x1xf32>
    %553 = vector.extract_strided_slice %536 {offsets = [0, 0], sizes = [32, 255], strides = [1, 1]} : vector<32x256xf32> to vector<32x255xf32>
    %554 = tpu.concatenate %552, %553 in 1 : vector<32x1xf32>, vector<32x255xf32> -> vector<32x256xf32>
    %555 = vector.broadcast %101 : vector<1x256xf32> to vector<32x256xf32>
    %556 = arith.mulf %554, %555 : vector<32x256xf32>
    %557 = vector.broadcast %123 : vector<1x256xf32> to vector<32x256xf32>
    %558 = arith.mulf %536, %557 : vector<32x256xf32>
    %559 = vector.extract_strided_slice %536 {offsets = [0, 1], sizes = [32, 255], strides = [1, 1]} : vector<32x256xf32> to vector<32x255xf32>
    %560 = vector.extract_strided_slice %536 {offsets = [0, 0], sizes = [32, 1], strides = [1, 1]} : vector<32x256xf32> to vector<32x1xf32>
    %561 = tpu.concatenate %559, %560 in 1 : vector<32x255xf32>, vector<32x1xf32> -> vector<32x256xf32>
    %562 = vector.broadcast %145 : vector<1x256xf32> to vector<32x256xf32>
    %563 = arith.mulf %561, %562 : vector<32x256xf32>
    %564 = vector.extract_strided_slice %536 {offsets = [0, 15], sizes = [32, 241], strides = [1, 1]} : vector<32x256xf32> to vector<32x241xf32>
    %565 = vector.extract_strided_slice %536 {offsets = [0, 0], sizes = [32, 15], strides = [1, 1]} : vector<32x256xf32> to vector<32x15xf32>
    %566 = tpu.concatenate %564, %565 in 1 : vector<32x241xf32>, vector<32x15xf32> -> vector<32x256xf32>
    %567 = vector.broadcast %167 : vector<1x256xf32> to vector<32x256xf32>
    %568 = arith.mulf %566, %567 : vector<32x256xf32>
    %569 = vector.extract_strided_slice %536 {offsets = [0, 16], sizes = [32, 240], strides = [1, 1]} : vector<32x256xf32> to vector<32x240xf32>
    %570 = vector.extract_strided_slice %536 {offsets = [0, 0], sizes = [32, 16], strides = [1, 1]} : vector<32x256xf32> to vector<32x16xf32>
    %571 = tpu.concatenate %569, %570 in 1 : vector<32x240xf32>, vector<32x16xf32> -> vector<32x256xf32>
    %572 = vector.broadcast %189 : vector<1x256xf32> to vector<32x256xf32>
    %573 = arith.mulf %571, %572 : vector<32x256xf32>
    %574 = vector.extract_strided_slice %536 {offsets = [0, 17], sizes = [32, 239], strides = [1, 1]} : vector<32x256xf32> to vector<32x239xf32>
    %575 = vector.extract_strided_slice %536 {offsets = [0, 0], sizes = [32, 17], strides = [1, 1]} : vector<32x256xf32> to vector<32x17xf32>
    %576 = tpu.concatenate %574, %575 in 1 : vector<32x239xf32>, vector<32x17xf32> -> vector<32x256xf32>
    %577 = vector.broadcast %211 : vector<1x256xf32> to vector<32x256xf32>
    %578 = arith.mulf %576, %577 : vector<32x256xf32>
    %579 = tpu.concatenate %541, %546, %551, %556, %558, %563, %568, %573, %578 in 0 : vector<32x256xf32>, vector<32x256xf32>, vector<32x256xf32>, vector<32x256xf32>, vector<32x256xf32>, vector<32x256xf32>, vector<32x256xf32>, vector<32x256xf32>, vector<32x256xf32> -> vector<288x256xf32>
    %c0_147 = arith.constant 0 : index
    %c0_148 = arith.constant 0 : index
    %580 = vector.load %arg13[%c0_147, %c0_148] : memref<4x288xf32, #tpu.memory_space<vmem>>, vector<4x288xf32>
    %cst_149 = arith.constant dense<0.000000e+00> : vector<4x256xf32>
    %581 = tpu.matmul %580, %579, %cst_149 {dimension_numbers = #tpu.dot_dimension_numbers<[1], [0], [0], [1], [0, 0, 1, 1], [], []>} : vector<4x288xf32>, vector<288x256xf32>, vector<4x256xf32> -> vector<4x256xf32>
    %c0_150 = arith.constant 0 : index
    %c0_151 = arith.constant 0 : index
    %582 = vector.load %arg14[%c0_150, %c0_151] : memref<4x1xf32, #tpu.memory_space<vmem>>, vector<4x1xf32>
    %583 = vector.broadcast %582 : vector<4x1xf32> to vector<4x256xf32>
    %584 = arith.addf %581, %583 : vector<4x256xf32>
    %c0_152 = arith.constant 0 : index
    %c0_153 = arith.constant 0 : index
    %c0_154 = arith.constant 0 : index
    %585 = vector.load %arg15[%c0_152, %c0_153, %c0_154] : memref<1x4x256xf32, #tpu.memory_space<vmem>>, vector<1x4x256xf32>
    %586 = vector.shape_cast %585 : vector<1x4x256xf32> to vector<4x256xf32>
    %587 = vector.shape_cast %584 : vector<4x256xf32> to vector<1x4x256xf32>
    tpu.vector_store %arg15[%c0_152, %c0_153, %c0_154], %587 {strides = array<i32>} : memref<1x4x256xf32, #tpu.memory_space<vmem>>, vector<1x4x256xf32>,
    return
  }
  func.func @transform_0(%arg0: i32) -> (i32, i32, i32) {
    %c0_i32 = arith.constant 0 : i32
    %c0_i32_0 = arith.constant 0 : i32
    %c0_i32_1 = arith.constant 0 : i32
    return %arg0, %c0_i32, %c0_i32_0 : i32, i32, i32
  }
  func.func @transform_1(%arg0: i32) -> (i32, i32, i32) {
    %c0_i32 = arith.constant 0 : i32
    %c0_i32_0 = arith.constant 0 : i32
    %c0_i32_1 = arith.constant 0 : i32
    return %arg0, %c0_i32, %c0_i32_0 : i32, i32, i32
  }
  func.func @transform_2(%arg0: i32) -> (i32, i32) {
    %c0_i32 = arith.constant 0 : i32
    %c0_i32_0 = arith.constant 0 : i32
    %c0_i32_1 = arith.constant 0 : i32
    return %c0_i32, %c0_i32_0 : i32, i32
  }
  func.func @transform_3(%arg0: i32) -> (i32, i32) {
    %c0_i32 = arith.constant 0 : i32
    %c0_i32_0 = arith.constant 0 : i32
    %c0_i32_1 = arith.constant 0 : i32
    return %c0_i32, %c0_i32_0 : i32, i32
  }
  func.func @transform_4(%arg0: i32) -> (i32, i32) {
    %c0_i32 = arith.constant 0 : i32
    %c0_i32_0 = arith.constant 0 : i32
    %c0_i32_1 = arith.constant 0 : i32
    return %c0_i32, %c0_i32_0 : i32, i32
  }
  func.func @transform_5(%arg0: i32) -> (i32, i32) {
    %c0_i32 = arith.constant 0 : i32
    %c0_i32_0 = arith.constant 0 : i32
    %c0_i32_1 = arith.constant 0 : i32
    return %c0_i32, %c0_i32_0 : i32, i32
  }
  func.func @transform_6(%arg0: i32) -> (i32, i32) {
    %c0_i32 = arith.constant 0 : i32
    %c0_i32_0 = arith.constant 0 : i32
    %c0_i32_1 = arith.constant 0 : i32
    return %c0_i32, %c0_i32_0 : i32, i32
  }
  func.func @transform_7(%arg0: i32) -> (i32, i32) {
    %c0_i32 = arith.constant 0 : i32
    %c0_i32_0 = arith.constant 0 : i32
    %c0_i32_1 = arith.constant 0 : i32
    return %c0_i32, %c0_i32_0 : i32, i32
  }
  func.func @transform_8(%arg0: i32) -> (i32, i32) {
    %c0_i32 = arith.constant 0 : i32
    %c0_i32_0 = arith.constant 0 : i32
    %c0_i32_1 = arith.constant 0 : i32
    return %c0_i32, %c0_i32_0 : i32, i32
  }
  func.func @transform_9(%arg0: i32) -> (i32, i32) {
    %c0_i32 = arith.constant 0 : i32
    %c0_i32_0 = arith.constant 0 : i32
    %c0_i32_1 = arith.constant 0 : i32
    return %c0_i32, %c0_i32_0 : i32, i32
  }
  func.func @transform_10(%arg0: i32) -> (i32, i32) {
    %c0_i32 = arith.constant 0 : i32
    %c0_i32_0 = arith.constant 0 : i32
    %c0_i32_1 = arith.constant 0 : i32
    return %c0_i32, %c0_i32_0 : i32, i32
  }
  func.func @transform_11(%arg0: i32) -> (i32, i32) {
    %c0_i32 = arith.constant 0 : i32
    %c0_i32_0 = arith.constant 0 : i32
    %c0_i32_1 = arith.constant 0 : i32
    return %c0_i32, %c0_i32_0 : i32, i32
  }
  func.func @transform_12(%arg0: i32) -> (i32, i32) {
    %c0_i32 = arith.constant 0 : i32
    %c0_i32_0 = arith.constant 0 : i32
    %c0_i32_1 = arith.constant 0 : i32
    return %c0_i32, %c0_i32_0 : i32, i32
  }
  func.func @transform_13(%arg0: i32) -> (i32, i32) {
    %c0_i32 = arith.constant 0 : i32
    %c0_i32_0 = arith.constant 0 : i32
    %c0_i32_1 = arith.constant 0 : i32
    return %c0_i32, %c0_i32_0 : i32, i32
  }
  func.func @transform_14(%arg0: i32) -> (i32, i32, i32) {
    %c0_i32 = arith.constant 0 : i32
    %c0_i32_0 = arith.constant 0 : i32
    %c0_i32_1 = arith.constant 0 : i32
    return %arg0, %c0_i32, %c0_i32_0 : i32, i32, i32
  }
}

</mosaic_0001>

<bundles_post_ra>
// kernel: tpu_custom_call.1
= control target key start
LH: loop header
LB: loop body
LE: loop exit
PB: predicated region body
PF: predicated region fallthrough
CT: control target
= control target key end

     0   :  { %s7815_s0 = inlined_call_operand.hbm [shape: f32[2,4,256], index: 0, kind: input, shape index: {}]   ;;  %s7816_s1 = inlined_call_operand.hbm [shape: f32[2,4,256], index: 1, kind: input, shape index: {}]   ;;  %s7817_s2 = inlined_call_operand.hbm [shape: f32[24,72], index: 2, kind: input, shape index: {}]   ;;  %s7818_s3 = inlined_call_operand.vmem [shape: f32[24,1], index: 3, kind: input, shape index: {}]   ;;  %s7819_s4 = inlined_call_operand.vmem [shape: f32[24,216], index: 4, kind: input, shape index: {}]   ;;  %s7820_s5 = inlined_call_operand.vmem [shape: f32[24,1], index: 5, kind: input, shape index: {}]   ;;  %s7821_s6 = inlined_call_operand.vmem [shape: f32[2,216], index: 6, kind: input, shape index: {}]   ;;  %s7822_s7 = inlined_call_operand.vmem [shape: f32[2,1], index: 7, kind: input, shape index: {}]   ;;  %s7823_s8 = inlined_call_operand.vmem [shape: f32[32,36], index: 8, kind: input, shape index: {}]   ;;  %s7824_s9 = inlined_call_operand.vmem [shape: f32[32,1], index: 9, kind: input, shape index: {}]   ;;  %s7825_s10 = inlined_call_operand.vmem [shape: f32[32,36], index: 10, kind: input, shape index: {}]   ;;  %s7826_s11 = inlined_call_operand.vmem [shape: f32[32,1], index: 11, kind: input, shape index: {}]   ;;  %s7827_s12 = inlined_call_operand.vmem [shape: f32[4,288], index: 12, kind: input, shape index: {}]   ;;  %s7828_s13 = inlined_call_operand.vmem [shape: f32[4,1], index: 13, kind: input, shape index: {}]   ;;  %s7829_s14 = inlined_call_operand.hbm [shape: f32[2,4,256], index: 14, kind: output, shape index: {}]  }
   0x1   :  { %7897 = sst [smem:[#allocation26_spill]] %s7817_s2 }
   0x2   :  { %7898 = sst [smem:[#allocation27_spill]] %s7825_s10 }
   0x3   :  { %7899 = sst [smem:[#allocation28_spill]] %s7827_s12 }
   0x4   :  { %7900 = sst [smem:[#allocation29_spill]] %s7828_s13 }
   0x5   :  { %7901 = sst [smem:[#allocation30_spill]] %s7829_s14 }
   0x6   :  { %19 = vsyncpa [#allocation3], 0 }
   0x7   :  { %21 = vsyncpa [#allocation3 + $0x1], 0 }
   0x8   :  { %22 = vsyncpa [#allocation6], 0 }
   0x9   :  { %24 = vsyncpa [#allocation6 + $0x1], 0 }
   0xa   :  { %25 = vsyncpa [#allocation4], 0 }
   0xb   :  { %27 = vsyncpa [#allocation4 + $0x1], 0  ;;  %s4467_s29 = smov 0   ;;  %s4469_s30 = smov 0  }
   0xc   :  { %s4471_s15 = smov 0   ;;  %s4473_s16 = smov 0  }
   0xd LB: > { %7902 = sst [smem:[#allocation13_spill]] %s4362_s29  ;;  %s4488_s17 = sadd.s32 4294967295, %s4374_s16   ;;  %s4374_s16 = sphi %s4473_s16, %s8316_s16   ;;  %s4370_s15 = sphi %s4471_s15, %s8318_s15   ;;  %s4366_s30 = sphi %s4469_s30, %s8320_s30   ;;  %s4362_s29 = sphi %s4467_s29, %s8319_s29  }
   0xe   : > { %7903 = sst [smem:[#allocation14_spill]] %s4370_s15  ;;  %s3836_s18 = sadd.s32 4294967294, %s4374_s16  }
   0xf   : > { %p53_p0 = scmp.ne.s32.totalorder %s4366_s30, %s4362_s29  ;;  %p7840_p1 = scmp.eq.s32.totalorder %s4488_s17, 0 }
  0x10   : > { %p361_p3 = scmp.eq.s32.totalorder %s3836_s18, 1  ;;  %p3837_p5 = scmp.ge.s32.totalorder %s4374_s16, 1 }
  0x11   : > { %p4497_p4 = por %p7840_p1, %p53_p0  ;;  %p368_p7 = scmp.lt.s32.totalorder %s4374_s16, 3 }
  0x12   : > { %p4502_p6 = por %p361_p3, %p53_p0  ;;  %s4376_s22 = smov [#allocation7]  }
  0x13   : > { %s7904_s19 = scalar_select %p4497_p4, 1, 0 }
  0x14   : > { %s7905_s20 = scalar_select %p4502_p6, 1, 0 }
  0x15   : > { %p4507_p8 = pnand %p3837_p5, %p368_p7  ;;  %s380_s23 = sshll.u32 %s4376_s22, 4  ;;  %s381_s23 = int_to_ptr.vmem [resolvable:$true] %s380_s23 }
  0x16   : > { %7906 = sst [smem:[#allocation15_spill]] %s7905_s20  ;;  %s4521_s25 = sadd.s32 1, %s4374_s16  }
  0x17   : > { %s7907_s21 = scalar_select %p4507_p8, 1, 0 }
  0x18   : > { %p4146_p9 = pneg %p4507_p8  ;;  %7909 = sst [smem:[#allocation16_spill]] %s4521_s25 }
  0x19   : > { %s40_s26 = sadd.s32 1, %s4370_s15  ;;  %s37_s27 = ssub.s32 %s4374_s16, %s4521_s25 }
  0x1a   : > { %p4516_p11 = pnand %p4146_p9, %p7840_p1  ;;  %s4231_s28 = scalar_lea.vmem %s381_s23, 384 }
  0x1b   : > { %p4232_p13 = scmp.ne.s32.totalorder %s381_s23, %s4231_s28  ;;  %p4239_p5 = scmp.lt.s32.totalorder %s381_s23, %s381_s23 }
  0x1c   : > { %p4222_p12 = pneg %p4516_p11  ;;  %p4240_p7 = scmp.lt.s32.totalorder %s4231_s28, %s4231_s28 }
  0x1e   : > { %p4234_p0 = pnand %p4232_p13, %p4222_p12  ;;  %p4241_p10 = por %p4240_p7, %p4239_p5 }
  0x20   : > { %p4235_p3 = pneg %p4234_p0 }
  0x22   : > { %p4242_p2 = pnand %p4241_p10, %p4235_p3 }
  0x24   : > { %4245 = shalt.err (!%p4242_p2)
}
  0x25   : > { %s4377_s18 = smov 128   ;;  %s4378_s22 = smov 8  }
  0x26   : > { %s7910_s2 = sld [smem:[#allocation26_spill]]  ;;  %p38_p9 = scmp.eq.s32.totalorder %s37_s27, 0 }
  0x27   : > { %p47_p12 = scmp.ne.s32.totalorder %s4370_s15, %s4366_s30  ;;  %p48_p10 = scmp.eq.s32.totalorder %s4374_s16, 0 }
  0x28   : > { %p4162_p2 = scmp.lt.s32.totalorder %s4374_s16, 2  ;;  %p7912_p0 = scmp.eq.s32.totalorder %s4488_s17, 1 }
  0x29   : > { %s4538_s28 = scalar_select %p38_p9, %s4370_s15, %s40_s26  }
  0x2a   : > { %p49_p13 = por %p48_p10, %p47_p12  ;;  %p4542_p3 = por %p7912_p0, %p47_p12 }
  0x2b   : > { %7911 = sst [smem:[#allocation17_spill]] %s4538_s28  ;;  %s427_s14 = sand.u32 1, %s4370_s15  }
  0x2c   : > { %4149 = dma.hbm_to_vmem [thread:$0]  (!%p4516_p11), %s7910_s2, 384, %s381_s23, [#allocation6], %s4377_s18, %s4377_s18, %s4378_s22  }
  0x2d   : > { %s7913_s29 = scalar_select %p4542_p3, 1, 0 }
  0x2e   : > { %s4133_s13 = sshll.u32 %s4374_s16, 7  ;;  %s4548_s12 = sshll.u32 %s427_s14, 3 }
  0x2f   : > { %7914 = sst [smem:[#allocation18_spill]] %s7913_s29  ;;  %s4553_s20 = scalar_lea.hbm %s7815_s0, %s4133_s13 }
  0x30   : > { %s431_s23 = scalar_lea.vmem [#allocation2], %s4548_s12  ;;  %p4556_p11 = pnand %p4162_p2, %p49_p13 }
  0x31   : > { %s439_s25 = sshll.u32 %s431_s23, 4  ;;  %s4563_s22 = scalar_lea.hbm %s7816_s1, %s4133_s13  ;;  %s440_s25 = int_to_ptr.vmem [resolvable:$true] %s439_s25 }
  0x32   : > { %s428_s10 = scalar_lea.sflag [#allocation3], %s427_s14  ;;  %s4246_s24 = scalar_lea.hbm %s4553_s20, 128 }
  0x33   : > { %p4247_p5 = scmp.ne.s32.totalorder %s4553_s20, %s4246_s24  ;;  %p4248_p7 = pneg %p4556_p11 }
  0x34   : > { %s4251_s28 = scalar_lea.hbm %s7815_s0, 256  ;;  %p4252_p10 = scmp.lt.s32.totalorder %s4553_s20, %s7815_s0 }
  0x35   : > { %p4249_p9 = pnand %p4248_p7, %p4247_p5  ;;  %p4253_p2 = scmp.lt.s32.totalorder %s4251_s28, %s4246_s24 }
  0x37   : > { %p4250_p12 = pneg %p4249_p9  ;;  %p4254_p13 = por %p4253_p2, %p4252_p10 }
  0x39   : > { %p4255_p0 = pnand %p4254_p13, %p4250_p12 }
  0x3b   : > { %4258 = shalt.err (!%p4255_p0)
}
  0x3c   : > { %s4259_s13 = scalar_lea.vmem %s440_s25, 128  ;;  %s4379_s14 = smov [#allocation2]  }
  0x3d   : > { %p4260_p1 = scmp.ne.s32.totalorder %s440_s25, %s4259_s13  ;;  %s4264_s27 = sshll.u32 %s4379_s14, 4  ;;  %s4265_s27 = int_to_ptr.vmem [resolvable:$false] %s4264_s27 }
  0x3e   : > { %s4266_s2 = scalar_lea.vmem %s4265_s27, 256  ;;  %p4267_p9 = scmp.lt.s32.totalorder %s440_s25, %s4265_s27 }
  0x3f   : > { %p4262_p6 = pnand %p4260_p1, %p4248_p7  ;;  %p4268_p3 = scmp.lt.s32.totalorder %s4266_s2, %s4259_s13 }
  0x41   : > { %p4263_p5 = pneg %p4262_p6  ;;  %p4269_p4 = por %p4268_p3, %p4267_p9 }
  0x43   : > { %p4270_p8 = pnand %p4269_p4, %p4263_p5 }
  0x45   : > { %4273 = shalt.err (!%p4270_p8)
}
  0x46   : > { %4153 = dma.hbm_to_vmem [thread:$0]  (!%p4556_p11), %s4553_s20, 128, %s440_s25, %s428_s10  }
  0x47   : > { %s446_s29 = sand.u32 1, %s4374_s16   ;;  %s450_s15 = scalar_lea.vmem [#allocation5], %s4548_s12 }
  0x48   : > { %s458_s28 = sshll.u32 %s450_s15, 4  ;;  %s447_s18 = scalar_lea.sflag [#allocation6], %s446_s29  ;;  %s459_s28 = int_to_ptr.vmem [resolvable:$true] %s458_s28 }
  0x49   : > { %s4274_s24 = scalar_lea.hbm %s4563_s22, 128  ;;  %s4279_s14 = scalar_lea.hbm %s7816_s1, 256 }
  0x4a   : > { %p4275_p1 = scmp.ne.s32.totalorder %s4563_s22, %s4274_s24  ;;  %p4280_p8 = scmp.lt.s32.totalorder %s4563_s22, %s7816_s1 }
  0x4b   : > { %p4281_p3 = scmp.lt.s32.totalorder %s4279_s14, %s4274_s24 }
  0x4c   : > { %p4277_p4 = pnand %p4275_p1, %p4248_p7 }
  0x4d   : > { %p4282_p12 = por %p4281_p3, %p4280_p8 }
  0x4e   : > { %p4278_p6 = pneg %p4277_p4 }
  0x50   : > { %p4283_p10 = pnand %p4282_p12, %p4278_p6 }
  0x52   : > { %4286 = shalt.err (!%p4283_p10)
}
  0x53   : > { %s4287_s12 = scalar_lea.vmem %s459_s28, 128  ;;  %s4380_s20 = smov [#allocation5]  }
  0x54   : > { %p4288_p2 = scmp.ne.s32.totalorder %s459_s28, %s4287_s12  ;;  %s4292_s25 = sshll.u32 %s4380_s20, 4  ;;  %s4293_s25 = int_to_ptr.vmem [resolvable:$false] %s4292_s25 }
  0x55   : > { %s4294_s10 = scalar_lea.vmem %s4293_s25, 256  ;;  %p4295_p5 = scmp.lt.s32.totalorder %s459_s28, %s4293_s25 }
  0x56   : > { %p4290_p13 = pnand %p4288_p2, %p4248_p7  ;;  %p4296_p9 = scmp.lt.s32.totalorder %s4294_s10, %s4287_s12 }
  0x58   : > { %p4291_p0 = pneg %p4290_p13  ;;  %p4297_p1 = por %p4296_p9, %p4295_p5 }
  0x5a   : > { %p4298_p4 = pnand %p4297_p1, %p4291_p0 }
  0x5c   : > { %4301 = shalt.err (!%p4298_p4)
}
  0x5d   : > { %4156 = dma.hbm_to_vmem [thread:$0]  (!%p4556_p11), %s4563_s22, 128, %s459_s28, %s447_s18  }
  0x5e   : > { %p7916_p6 = scmp.ne.s32.totalorder %s7907_s21, 0 }
  0x60   : > { %467 = sbr.rel (%p7916_p6) target bundleno = 2457 (0x999), region = 76 }
  0x65   : > { %s4608_s29 = sand.u32 1, %s4366_s30   ;;  %p7917_p7 = scmp.ne.s32.totalorder %s7904_s19, 0 }
  0x66   : > { %s4611_s15 = sshll.u32 %s4608_s29, 3  ;;  %s470_s24 = scalar_lea.sflag [#allocation3], %s4608_s29 }
  0x67   : > { %s4615_s23 = scalar_lea.vmem [#allocation2], %s4611_s15 }
  0x68   : > { %4345 = dma.done.wait (%p7917_p7), %s470_s24, 128  }
  0x69   : > { %4347 = vsyncadd (%p7917_p7), %s470_s24, 4294967168  ;;  %s478_s21 = sand.u32 1, %s4488_s17   ;;  %s4623_s22 = scalar_lea.vmem [#allocation5], %s4611_s15 }
  0x6a   : > { %s479_s26 = scalar_lea.sflag [#allocation6], %s478_s21 }
  0x6b   : > { %4349 = dma.done.wait (%p7917_p7), %s479_s26, 128  }
  0x6c   : > { %4351 = vsyncadd (%p7917_p7), %s479_s26, 4294967168  ;;  %p7918_p11 = scmp.eq.s32.totalorder %s4488_s17, 0 }
  0x6e   : > { %4353 = dma.done.wait (%p7918_p11), [#allocation6], 384   ;;  %p7919_p8 = pmov %p7918_p11 }
  0x6f   : > { %v7869_v0 = vmov 0.0   ;;  %v536_v1 = vld [vmem:[%s4615_s23] sm:$0xff]  ;;  %v537_v2 = vld [vmem:[%s4623_s22] sm:$0xff]  ;;  %vm7844_vm0 = vcmask 1043456   ;;  %s7865_s19 = smov 112   ;;  %s7886_s28 = smov 111   ;;  %v538_v11 = vlaneseq }
  0x70   : > { %4355 = vsyncadd (%p7919_p8), [#allocation6], 4294966912  ;;  %853 = vmatprep.mubr.f32.mxu1 %v7869_v0  ;;  %v653_v3 = vcombine.low %v537_v2, %v537_v2  ;;  %v4636_v4 = vcombine.high %v536_v1, %v536_v1  ;;  %s7863_s18 = smov 113   ;;  %s7888_s13 = smov 127   ;;  %v4390_v7 = vmov 0   ;;  %v761_v8 = vld [vmem:[%s7818_s3] sm:$0xff] }
  0x71   : > { %s4386_s14 = smov 1   ;;  %s4387_s27 = smov 15   ;;  %4210 = vset.pattern.permute.xlu0 %v4390_v7  ;;  %4211 = vset.pattern.permute.xlu1 %v4390_v7  ;;  %v763_v9 = vld [vmem:[%s7818_s3 + $0x10] sm:$0xff]  ;;  %v762_v10 = vld [vmem:[%s7818_s3 + $0x8] sm:$0xff]  ;;  %v539_v12 = vand.u32 127, %v538_v11  ;;  %v7920_v31 = vmov 0 }
  0x72   : > { %v4639_v5 = vsel %vm7844_vm0, %v536_v1, %v653_v3  ;;  %v4647_v6 = vsel %vm7844_vm0, %v4636_v4, %v537_v2  ;;  %s4388_s2 = smov 16   ;;  %s4389_s12 = smov 17   ;;  %v7922_v32 = vmov 0  ;;  %v7924_v33 = vmov 0 }
  0x73   : > { %734 = vrot.lane.b32.xlu1 %v4639_v5, %s7865_s19  ;;  %746 = vrot.lane.b32.xlu0 %v4639_v5, %s7886_s28  ;;  %v540_v13 = vadd.s32 128, %v539_v12  ;;  %v541_v14 = vcvt.s32.f32 %v539_v12  ;;  %v7926_v35 = vmov 0  ;;  %v7928_v36 = vmov 0  ;;  %s8243_s21 = sld [smem:[#allocation29_spill]]  ;;  %s4135_s25 = sshll.u32 %s4488_s17, 7 }
  0x74   : > { %v7937_v40 = vmov 0  ;;  %v7939_v41 = vmov 0  ;;  %v7941_v42 = vmov 0  ;;  %s8309_s20 = sld [smem:[#allocation18_spill]]  ;;  %s4391_s24 = smov [#allocation8]  }
  0x75   : > { %v542_v15 = vcvt.s32.f32 %v540_v13  ;;  %v543_v16 = vadd.f32 0.5, %v541_v14 }
  0x77   : > { %736 = vrot.lane.b32.xlu1 %v4647_v6, %s7865_s19  ;;  %748 = vrot.lane.b32.xlu0 %v4647_v6, %s7886_s28  ;;  %v544_v17 = vadd.f32 0.5, %v542_v15  ;;  %v545_v18 = vmul.f32 0.0625, %v543_v16 }
  0x79   : > { %v546_v19 = vmul.f32 0.0625, %v544_v17  ;;  %v4687_v20 = vfloor.f32 %v545_v18 }
  0x7a   : > { %p8311_p12 = scmp.ne.s32.totalorder %s8309_s20, 0 }
  0x7b   : > { %724 = vrot.lane.b32.xlu1 %v4647_v6, %s7863_s18  ;;  %722 = vrot.lane.b32.xlu0 %v4639_v5, %s7863_s18  ;;  %v4689_v21 = vfloor.f32 %v546_v19  ;;  %v549_v22 = vmul.f32 16.0, %v4687_v20  ;;  %v625_v28 = vadd.f32 1.0, %v4687_v20  ;;  %v4829_v54 = vadd.f32 -1.0, %v4687_v20 }
  0x7d   : > { %v550_v23 = vmul.f32 16.0, %v4689_v21  ;;  %v4693_v24 = vsub.f32 %v541_v14, %v549_v22  ;;  %v626_v29 = vadd.f32 1.0, %v4689_v21  ;;  %vm7845_vm8 = vcmp.gt.f32.partialorder %v625_v28, -0.5 }
  0x7e   : > { %v4822_v51 = vadd.f32 -1.0, %v4689_v21 }
  0x7f   : > { %712 = vrot.lane.b32.xlu1 %v4647_v6, %s7888_s13  ;;  %710 = vrot.lane.b32.xlu0 %v4639_v5, %s7888_s13  ;;  %v4695_v25 = vsub.f32 %v542_v15, %v550_v23  ;;  %v587_v26 = vadd.f32 1.0, %v4693_v24  ;;  %vm575_vm3 = vcmp.gt.f32.partialorder %v4693_v24, -0.5  ;;  %vm577_vm4 = vcmp.lt.f32.partialorder %v4693_v24, 15.5  ;;  %v758_v15 = vld [vmem:[#allocation7] sm:$0xff] }
  0x80   : > { %vm4710_vm11 = vmand %vm575_vm3, %vm577_vm4  ;;  %vm628_vm13 = vcmp.gt.f32.partialorder %v626_v29, -0.5  ;;  %v553_v34 = vadd.f32 -1.0, %v4693_v24  ;;  %vm632_vm3 = vcmp.lt.f32.partialorder %v626_v29, 15.5 }
  0x81   : > { %v588_v27 = vadd.f32 1.0, %v4695_v25  ;;  %vm589_vm1 = vcmp.gt.f32.partialorder %v587_v26, -0.5  ;;  %vm591_vm2 = vcmp.lt.f32.partialorder %v587_v26, 15.5  ;;  %v554_v30 = vadd.f32 -1.0, %v4695_v25 }
  0x82   : > { %vm4704_vm7 = vmand %vm589_vm1, %vm591_vm2  ;;  %vm576_vm9 = vcmp.gt.f32.partialorder %v4695_v25, -0.5  ;;  %vm578_vm10 = vcmp.lt.f32.partialorder %v4695_v25, 15.5  ;;  %v7923_v32 = vsel %vm4710_vm11, 4294967295, %v7922_v32 }
  0x83   : > { %699 = vrot.lane.b32.xlu1 %v4639_v5, %s4386_s14  ;;  %696 = vrot.lane.b32.xlu0 %v4647_v6, %s4386_s14  ;;  %vm590_vm5 = vcmp.gt.f32.partialorder %v588_v27, -0.5  ;;  %vm592_vm6 = vcmp.lt.f32.partialorder %v588_v27, 15.5  ;;  %v7921_v31 = vsel %vm4704_vm7, 4294967295, %v7920_v31  ;;  %vm643_vm14 = vmand %vm4704_vm7, %vm7845_vm8  ;;  %vm556_vm15 = vcmp.gt.f32.partialorder %v554_v30, -0.5 }
  0x84   : > { %vm4714_vm12 = vmand %vm590_vm5, %vm592_vm6  ;;  %vm558_vm1 = vcmp.lt.f32.partialorder %v554_v30, 15.5  ;;  %vm7854_vm5 = vcmp.lt.f32.partialorder %v625_v28, 15.5  ;;  %vm555_vm8 = vcmp.gt.f32.partialorder %v553_v34, -0.5  ;;  %vm557_vm7 = vcmp.lt.f32.partialorder %v553_v34, 15.5 }
  0x85   : > { %v7925_v33 = vsel %vm4714_vm12, 4294967295, %v7924_v33  ;;  %vm4722_vm2 = vmand %vm576_vm9, %vm578_vm10 }
  0x86   : > { %v7927_v35 = vsel %vm4722_vm2, 4294967295, %v7926_v35  ;;  %vm644_vm4 = vmand %vm4714_vm12, %vm628_vm13 }
  0x87   : > { %687 = vrot.lane.b32.xlu1 %v4639_v5, %s4387_s27  ;;  %684 = vrot.lane.b32.xlu0 %v4647_v6, %s4387_s27  ;;  %vm4729_vm6 = vmand %vm556_vm15, %vm558_vm1  ;;  %vm7934_vm15 = vcmp.gt.f32.partialorder %v625_v28, -0.5 }
  0x88   : > { %v7929_v36 = vsel %vm4729_vm6, 4294967295, %v7928_v36  ;;  %vm638_vm0 = vmand %vm4722_vm2, %vm628_vm13 }
  0x89   : > { %vm4737_vm9 = vmand %vm644_vm4, %vm632_vm3 }
  0x8a   : > { %vm4742_vm10 = vmand %vm643_vm14, %vm7854_vm5  ;;  %v4806_v48 = vsel %vm4737_vm9, 1.0, %v7869_v0 }
  0x8b   : > { %675 = vrot.lane.b32.xlu1 %v4639_v5, %s4388_s2  ;;  %672 = vrot.lane.b32.xlu0 %v4647_v6, %s4388_s2  ;;  %vm637_vm1 = vmand %vm4710_vm11, %vm7934_vm15  ;;  %vm7857_vm15 = vcmp.gt.f32.partialorder %v4689_v21, -0.5  ;;  %v4811_v49 = vsel %vm4742_vm10, 1.0, %v7869_v0 }
  0x8c   : > { %vm630_vm2 = vmand %vm4729_vm6, %vm628_vm13  ;;  %vm7943_vm13 = vcmp.gt.f32.partialorder %v625_v28, -0.5 }
  0x8d   : > { %vm4753_vm12 = vmand %vm638_vm0, %vm632_vm3  ;;  %vm7860_vm0 = vcmp.gt.f32.partialorder %v4687_v20, -0.5 }
  0x8e   : > { %vm4757_vm4 = vmand %vm555_vm8, %vm557_vm7  ;;  %vm608_vm8 = vcmp.lt.f32.partialorder %v4689_v21, 15.5  ;;  %v4837_v58 = vsel %vm4753_vm12, 1.0, %v7869_v0 }
  0x8f   : > { %663 = vrot.lane.b32.xlu1 %v4639_v5, %s4389_s12  ;;  %659 = vrot.lane.b32.xlu0 %v4647_v6, %s4389_s12  ;;  %v7938_v40 = vsel %vm4757_vm4, 4294967295, %v7937_v40  ;;  %vm4762_vm14 = vmand %vm637_vm1, %vm7854_vm5  ;;  %vm7944_vm1 = vnez %v7925_v33 }
  0x90   : > { %v7940_v41 = vsel %vm4762_vm14, 4294967295, %v7939_v41  ;;  %vm4768_vm11 = vmand %vm630_vm2, %vm632_vm3  ;;  %vm7945_vm2 = vnez %v7921_v31  ;;  %vm7862_vm14 = vcmask 908288  }
  0x91   : > { %v7942_v42 = vsel %vm4768_vm11, 4294967295, %v7941_v42  ;;  %vm629_vm7 = vmand %vm4757_vm4, %vm7943_vm13  ;;  %vm7946_vm11 = vcmp.lt.f32.partialorder %v625_v28, 15.5 }
  0x92   : > { %vm620_vm5 = vmand %vm7944_vm1, %vm7857_vm15  ;;  %vm7861_vm15 = vcmask 916480   ;;  %vm7951_vm1 = vcmp.lt.f32.partialorder %v4687_v20, 15.5 }
  0x93   : > { %766 = vperm.xlu0 %4210, %v761_v8   ;;  %776 = vperm.xlu1 %4211, %v763_v9   ;;  %vm619_vm3 = vmand %vm7945_vm2, %vm7860_vm0 }
  0x94   : > { %vm4787_vm6 = vmand %vm629_vm7, %vm7946_vm11  ;;  %vm7954_vm11 = vcmp.gt.f32.partialorder %v4689_v21, -0.5 }
  0x95   : > { %vm4793_vm13 = vmand %vm620_vm5, %vm608_vm8  ;;  %vm7955_vm5 = vnez %v7927_v35  ;;  %v4867_v2 = vsel %vm4787_vm6, 1.0, %v7869_v0 }
  0x96   : > { %vm4799_vm4 = vmand %vm619_vm3, %vm7951_vm1  ;;  %vm7958_vm1 = vnez %v7923_v32  ;;  %v4909_v19 = vsel %vm4793_vm13, 1.0, %v7869_v0 }
  0x97   : > { %771 = vperm.xlu1 %4211, %v762_v10   ;;  %vm4817_vm7 = vmand %vm7955_vm5, %vm7954_vm11  ;;  %v4914_v22 = vsel %vm4799_vm4, 1.0, %v7869_v0  ;;  %vm7981_vm4 = vcmp.lt.f32.partialorder %v4687_v20, 15.5 }
  0x98   : > { %vm613_vm10 = vmand %vm7958_vm1, %vm7860_vm0  ;;  %vm7961_vm0 = vnez %v7940_v41 }
  0x99   : > { %vm7959_vm3 = vmmov %vm7954_vm11  ;;  %vm7960_vm11 = vnez %v7929_v36  ;;  %v4849_v62 = vsel %vm7961_vm0, 1.0, %v7869_v0  ;;  %vm7965_vm0 = vcmp.lt.f32.partialorder %v4687_v20, 15.5 }
  0x9a   : > { %vm606_vm9 = vmand %vm7960_vm11, %vm7959_vm3  ;;  %vm7964_vm3 = vnez %v7942_v42 }
  0x9b   : > { %vm4855_vm12 = vmand %vm4817_vm7, %vm608_vm8  ;;  %v4862_v1 = vsel %vm7964_vm3, 1.0, %v7869_v0  ;;  %vm7973_vm7 = vnez %v7938_v40 }
  0x9c   : > { %vm4879_vm3 = vmand %vm606_vm9, %vm608_vm8  ;;  %vm7872_vm8 = vcmask 1039360   ;;  %vm7976_vm9 = vcmp.gt.f32.partialorder %v4822_v51, -0.5  ;;  %v4919_v23 = vsel %vm4855_vm12, 1.0, %v7869_v0  ;;  %vm7986_vm12 = vcmp.gt.f32.partialorder %v4822_v51, -0.5 }
  0x9d   : > { %v709_v37 = vmul.f32 %v4647_v6, %v4919_v23  ;;  %v4960_v41 = vsel %vm4879_vm3, 1.0, %v7869_v0  ;;  %vm7868_vm3 = vcmask 121856  }
  0xe5   : > { %v735_v43 = vpop.permute.xlu1 %734  ;;  %v747_v44 = vpop.permute.xlu0 %746 }
  0xe9   : > { %v737_v52 = vpop.permute.xlu1 %736  ;;  %v749_v53 = vpop.permute.xlu0 %748 }
  0xea   : > { %v743_v55 = vsel %vm7861_vm15, %v737_v52, %v735_v43  ;;  %v755_v56 = vsel %vm7862_vm14, %v749_v53, %v747_v44  ;;  %v751_v57 = vsel %vm7862_vm14, %v747_v44, %v749_v53  ;;  %v739_v59 = vsel %vm7861_vm15, %v735_v43, %v737_v52  ;;  %vm4871_vm15 = vmand %vm613_vm10, %vm7965_vm0 }
  0xeb   : > { %v757_v60 = vmul.f32 %v755_v56, %v4806_v48  ;;  %v756_v61 = vmul.f32 %v751_v57, %v4811_v49  ;;  %v745_v9 = vmul.f32 %v743_v55, %v4837_v58  ;;  %vm7970_vm14 = vcmask 924672  }
  0xec   : > { %vm7971_vm10 = vmmov %vm7970_vm14  ;;  %v744_v14 = vmul.f32 %v739_v59, %v4849_v62  ;;  %vm7972_vm0 = vcmp.gt.f32.partialorder %v4687_v20, -0.5  ;;  %v4929_v28 = vsel %vm4871_vm15, 1.0, %v7869_v0  ;;  %vm7875_vm15 = vcmask 7168  }
  0xed   : > { %v725_v7 = vpop.permute.xlu1 %724  ;;  %803 = vmatprep.subr.mxu1 %v757_v60  ;;  %v723_v8 = vpop.permute.xlu0 %722  ;;  %vm4891_vm11 = vmand %vm7973_vm7, %vm7972_vm0  ;;  %vm567_vm0 = vcmp.lt.f32.partialorder %v4829_v54, 15.5  ;;  %v708_v39 = vmul.f32 %v4639_v5, %v4929_v28 }
  0xee   : > { %v727_v12 = vsel %vm7970_vm14, %v723_v8, %v725_v7  ;;  %v731_v13 = vsel %vm7971_vm10, %v725_v7, %v723_v8  ;;  %804 = vmatpush1.msra.mxu1 %v756_v61  ;;  %vm568_vm14 = vcmp.lt.f32.partialorder %v4822_v51, 15.5  ;;  %vm7977_vm10 = vnez %v7925_v33  ;;  %vm609_vm13 = vmand %vm4891_vm11, %vm7981_vm4 }
  0xef   : > { %805 = vmatprep.subr.mxu1 %v745_v9  ;;  %v733_v16 = vmul.f32 %v731_v13, %v4862_v1  ;;  %v732_v17 = vmul.f32 %v727_v12, %v4867_v2  ;;  %vm4902_vm6 = vmand %vm7977_vm10, %vm7976_vm9  ;;  %vm7980_vm9 = vcmp.gt.f32.partialorder %v4829_v54, -0.5  ;;  %v4963_v42 = vsel %vm609_vm13, 1.0, %v7869_v0 }
  0xf0   : > { %806 = vmatpush1.msra.mxu1 %v744_v14  ;;  %vm595_vm10 = vmand %vm7945_vm2, %vm7980_vm9  ;;  %vm7992_vm13 = vnez %v7929_v36 }
  0xf1   : > { %v713_v26 = vpop.permute.xlu1 %712  ;;  %807 = vmatprep.subr.mxu1 %v733_v16  ;;  %v711_v27 = vpop.permute.xlu0 %710  ;;  %vm4941_vm2 = vmand %vm4902_vm6, %vm568_vm14  ;;  %v759_v16 = vld [vmem:[#allocation7 + $0x8] sm:$0xff] }
  0xf2   : > { %v715_v29 = vsel %vm7872_vm8, %v711_v27, %v713_v26  ;;  %v719_v30 = vsel %vm7872_vm8, %v713_v26, %v711_v27  ;;  %808 = vmatpush1.msra.mxu1 %v732_v17  ;;  %vm4951_vm11 = vmand %vm595_vm10, %vm567_vm0  ;;  %v4986_v32 = vsel %vm4941_vm2, 1.0, %v7869_v0  ;;  %v760_v17 = vld [vmem:[#allocation7 + $0x10] sm:$0xff] }
  0xf3   : > { %v721_v33 = vmul.f32 %v719_v30, %v4909_v19  ;;  %v720_v34 = vmul.f32 %v715_v29, %v4914_v22  ;;  %vm582_vm6 = vmand %vm7955_vm5, %vm7986_vm12  ;;  %7989 = vst [vmem:[#allocation19_spill] sm:$0xff] %v4986_v32  ;;  %v4991_v47 = vsel %vm4951_vm11, 1.0, %v7869_v0 }
  0xf4   : > { %vm581_vm10 = vmand %vm7958_vm1, %vm7980_vm9  ;;  %7990 = vst [vmem:[#allocation20_spill] sm:$0xff] %v4991_v47 }
  0xf5   : > { %v700_v6 = vpop.permute.xlu1 %699  ;;  %809 = vmatprep.subr.mxu1 %v721_v33  ;;  %v697_v43 = vpop.permute.xlu0 %696  ;;  %vm4979_vm5 = vmand %vm582_vm6, %vm568_vm14  ;;  %vm7871_vm6 = vcmask 130048  }
  0xf6   : > { %v702_v5 = vsel %vm7875_vm15, %v700_v6, %v697_v43  ;;  %v705_v44 = vsel %vm7875_vm15, %v697_v43, %v700_v6  ;;  %810 = vmatpush1.msra.mxu1 %v720_v34  ;;  %vm583_vm1 = vmand %vm581_vm10, %vm567_vm0  ;;  %v5010_v36 = vsel %vm4979_vm5, 1.0, %v7869_v0  ;;  %vm7867_vm10 = vcmask 138240  }
  0xf7   : > { %811 = vmatprep.subr.mxu1 %v709_v37  ;;  %v707_v45 = vmul.f32 %v702_v5, %v4960_v41  ;;  %v706_v35 = vmul.f32 %v705_v44, %v4963_v42  ;;  %vm7991_vm4 = vmmov %vm7986_vm12  ;;  %7994 = vst [vmem:[#allocation21_spill] sm:$0xff] %v5010_v36  ;;  %v5013_v59 = vsel %vm583_vm1, 1.0, %v7869_v0  ;;  %vm7998_vm5 = vcmask 908288  }
  0xf8   : > { %812 = vmatpush1.msra.mxu1 %v708_v39  ;;  %vm566_vm12 = vmand %vm7992_vm13, %vm7991_vm4  ;;  %7995 = vst [vmem:[#allocation22_spill] sm:$0xff] %v5013_v59 }
  0xf9   : > { %v688_v50 = vpop.permute.xlu1 %687  ;;  %v685_v52 = vpop.permute.xlu0 %684  ;;  %813 = vmatprep.subr.mxu1 %v707_v45  ;;  %vm7993_vm2 = vmmov %vm7980_vm9 }
  0xfa   : > { %v690_v53 = vsel %vm7868_vm3, %v688_v50, %v685_v52  ;;  %v693_v55 = vsel %vm7868_vm3, %v685_v52, %v688_v50  ;;  %814 = vmatpush1.msra.mxu1 %v706_v35  ;;  %vm565_vm11 = vmand %vm7973_vm7, %vm7993_vm2 }
  0xfb   : > { %v695_v56 = vmul.f32 %v690_v53, %v4986_v32  ;;  %v694_v57 = vmul.f32 %v693_v55, %v4991_v47  ;;  %vm570_vm9 = vmand %vm566_vm12, %vm568_vm14  ;;  %vm779_vm14 = vcmask 588800   ;;  %v1155_v55 = vld [vmem:[%s7819_s4 + $0x8] sm:$0xff] }
  0xfc   : > { %vm569_vm7 = vmand %vm565_vm11, %vm567_vm0  ;;  %v5024_v8 = vsel %vm570_vm9, 1.0, %v7869_v0  ;;  %vm1178_vm0 = vcmask 719872   ;;  %vm8004_vm11 = vcmask 916480  }
  0xfd   : > { %v676_v60 = vpop.permute.xlu1 %675  ;;  %v673_v61 = vpop.permute.xlu0 %672  ;;  %815 = vmatprep.subr.mxu1 %v695_v56  ;;  %7996 = vst [vmem:[#allocation23_spill] sm:$0xff] %v5024_v8  ;;  %v5027_v51 = vsel %vm569_vm7, 1.0, %v7869_v0  ;;  %v1162_v56 = vld [vmem:[%s7820_s5 + $0x10] sm:$0xff]  ;;  %vm7999_vm1 = vmmov %vm7998_vm5 }
  0xfe   : > { %v678_v40 = vsel %vm7871_vm6, %v676_v60, %v673_v61  ;;  %v681_v63 = vsel %vm7871_vm6, %v673_v61, %v676_v60  ;;  %816 = vmatpush1.msra.mxu1 %v694_v57  ;;  %7997 = vst [vmem:[#allocation24_spill] sm:$0xff] %v5027_v51  ;;  %v1160_v57 = vld [vmem:[%s7820_s5] sm:$0xff]  ;;  %v1161_v60 = vld [vmem:[%s7820_s5 + $0x8] sm:$0xff]  ;;  %vm8000_vm4 = vmmov %vm7999_vm1 }
  0xff   : > { %v683_v3 = vmul.f32 %v678_v40, %v5010_v36  ;;  %v682_v7 = vmul.f32 %v681_v63, %v5013_v59  ;;  %vm8001_vm13 = vmmov %vm7999_vm1 }
 0x100   : > { %vm8002_vm12 = vmmov %vm7999_vm1 }
 0x101   : > { %v664_v9 = vpop.permute.xlu1 %663  ;;  %v660_v10 = vpop.permute.xlu0 %659  ;;  %817 = vmatprep.subr.mxu1 %v683_v3  ;;  %vm8003_vm2 = vmmov %vm7999_vm1 }
 0x102   : > { %v666_v54 = vsel %vm7867_vm10, %v664_v9, %v660_v10  ;;  %v669_v12 = vsel %vm7867_vm10, %v660_v10, %v664_v9  ;;  %818 = vmatpush1.msra.mxu1 %v682_v7  ;;  %vm8005_vm9 = vmmov %vm8004_vm11 }
 0x103   : > { %v671_v13 = vmul.f32 %v666_v54, %v5024_v8  ;;  %v670_v14 = vmul.f32 %v669_v12, %v5027_v51  ;;  %vm8006_vm7 = vmmov %vm8005_vm9 }
 0x105   : > { %819 = vmatprep.subr.mxu1 %v671_v13 }
 0x106   : > { %820 = vmatpush1.msra.mxu1 %v670_v14 }
 0x107   : > { %3851 = vmatmul.mubr.msk.f32.vlgmr.msra.gmra.mxu1 %vm779_vm14, %v758_v15 }
 0x108   : > { %859 = vmatprep.mubr.f32.mxu1 %v7869_v0 }
 0x10b   : > { %3852 = vmatmul.mubr.msk.f32.gmra.mxu1 %vm779_vm14, %v759_v16 }
 0x10c   : > { %865 = vmatprep.mubr.f32.mxu1 %v7869_v0 }
 0x10e   : > { %v767_v18 = vpop.permute.xlu0 %766  ;;  %v777_v34 = vpop.permute.xlu1 %776 }
 0x10f   : > { %3853 = vmatmul.mubr.msk.f32.gmra.mxu1 %vm779_vm14, %v760_v17  ;;  %vm8007_vm14 = vmmov %vm8006_vm7 }
 0x110   : > { %3854 = vmatprep.mubr.msk.f32.mxu1 %vm1178_vm0, %v1155_v55 }
 0x112   : > { %v772_v37 = vpop.permute.xlu1 %771 }
 0x1c7   : > { %v855_v26 = vpop.f32.mrf.mxu1 }
 0x1c8   : > { %v856_v27 = vadd.f32 %v855_v26, %v767_v18 }
 0x1c9   : > { %v857_v30 = vpop.f32.mrf.mxu1 }
 0x1ca   : > { %v5035_v29 = vmax.f32 %v856_v27, 0.0  ;;  %v858_v31 = vadd.f32 %v857_v30, %v767_v18 }
 0x1cb   : > { %v861_v38 = vpop.f32.mrf.mxu1 }
 0x1cc   : > { %992 = vrot.lane.b32.xlu1 %v5035_v29, %s4386_s14  ;;  %1022 = vrot.lane.b32.xlu0 %v5035_v29, %s7888_s13  ;;  %v5045_v33 = vmax.f32 %v858_v31, 0.0  ;;  %v862_v39 = vadd.f32 %v861_v38, %v772_v37 }
 0x1cd   : > { %v863_v6 = vpop.f32.mrf.mxu1 }
 0x1ce   : > { %v864_v43 = vadd.f32 %v863_v6, %v772_v37  ;;  %v5063_v5 = vmax.f32 %v862_v39, 0.0  ;;  %v1017_v39 = vmul.f32 %v5045_v33, %v4919_v23  ;;  %v1016_v6 = vmul.f32 %v5035_v29, %v4929_v28 }
 0x1cf   : > { %v867_v45 = vpop.f32.mrf.mxu1 }
 0x1d0   : > { %959 = vrot.lane.b32.xlu1 %v5035_v29, %s4387_s27  ;;  %1121 = vrot.lane.b32.xlu0 %v5035_v29, %s7886_s28  ;;  %v5069_v44 = vmax.f32 %v864_v43, 0.0  ;;  %v868_v35 = vadd.f32 %v867_v45, %v777_v34 }
 0x1d1   : > { %v869_v46 = vpop.f32.mrf.mxu1 }
 0x1d2   : > { %v876_v50 = vmax.f32 %v868_v35, 0.0  ;;  %v870_v52 = vadd.f32 %v869_v46, %v777_v34  ;;  %v1019_v31 = vmul.f32 %v5069_v44, %v4919_v23  ;;  %v1018_v34 = vmul.f32 %v5063_v5, %v4929_v28 }
 0x1d4   : > { %926 = vrot.lane.b32.xlu1 %v5035_v29, %s4388_s2  ;;  %983 = vrot.lane.b32.xlu0 %v5045_v33, %s4386_s14  ;;  %v877_v53 = vmax.f32 %v870_v52, 0.0  ;;  %v1020_v30 = vmul.f32 %v876_v50, %v4929_v28 }
 0x1d6   : > { %v1021_v27 = vmul.f32 %v877_v53, %v4919_v23 }
 0x1d8   : > { %893 = vrot.lane.b32.xlu1 %v5035_v29, %s4389_s12  ;;  %950 = vrot.lane.b32.xlu0 %v5045_v33, %s4387_s27 }
 0x1dc   : > { %1024 = vrot.lane.b32.xlu1 %v5045_v33, %s7888_s13  ;;  %917 = vrot.lane.b32.xlu0 %v5045_v33, %s4388_s2 }
 0x1e0   : > { %1123 = vrot.lane.b32.xlu1 %v5045_v33, %s7886_s28  ;;  %881 = vrot.lane.b32.xlu0 %v5045_v33, %s4389_s12 }
 0x1e4   : > { %994 = vrot.lane.b32.xlu1 %v5063_v5, %s4386_s14  ;;  %1125 = vrot.lane.b32.xlu0 %v5063_v5, %s7886_s28 }
 0x1e8   : > { %961 = vrot.lane.b32.xlu1 %v5063_v5, %s4387_s27  ;;  %985 = vrot.lane.b32.xlu0 %v5069_v44, %s4386_s14 }
 0x1ec   : > { %928 = vrot.lane.b32.xlu1 %v5063_v5, %s4388_s2  ;;  %952 = vrot.lane.b32.xlu0 %v5069_v44, %s4387_s27 }
 0x1f0   : > { %895 = vrot.lane.b32.xlu1 %v5063_v5, %s4389_s12  ;;  %919 = vrot.lane.b32.xlu0 %v5069_v44, %s4388_s2 }
 0x1f4   : > { %1127 = vrot.lane.b32.xlu1 %v5069_v44, %s7886_s28  ;;  %883 = vrot.lane.b32.xlu0 %v5069_v44, %s4389_s12 }
 0x1f8   : > { %996 = vrot.lane.b32.xlu1 %v876_v50, %s4386_s14  ;;  %1129 = vrot.lane.b32.xlu0 %v876_v50, %s7886_s28 }
 0x1fc   : > { %963 = vrot.lane.b32.xlu1 %v876_v50, %s4387_s27  ;;  %987 = vrot.lane.b32.xlu0 %v877_v53, %s4386_s14 }
 0x200   : > { %930 = vrot.lane.b32.xlu1 %v876_v50, %s4388_s2  ;;  %954 = vrot.lane.b32.xlu0 %v877_v53, %s4387_s27 }
 0x204   : > { %897 = vrot.lane.b32.xlu1 %v876_v50, %s4389_s12  ;;  %1096 = vrot.lane.b32.xlu0 %v876_v50, %s7865_s19 }
 0x208   : > { %1094 = vrot.lane.b32.xlu1 %v5069_v44, %s7865_s19  ;;  %921 = vrot.lane.b32.xlu0 %v877_v53, %s4388_s2 }
 0x20c   : > { %1090 = vrot.lane.b32.xlu1 %v5045_v33, %s7865_s19  ;;  %885 = vrot.lane.b32.xlu0 %v877_v53, %s4389_s12 }
 0x210   : > { %1061 = vrot.lane.b32.xlu1 %v5069_v44, %s7863_s18  ;;  %1092 = vrot.lane.b32.xlu0 %v5063_v5, %s7865_s19 }
 0x214   : > { %1131 = vrot.lane.b32.xlu1 %v877_v53, %s7886_s28  ;;  %1088 = vrot.lane.b32.xlu0 %v5035_v29, %s7865_s19 }
 0x218   : > { %1098 = vrot.lane.b32.xlu1 %v877_v53, %s7865_s19  ;;  %1063 = vrot.lane.b32.xlu0 %v876_v50, %s7863_s18  ;;  %s8016_s19 = smov 112  }
 0x21c   : > { %1057 = vrot.lane.b32.xlu1 %v5045_v33, %s7863_s18  ;;  %1059 = vrot.lane.b32.xlu0 %v5063_v5, %s7863_s18 }
 0x220   : > { %1065 = vrot.lane.b32.xlu1 %v877_v53, %s7863_s18  ;;  %1055 = vrot.lane.b32.xlu0 %v5035_v29, %s7863_s18  ;;  %s8017_s18 = smov 113  }
 0x224   : > { %1032 = vrot.lane.b32.xlu1 %v877_v53, %s7888_s13  ;;  %1030 = vrot.lane.b32.xlu0 %v876_v50, %s7888_s13 }
 0x228   : > { %1028 = vrot.lane.b32.xlu1 %v5069_v44, %s7888_s13  ;;  %1026 = vrot.lane.b32.xlu0 %v5063_v5, %s7888_s13 }
 0x22c   : > { %1175 = vperm.xlu1 %4211, %v1162_v56   ;;  %1165 = vperm.xlu0 %4210, %v1160_v57  }
 0x230   : > { %1170 = vperm.xlu0 %4210, %v1161_v60  }
 0x23e   : > { %v993_v61 = vpop.permute.xlu1 %992  ;;  %v1023_v40 = vpop.permute.xlu0 %1022 }
 0x242   : > { %v5136_v63 = vpop.permute.xlu1 %959  ;;  %v5138_v3 = vpop.permute.xlu0 %1121 }
 0x246   : > { %v5140_v7 = vpop.permute.xlu1 %926  ;;  %v984_v9 = vpop.permute.xlu0 %983 }
 0x24a   : > { %v5142_v10 = vpop.permute.xlu1 %893  ;;  %v5144_v54 = vpop.permute.xlu0 %950 }
 0x24e   : > { %v1025_v12 = vpop.permute.xlu1 %1024  ;;  %v5146_v13 = vpop.permute.xlu0 %917 }
 0x24f   : > { %v1034_v14 = vsel %vm7872_vm8, %v1023_v40, %v1025_v12  ;;  %v1046_v15 = vsel %vm7872_vm8, %v1025_v12, %v1023_v40 }
 0x250   : > { %v1049_v16 = vmul.f32 %v1034_v14, %v4914_v22  ;;  %v1050_v17 = vmul.f32 %v1046_v15, %v4909_v19  ;;  %v998_v15 = vsel %vm7875_vm15, %v993_v61, %v984_v9 }
 0x252   : > { %v5152_v18 = vpop.permute.xlu1 %1123  ;;  %1188 = vmatprep.subr.mxu1 %v1050_v17  ;;  %v5154_v26 = vpop.permute.xlu0 %881 }
 0x253   : > { %1189 = vmatpush1.msra.mxu1 %v1049_v16  ;;  %v1007_v16 = vsel %vm7875_vm15, %v984_v9, %v993_v61 }
 0x254   : > { %1190 = vmatprep.subr.mxu1 %v1021_v27 }
 0x255   : > { %1191 = vmatpush1.msra.mxu1 %v1020_v30 }
 0x256   : > { %v995_v37 = vpop.permute.xlu1 %994  ;;  %1192 = vmatprep.subr.mxu1 %v1019_v31  ;;  %v5162_v38 = vpop.permute.xlu0 %1125 }
 0x257   : > { %1193 = vmatpush1.msra.mxu1 %v1018_v34 }
 0x258   : > { %1194 = vmatprep.subr.mxu1 %v1017_v39  ;;  %v1011_v39 = vmul.f32 %v998_v15, %v4960_v41 }
 0x259   : > { %1195 = vmatpush1.msra.mxu1 %v1016_v6  ;;  %v1010_v6 = vmul.f32 %v1007_v16, %v4963_v42 }
 0x25a   : > { %v962_v43 = vpop.permute.xlu1 %961  ;;  %v986_v45 = vpop.permute.xlu0 %985 }
 0x25b   : > { %v999_v29 = vsel %vm7875_vm15, %v995_v37, %v986_v45  ;;  %v1008_v40 = vsel %vm7875_vm15, %v986_v45, %v995_v37 }
 0x25c   : > { %v1013_v30 = vmul.f32 %v999_v29, %v4960_v41  ;;  %v1012_v31 = vmul.f32 %v1008_v40, %v4963_v42 }
 0x25e   : > { %v929_v44 = vpop.permute.xlu1 %928  ;;  %v953_v35 = vpop.permute.xlu0 %952 }
 0x25f   : > { %v966_v45 = vsel %vm7868_vm3, %v962_v43, %v953_v35  ;;  %v975_v61 = vsel %vm7868_vm3, %v953_v35, %v962_v43 }
 0x260   : > { %v980_v43 = vmul.f32 %v966_v45, %v4986_v32  ;;  %v979_v35 = vmul.f32 %v975_v61, %v4991_v47 }
 0x262   : > { %v5168_v46 = vpop.permute.xlu1 %895  ;;  %v920_v5 = vpop.permute.xlu0 %919 }
 0x263   : > { %v933_v15 = vsel %vm7871_vm6, %v929_v44, %v920_v5 }
 0x266   : > { %v5170_v50 = vpop.permute.xlu1 %1127  ;;  %v5172_v52 = vpop.permute.xlu0 %883 }
 0x26a   : > { %v997_v53 = vpop.permute.xlu1 %996  ;;  %v5174_v55 = vpop.permute.xlu0 %1129 }
 0x26e   : > { %v964_v33 = vpop.permute.xlu1 %963  ;;  %v988_v56 = vpop.permute.xlu0 %987 }
 0x26f   : > { %v1000_v57 = vsel %vm7875_vm15, %v997_v53, %v988_v56  ;;  %v1009_v60 = vsel %vm7875_vm15, %v988_v56, %v997_v53 }
 0x270   : > { %v1014_v12 = vmul.f32 %v1009_v60, %v4963_v42  ;;  %v1015_v14 = vmul.f32 %v1000_v57, %v4960_v41  ;;  %v974_v57 = vsel %vm7868_vm3, %v5144_v54, %v5136_v63 }
 0x272   : > { %v931_v17 = vpop.permute.xlu1 %930  ;;  %v955_v27 = vpop.permute.xlu0 %954  ;;  %1196 = vmatprep.subr.mxu1 %v1015_v14  ;;  %v977_v14 = vmul.f32 %v974_v57, %v4991_v47 }
 0x273   : > { %v967_v34 = vsel %vm7868_vm3, %v964_v33, %v955_v27  ;;  %1197 = vmatpush1.msra.mxu1 %v1014_v12  ;;  %v976_v37 = vsel %vm7868_vm3, %v955_v27, %v964_v33  ;;  %v965_v33 = vsel %vm7868_vm3, %v5136_v63, %v5144_v54  ;;  %v942_v54 = vsel %vm7871_vm6, %v920_v5, %v929_v44 }
 0x274   : > { %1198 = vmatprep.subr.mxu1 %v1013_v30  ;;  %v982_v56 = vmul.f32 %v967_v34, %v4986_v32  ;;  %v981_v29 = vmul.f32 %v976_v37, %v4991_v47  ;;  %v978_v12 = vmul.f32 %v965_v33, %v4986_v32  ;;  %v941_v34 = vsel %vm7871_vm6, %v5146_v13, %v5140_v7 }
 0x275   : > { %1199 = vmatpush1.msra.mxu1 %v1012_v31  ;;  %v932_v31 = vsel %vm7871_vm6, %v5140_v7, %v5146_v13  ;;  %v947_v44 = vmul.f32 %v933_v15, %v5010_v36  ;;  %v946_v5 = vmul.f32 %v942_v54, %v5013_v59  ;;  %v944_v61 = vmul.f32 %v941_v34, %v5013_v59 }
 0x276   : > { %v898_v9 = vpop.permute.xlu1 %897  ;;  %v5192_v53 = vpop.permute.xlu0 %1096  ;;  %1200 = vmatprep.subr.mxu1 %v1011_v39  ;;  %v945_v45 = vmul.f32 %v932_v31, %v5010_v36  ;;  %v900_v7 = vsel %vm7867_vm10, %v5168_v46, %v5172_v52  ;;  %v909_v13 = vsel %vm7867_vm10, %v5172_v52, %v5168_v46  ;;  %v1146_v15 = vsel %vm7998_vm5, %v5170_v50, %v5162_v38  ;;  %vm8008_vm5 = vmmov %vm8006_vm7 }
 0x277   : > { %1201 = vmatpush1.msra.mxu1 %v1010_v6  ;;  %v914_v46 = vmul.f32 %v900_v7, %v5024_v8  ;;  %v913_v52 = vmul.f32 %v909_v13, %v5027_v51  ;;  %v1151_v34 = vmul.f32 %v1146_v15, %v4806_v48 }
 0x278   : > { %1202 = vmatprep.subr.mxu1 %v982_v56 }
 0x279   : > { %1203 = vmatpush1.msra.mxu1 %v981_v29  ;;  %v899_v29 = vsel %vm7867_vm10, %v5142_v10, %v5154_v26 }
 0x27a   : > { %v5204_v60 = vpop.permute.xlu1 %1094  ;;  %v922_v40 = vpop.permute.xlu0 %921  ;;  %1204 = vmatprep.subr.mxu1 %v980_v43  ;;  %v908_v43 = vsel %vm7867_vm10, %v5154_v26, %v5142_v10 }
 0x27b   : > { %v934_v16 = vsel %vm7871_vm6, %v931_v17, %v922_v40  ;;  %v943_v63 = vsel %vm7871_vm6, %v922_v40, %v931_v17  ;;  %1205 = vmatpush1.msra.mxu1 %v979_v35 }
 0x27c   : > { %v948_v27 = vmul.f32 %v943_v63, %v5013_v59  ;;  %1206 = vmatprep.subr.mxu1 %v978_v12  ;;  %v949_v30 = vmul.f32 %v934_v16, %v5010_v36  ;;  %v912_v12 = vmul.f32 %v899_v29, %v5024_v8  ;;  %v1134_v16 = vsel %vm8001_vm13, %v5162_v38, %v5170_v50 }
 0x27d   : > { %1207 = vmatpush1.msra.mxu1 %v977_v14  ;;  %v911_v14 = vmul.f32 %v908_v43, %v5027_v51  ;;  %v1150_v38 = vmul.f32 %v1134_v16, %v4811_v49 }
 0x27e   : > { %v5220_v37 = vpop.permute.xlu1 %1090  ;;  %v886_v17 = vpop.permute.xlu0 %885  ;;  %1208 = vmatprep.subr.mxu1 %v949_v30  ;;  %v1133_v30 = vsel %vm8003_vm2, %v5138_v3, %v5152_v18 }
 0x27f   : > { %v901_v39 = vsel %vm7867_vm10, %v898_v9, %v886_v17  ;;  %1209 = vmatpush1.msra.mxu1 %v948_v27  ;;  %v910_v6 = vsel %vm7867_vm10, %v886_v17, %v898_v9  ;;  %v1145_v27 = vsel %vm8002_vm12, %v5152_v18, %v5138_v3 }
 0x280   : > { %1210 = vmatprep.subr.mxu1 %v947_v44  ;;  %v916_v9 = vmul.f32 %v901_v39, %v5024_v8  ;;  %v915_v57 = vmul.f32 %v910_v6, %v5027_v51  ;;  %v1149_v44 = vmul.f32 %v1145_v27, %v4806_v48 }
 0x281   : > { %1211 = vmatpush1.msra.mxu1 %v946_v5  ;;  %v1148_v5 = vmul.f32 %v1133_v30, %v4811_v49 }
 0x282   : > { %v5234_v56 = vpop.permute.xlu1 %1061  ;;  %v1093_v33 = vpop.permute.xlu0 %1092  ;;  %1212 = vmatprep.subr.mxu1 %v945_v45 }
 0x283   : > { %1213 = vmatpush1.msra.mxu1 %v944_v61  ;;  %v1113_v3 = vsel %vm8006_vm7, %v5204_v60, %v1093_v33  ;;  %v1101_v18 = vsel %vm8007_vm14, %v1093_v33, %v5204_v60 }
 0x284   : > { %1214 = vmatprep.subr.mxu1 %v916_v9  ;;  %v1118_v13 = vmul.f32 %v1113_v3, %v4837_v58  ;;  %v1117_v9 = vmul.f32 %v1101_v18, %v4849_v62  ;;  %v1157_v3 = vld [vmem:[%s7819_s4 + $0x18] sm:$0xff]  ;;  %v1156_v18 = vld [vmem:[%s7819_s4 + $0x10] sm:$0xff] }
 0x285   : > { %1215 = vmatpush1.msra.mxu1 %v915_v57 }
 0x286   : > { %v1132_v35 = vpop.permute.xlu1 %1131  ;;  %v1089_v40 = vpop.permute.xlu0 %1088  ;;  %1216 = vmatprep.subr.mxu1 %v914_v46 }
 0x287   : > { %v1135_v10 = vsel %vm7999_vm1, %v5174_v55, %v1132_v35  ;;  %v1147_v26 = vsel %vm8000_vm4, %v1132_v35, %v5174_v55  ;;  %1217 = vmatpush1.msra.mxu1 %v913_v52  ;;  %vm8009_vm1 = vmmov %vm8008_vm5  ;;  %vm8010_vm4 = vcmask 924672  }
 0x288   : > { %v1152_v63 = vmul.f32 %v1135_v10, %v4811_v49  ;;  %1218 = vmatprep.subr.mxu1 %v912_v12  ;;  %v1153_v54 = vmul.f32 %v1147_v26, %v4806_v48  ;;  %v1100_v7 = vsel %vm8009_vm1, %v1089_v40, %v5220_v37  ;;  %vm8011_vm13 = vmmov %vm8010_vm4 }
 0x289   : > { %1219 = vmatpush1.msra.mxu1 %v911_v14  ;;  %v1115_v57 = vmul.f32 %v1100_v7, %v4849_v62  ;;  %vm8012_vm12 = vmmov %vm8010_vm4 }
 0x28a   : > { %v1099_v55 = vpop.permute.xlu1 %1098  ;;  %v1064_v31 = vpop.permute.xlu0 %1063  ;;  %1230 = vmatprep.subr.mxu1 %v1153_v54  ;;  %vm8013_vm2 = vmmov %vm8010_vm4 }
 0x28b   : > { %v1114_v50 = vsel %vm8004_vm11, %v1099_v55, %v5192_v53  ;;  %1231 = vmatpush2.msra.mxu1 %v1152_v63  ;;  %v1102_v17 = vsel %vm8005_vm9, %v5192_v53, %v1099_v55  ;;  %v1112_v53 = vsel %vm8008_vm5, %v5220_v37, %v1089_v40  ;;  %vm8014_vm11 = vmmov %vm8013_vm2 }
 0x28c   : > { %1232 = vmatprep.subr.mxu1 %v1151_v34  ;;  %v1120_v45 = vmul.f32 %v1114_v50, %v4837_v58  ;;  %v1119_v61 = vmul.f32 %v1102_v17, %v4849_v62  ;;  %v1116_v29 = vmul.f32 %v1112_v53, %v4837_v58  ;;  %vm8015_vm9 = vmmov %vm8013_vm2 }
 0x28d   : > { %1233 = vmatpush2.msra.mxu1 %v1150_v38 }
 0x28e   : > { %v1058_v39 = vpop.permute.xlu1 %1057  ;;  %v1060_v6 = vpop.permute.xlu0 %1059  ;;  %1234 = vmatprep.subr.mxu1 %v1149_v44 }
 0x28f   : > { %1235 = vmatpush2.msra.mxu1 %v1148_v5  ;;  %v1080_v43 = vsel %vm8010_vm4, %v5234_v56, %v1060_v6  ;;  %v1068_v52 = vsel %vm8013_vm2, %v1060_v6, %v5234_v56  ;;  %v1154_v5 = vld [vmem:[%s7819_s4] sm:$0xff] }
 0x290   : > { %1236 = vmatprep.subr.mxu1 %v1120_v45  ;;  %v1085_v26 = vmul.f32 %v1080_v43, %v4862_v1  ;;  %v1084_v16 = vmul.f32 %v1068_v52, %v4867_v2  ;;  %v1158_v6 = vld [vmem:[%s7819_s4 + $0x20] sm:$0xff] }
 0x291   : > { %1237 = vmatpush2.msra.mxu1 %v1119_v61 }
 0x292   : > { %v1066_v60 = vpop.permute.xlu1 %1065  ;;  %v1056_v33 = vpop.permute.xlu0 %1055  ;;  %1238 = vmatprep.subr.mxu1 %v1118_v13 }
 0x293   : > { %v1069_v46 = vsel %vm8011_vm13, %v1064_v31, %v1066_v60  ;;  %v1081_v37 = vsel %vm8012_vm12, %v1066_v60, %v1064_v31  ;;  %1239 = vmatpush2.msra.mxu1 %v1117_v9  ;;  %v1079_v12 = vsel %vm8014_vm11, %v1058_v39, %v1056_v33  ;;  %v1067_v14 = vsel %vm8015_vm9, %v1056_v33, %v1058_v39  ;;  %v1159_v39 = vld [vmem:[%s7819_s4 + $0x28] sm:$0xff] }
 0x294   : > { %v1086_v35 = vmul.f32 %v1069_v46, %v4867_v2  ;;  %1240 = vmatprep.subr.mxu1 %v1116_v29  ;;  %v1087_v40 = vmul.f32 %v1081_v37, %v4862_v1  ;;  %v1083_v54 = vmul.f32 %v1079_v12, %v4862_v1  ;;  %v1082_v27 = vmul.f32 %v1067_v14, %v4867_v2 }
 0x295   : > { %1241 = vmatpush2.msra.mxu1 %v1115_v57  ;;  %vm8024_vm13 = vcmask 916480  }
 0x296   : > { %v1033_v15 = vpop.permute.xlu1 %1032  ;;  %v1031_v10 = vpop.permute.xlu0 %1030  ;;  %1242 = vmatprep.subr.mxu1 %v1087_v40  ;;  %vm8025_vm12 = vmmov %vm8024_vm13 }
 0x297   : > { %v1048_v63 = vsel %vm7872_vm8, %v1033_v15, %v1031_v10  ;;  %1243 = vmatpush2.msra.mxu1 %v1086_v35  ;;  %v1036_v56 = vsel %vm7872_vm8, %v1031_v10, %v1033_v15  ;;  %vm8026_vm2 = vmmov %vm8025_vm12 }
 0x298   : > { %1244 = vmatprep.subr.mxu1 %v1085_v26  ;;  %v1054_v31 = vmul.f32 %v1048_v63, %v4909_v19  ;;  %v1053_v34 = vmul.f32 %v1036_v56, %v4914_v22  ;;  %v1554_v56 = vld [vmem:[%s7822_s7] sm:$0x3]  ;;  %vm8027_vm11 = vmmov %vm8026_vm2 }
 0x299   : > { %1245 = vmatpush2.msra.mxu1 %v1084_v16  ;;  %v5409_v16 = vld.sshfl [vmem:[%s7821_s6] sm:$0x33 pattern:$0x76325410]  ;;  %vm8028_vm9 = vmmov %vm8026_vm2 }
 0x29a   : > { %v1029_v30 = vpop.permute.xlu1 %1028  ;;  %v1027_v55 = vpop.permute.xlu0 %1026  ;;  %1246 = vmatprep.subr.mxu1 %v1083_v54  ;;  %v1568_v63 = vcombine.high %v5409_v16, %v5409_v16  ;;  %v4216_v54 = vld [vmem:[%s4615_s23] sm:$0xff] }
 0x29b   : > { %v1035_v38 = vsel %vm7872_vm8, %v1027_v55, %v1029_v30  ;;  %v1047_v50 = vsel %vm7872_vm8, %v1029_v30, %v1027_v55  ;;  %1247 = vmatpush2.msra.mxu1 %v1082_v27 }
 0x29c   : > { %v1051_v17 = vmul.f32 %v1035_v38, %v4914_v22  ;;  %1248 = vmatprep.subr.mxu1 %v1054_v31  ;;  %v1052_v44 = vmul.f32 %v1047_v50, %v4909_v19  ;;  %3858 = vmatprep.mubr.msk.f32.mxu0 %vm1178_vm0, %v1568_v63 }
 0x29d   : > { %1249 = vmatpush2.msra.mxu1 %v1053_v34 }
 0x29e   : > { %1250 = vmatprep.subr.mxu1 %v1052_v44 }
 0x29f   : > { %1251 = vmatpush2.msra.mxu1 %v1051_v17 }
 0x2a0   : > { %1253 = vmatmul.mubr.f32.vlgmr.msra.gmra.mxu1 %v1154_v5 }
 0x2a1   : > { %3855 = vmatprep.mubr.msk.f32.mxu1 %vm1178_vm0, %v1157_v3 }
 0x2a4   : > { %1259 = vmatmul.mubr.f32.gmra.mxu1 %v1156_v18 }
 0x2a5   : > { %3856 = vmatprep.mubr.msk.f32.mxu1 %vm1178_vm0, %v1159_v39  ;;  %vm8018_vm0 = vcmask 908288  }
 0x2a6   : > { %vm8019_vm7 = vmmov %vm8018_vm0 }
 0x2a7   : > { %v1166_v45 = vpop.permute.xlu0 %1165  ;;  %v1176_v40 = vpop.permute.xlu1 %1175  ;;  %vm8020_vm14 = vmmov %vm8018_vm0 }
 0x2a8   : > { %1265 = vmatmul.mubr.f32.gmra.mxu1 %v1158_v6  ;;  %vm8021_vm5 = vmmov %vm8018_vm0 }
 0x2a9   : > { %vm8022_vm1 = vmmov %vm8018_vm0 }
 0x2aa   : > { %vm8023_vm4 = vmmov %vm8018_vm0 }
 0x2ab   : > { %v1171_v29 = vpop.permute.xlu0 %1170 }
 0x360   : > { %v1254_v53 = vpop.f32.mrf.mxu1 }
 0x361   : > { %v1255_v61 = vadd.f32 %v1254_v53, %v1166_v45 }
 0x362   : > { %v1256_v13 = vpop.f32.mrf.mxu1 }
 0x363   : > { %v5327_v7 = vmax.f32 %v1255_v61, 0.0  ;;  %v1257_v9 = vadd.f32 %v1256_v13, %v1166_v45 }
 0x364   : > { %v1260_v33 = vpop.f32.mrf.mxu1 }
 0x365   : > { %1391 = vrot.lane.b32.xlu0 %v5327_v7, %s4386_s14  ;;  %1421 = vrot.lane.b32.xlu1 %v5327_v7, %s7888_s13  ;;  %v5337_v60 = vmax.f32 %v1257_v9, 0.0  ;;  %v1261_v57 = vadd.f32 %v1260_v33, %v1171_v29 }
 0x366   : > { %v1262_v43 = vpop.f32.mrf.mxu1 }
 0x367   : > { %v5355_v46 = vmax.f32 %v1261_v57, 0.0  ;;  %v1263_v37 = vadd.f32 %v1262_v43, %v1171_v29  ;;  %v1416_v43 = vmul.f32 %v5337_v60, %v4919_v23 }
 0x368   : > { %v1266_v35 = vpop.f32.mrf.mxu1 }
 0x369   : > { %1358 = vrot.lane.b32.xlu0 %v5327_v7, %s4387_s27  ;;  %1520 = vrot.lane.b32.xlu1 %v5327_v7, %s7886_s28  ;;  %v5361_v52 = vmax.f32 %v1263_v37, 0.0  ;;  %v1267_v12 = vadd.f32 %v1266_v35, %v1176_v40  ;;  %v1417_v33 = vmul.f32 %v5355_v46, %v4929_v28  ;;  %v1415_v37 = vmul.f32 %v5327_v7, %v4929_v28 }
 0x36a   : > { %v1268_v14 = vpop.f32.mrf.mxu1 }
 0x36b   : > { %v1275_v15 = vmax.f32 %v1267_v12, 0.0  ;;  %v1269_v10 = vadd.f32 %v1268_v14, %v1176_v40  ;;  %v1418_v9 = vmul.f32 %v5361_v52, %v4919_v23 }
 0x36d   : > { %1325 = vrot.lane.b32.xlu0 %v5327_v7, %s4388_s2  ;;  %1382 = vrot.lane.b32.xlu1 %v5337_v60, %s4386_s14  ;;  %v1276_v26 = vmax.f32 %v1269_v10, 0.0  ;;  %v1419_v13 = vmul.f32 %v1275_v15, %v4929_v28 }
 0x36f   : > { %v1420_v61 = vmul.f32 %v1276_v26, %v4919_v23 }
 0x371   : > { %1292 = vrot.lane.b32.xlu0 %v5327_v7, %s4389_s12  ;;  %1349 = vrot.lane.b32.xlu1 %v5337_v60, %s4387_s27 }
 0x375   : > { %1423 = vrot.lane.b32.xlu0 %v5337_v60, %s7888_s13  ;;  %1316 = vrot.lane.b32.xlu1 %v5337_v60, %s4388_s2 }
 0x379   : > { %1522 = vrot.lane.b32.xlu0 %v5337_v60, %s7886_s28  ;;  %1280 = vrot.lane.b32.xlu1 %v5337_v60, %s4389_s12 }
 0x37d   : > { %1393 = vrot.lane.b32.xlu0 %v5355_v46, %s4386_s14  ;;  %1524 = vrot.lane.b32.xlu1 %v5355_v46, %s7886_s28 }
 0x381   : > { %1360 = vrot.lane.b32.xlu0 %v5355_v46, %s4387_s27  ;;  %1384 = vrot.lane.b32.xlu1 %v5361_v52, %s4386_s14 }
 0x385   : > { %1327 = vrot.lane.b32.xlu0 %v5355_v46, %s4388_s2  ;;  %1351 = vrot.lane.b32.xlu1 %v5361_v52, %s4387_s27 }
 0x389   : > { %1294 = vrot.lane.b32.xlu0 %v5355_v46, %s4389_s12  ;;  %1318 = vrot.lane.b32.xlu1 %v5361_v52, %s4388_s2 }
 0x38d   : > { %1526 = vrot.lane.b32.xlu0 %v5361_v52, %s7886_s28  ;;  %1282 = vrot.lane.b32.xlu1 %v5361_v52, %s4389_s12 }
 0x391   : > { %1395 = vrot.lane.b32.xlu0 %v1275_v15, %s4386_s14  ;;  %1528 = vrot.lane.b32.xlu1 %v1275_v15, %s7886_s28 }
 0x395   : > { %1362 = vrot.lane.b32.xlu0 %v1275_v15, %s4387_s27  ;;  %1386 = vrot.lane.b32.xlu1 %v1276_v26, %s4386_s14 }
 0x399   : > { %1329 = vrot.lane.b32.xlu0 %v1275_v15, %s4388_s2  ;;  %1353 = vrot.lane.b32.xlu1 %v1276_v26, %s4387_s27 }
 0x39d   : > { %1296 = vrot.lane.b32.xlu0 %v1275_v15, %s4389_s12  ;;  %1495 = vrot.lane.b32.xlu1 %v1275_v15, %s8016_s19 }
 0x3a1   : > { %1493 = vrot.lane.b32.xlu0 %v5361_v52, %s8016_s19  ;;  %1320 = vrot.lane.b32.xlu1 %v1276_v26, %s4388_s2 }
 0x3a5   : > { %1489 = vrot.lane.b32.xlu0 %v5337_v60, %s8016_s19  ;;  %1284 = vrot.lane.b32.xlu1 %v1276_v26, %s4389_s12 }
 0x3a9   : > { %1460 = vrot.lane.b32.xlu0 %v5361_v52, %s8017_s18  ;;  %1491 = vrot.lane.b32.xlu1 %v5355_v46, %s8016_s19 }
 0x3ad   : > { %1530 = vrot.lane.b32.xlu0 %v1276_v26, %s7886_s28  ;;  %1487 = vrot.lane.b32.xlu1 %v5327_v7, %s8016_s19 }
 0x3b1   : > { %1497 = vrot.lane.b32.xlu0 %v1276_v26, %s8016_s19  ;;  %1462 = vrot.lane.b32.xlu1 %v1275_v15, %s8017_s18 }
 0x3b5   : > { %1456 = vrot.lane.b32.xlu0 %v5337_v60, %s8017_s18  ;;  %1458 = vrot.lane.b32.xlu1 %v5355_v46, %s8017_s18 }
 0x3b9   : > { %1464 = vrot.lane.b32.xlu0 %v1276_v26, %s8017_s18  ;;  %1454 = vrot.lane.b32.xlu1 %v5327_v7, %s8017_s18 }
 0x3bd   : > { %1431 = vrot.lane.b32.xlu0 %v1276_v26, %s7888_s13  ;;  %1429 = vrot.lane.b32.xlu1 %v1275_v15, %s7888_s13 }
 0x3c1   : > { %1427 = vrot.lane.b32.xlu0 %v5361_v52, %s7888_s13  ;;  %1425 = vrot.lane.b32.xlu1 %v5355_v46, %s7888_s13 }
 0x3c5   : > { %1557 = vperm.xlu1 %4211, %v1554_v56   ;;  %2981 = vrot.lane.b32.xlu0 %v4216_v54, %s8016_s19 }
 0x3c9   : > { %2992 = vrot.lane.b32.xlu0 %v4216_v54, %s7886_s28  ;;  %2983 = vrot.lane.b32.xlu1 %v4636_v4, %s8016_s19 }
 0x3cd   : > { %2959 = vrot.lane.b32.xlu0 %v4216_v54, %s7888_s13  ;;  %2994 = vrot.lane.b32.xlu1 %v4636_v4, %s7886_s28 }
 0x3d7   : > { %v1392_v27 = vpop.permute.xlu0 %1391  ;;  %v1422_v30 = vpop.permute.xlu1 %1421 }
 0x3db   : > { %v5434_v55 = vpop.permute.xlu0 %1358  ;;  %v5436_v31 = vpop.permute.xlu1 %1520 }
 0x3df   : > { %v5438_v34 = vpop.permute.xlu0 %1325  ;;  %v1383_v38 = vpop.permute.xlu1 %1382 }
 0x3e3   : > { %v5440_v50 = vpop.permute.xlu0 %1292  ;;  %v5442_v17 = vpop.permute.xlu1 %1349 }
 0x3e7   : > { %v1424_v44 = vpop.permute.xlu0 %1423  ;;  %v5444_v5 = vpop.permute.xlu1 %1316 }
 0x3e8   : > { %v1445_v3 = vsel %vm7872_vm8, %v1424_v44, %v1422_v30  ;;  %v1433_v18 = vsel %vm7872_vm8, %v1422_v30, %v1424_v44 }
 0x3e9   : > { %v1449_v39 = vmul.f32 %v1445_v3, %v4909_v19  ;;  %v1448_v6 = vmul.f32 %v1433_v18, %v4914_v22 }
 0x3eb   : > { %v5450_v45 = vpop.permute.xlu0 %1522  ;;  %1572 = vmatprep.subr.mxu0 %v1449_v39  ;;  %v5452_v53 = vpop.permute.xlu1 %1280  ;;  %v1397_v39 = vsel %vm7875_vm15, %v1392_v27, %v1383_v38 }
 0x3ec   : > { %1573 = vmatpush1.msra.mxu0 %v1448_v6  ;;  %v1406_v6 = vsel %vm7875_vm15, %v1383_v38, %v1392_v27 }
 0x3ed   : > { %1574 = vmatprep.subr.mxu0 %v1420_v61  ;;  %v1409_v27 = vmul.f32 %v1406_v6, %v4963_v42 }
 0x3ee   : > { %1575 = vmatpush1.msra.mxu0 %v1419_v13 }
 0x3ef   : > { %v1394_v29 = vpop.permute.xlu0 %1393  ;;  %1576 = vmatprep.subr.mxu0 %v1418_v9  ;;  %v5460_v57 = vpop.permute.xlu1 %1524 }
 0x3f0   : > { %1577 = vmatpush1.msra.mxu0 %v1417_v33 }
 0x3f1   : > { %1578 = vmatprep.subr.mxu0 %v1416_v43 }
 0x3f2   : > { %1579 = vmatpush1.msra.mxu0 %v1415_v37  ;;  %v1410_v37 = vmul.f32 %v1397_v39, %v4960_v41 }
 0x3f3   : > { %v1361_v35 = vpop.permute.xlu0 %1360  ;;  %v1385_v40 = vpop.permute.xlu1 %1384 }
 0x3f4   : > { %v1398_v7 = vsel %vm7875_vm15, %v1394_v29, %v1385_v40  ;;  %v1407_v44 = vsel %vm7875_vm15, %v1385_v40, %v1394_v29 }
 0x3f5   : > { %v1412_v9 = vmul.f32 %v1398_v7, %v4960_v41  ;;  %v1411_v43 = vmul.f32 %v1407_v44, %v4963_v42 }
 0x3f7   : > { %v1328_v52 = vpop.permute.xlu0 %1327  ;;  %v1352_v12 = vpop.permute.xlu1 %1351 }
 0x3f8   : > { %v1365_v40 = vsel %vm7868_vm3, %v1361_v35, %v1352_v12  ;;  %v1374_v38 = vsel %vm7868_vm3, %v1352_v12, %v1361_v35 }
 0x3f9   : > { %v1379_v35 = vmul.f32 %v1365_v40, %v4986_v32  ;;  %v1378_v12 = vmul.f32 %v1374_v38, %v4991_v47 }
 0x3fb   : > { %v5466_v14 = vpop.permute.xlu0 %1294  ;;  %v1319_v46 = vpop.permute.xlu1 %1318 }
 0x3fc   : > { %v1332_v39 = vsel %vm7871_vm6, %v1328_v52, %v1319_v46 }
 0x3ff   : > { %v5468_v15 = vpop.permute.xlu0 %1526  ;;  %v5470_v10 = vpop.permute.xlu1 %1282 }
 0x403   : > { %v1396_v26 = vpop.permute.xlu0 %1395  ;;  %v5472_v63 = vpop.permute.xlu1 %1528 }
 0x407   : > { %v1363_v60 = vpop.permute.xlu0 %1362  ;;  %v1387_v56 = vpop.permute.xlu1 %1386 }
 0x408   : > { %v1399_v54 = vsel %vm7875_vm15, %v1396_v26, %v1387_v56  ;;  %v1408_v30 = vsel %vm7875_vm15, %v1387_v56, %v1396_v26 }
 0x409   : > { %v1414_v3 = vmul.f32 %v1399_v54, %v4960_v41  ;;  %v1413_v18 = vmul.f32 %v1408_v30, %v4963_v42  ;;  %v1373_v30 = vsel %vm7868_vm3, %v5442_v17, %v5434_v55 }
 0x40b   : > { %v1330_v61 = vpop.permute.xlu0 %1329  ;;  %v1354_v13 = vpop.permute.xlu1 %1353  ;;  %1580 = vmatprep.subr.mxu0 %v1414_v3 }
 0x40c   : > { %v1366_v33 = vsel %vm7868_vm3, %v1363_v60, %v1354_v13  ;;  %1581 = vmatpush1.msra.mxu0 %v1413_v18  ;;  %v1375_v29 = vsel %vm7868_vm3, %v1354_v13, %v1363_v60  ;;  %v1364_v60 = vsel %vm7868_vm3, %v5434_v55, %v5442_v17  ;;  %v1376_v55 = vmul.f32 %v1373_v30, %v4991_v47 }
 0x40d   : > { %1582 = vmatprep.subr.mxu0 %v1412_v9  ;;  %v1381_v7 = vmul.f32 %v1366_v33, %v4986_v32  ;;  %v1380_v54 = vmul.f32 %v1375_v29, %v4991_v47  ;;  %v1377_v18 = vmul.f32 %v1364_v60, %v4986_v32  ;;  %v1341_v17 = vsel %vm7871_vm6, %v1319_v46, %v1328_v52 }
 0x40e   : > { %1583 = vmatpush1.msra.mxu0 %v1411_v43  ;;  %v1331_v43 = vsel %vm7871_vm6, %v5438_v34, %v5444_v5  ;;  %v1340_v29 = vsel %vm7871_vm6, %v5444_v5, %v5438_v34  ;;  %v1346_v52 = vmul.f32 %v1332_v39, %v5010_v36  ;;  %v1345_v40 = vmul.f32 %v1341_v17, %v5013_v59 }
 0x40f   : > { %v1297_v26 = vpop.permute.xlu0 %1296  ;;  %v5490_v56 = vpop.permute.xlu1 %1495  ;;  %1584 = vmatprep.subr.mxu0 %v1410_v37  ;;  %v1344_v38 = vmul.f32 %v1331_v43, %v5010_v36  ;;  %v1299_v34 = vsel %vm7867_vm10, %v5466_v14, %v5470_v10  ;;  %v1343_v5 = vmul.f32 %v1340_v29, %v5013_v59  ;;  %v1298_v30 = vsel %vm7867_vm10, %v5440_v50, %v5452_v53 }
 0x410   : > { %1585 = vmatpush1.msra.mxu0 %v1409_v27  ;;  %v1311_v39 = vmul.f32 %v1298_v30, %v5024_v8 }
 0x411   : > { %1586 = vmatprep.subr.mxu0 %v1381_v7  ;;  %v1308_v7 = vsel %vm7867_vm10, %v5470_v10, %v5466_v14  ;;  %v1313_v14 = vmul.f32 %v1299_v34, %v5024_v8 }
 0x412   : > { %1587 = vmatpush1.msra.mxu0 %v1380_v54  ;;  %v1312_v10 = vmul.f32 %v1308_v7, %v5027_v51 }
 0x413   : > { %v5502_v44 = vpop.permute.xlu0 %1493  ;;  %v1321_v3 = vpop.permute.xlu1 %1320  ;;  %1588 = vmatprep.subr.mxu0 %v1379_v35 }
 0x414   : > { %v1333_v6 = vsel %vm7871_vm6, %v1330_v61, %v1321_v3  ;;  %v1342_v13 = vsel %vm7871_vm6, %v1321_v3, %v1330_v61  ;;  %1589 = vmatpush1.msra.mxu0 %v1378_v12  ;;  %v1307_v12 = vsel %vm7867_vm10, %v5452_v53, %v5440_v50 }
 0x415   : > { %1590 = vmatprep.subr.mxu0 %v1377_v18  ;;  %v1348_v9 = vmul.f32 %v1333_v6, %v5010_v36  ;;  %v1347_v33 = vmul.f32 %v1342_v13, %v5013_v59  ;;  %v1545_v6 = vsel %vm8018_vm0, %v5468_v15, %v5460_v57  ;;  %v1310_v53 = vmul.f32 %v1307_v12, %v5027_v51  ;;  %vm8029_vm0 = vmmov %vm8026_vm2 }
 0x416   : > { %1591 = vmatpush1.msra.mxu0 %v1376_v55  ;;  %v1533_v55 = vsel %vm8021_vm5, %v5460_v57, %v5468_v15 }
 0x417   : > { %v5518_v61 = vpop.permute.xlu0 %1489  ;;  %v1285_v37 = vpop.permute.xlu1 %1284  ;;  %1592 = vmatprep.subr.mxu0 %v1348_v9  ;;  %v1549_v15 = vmul.f32 %v1533_v55, %v4811_v49 }
 0x418   : > { %v1300_v46 = vsel %vm7867_vm10, %v1297_v26, %v1285_v37  ;;  %1593 = vmatpush1.msra.mxu0 %v1347_v33  ;;  %v1309_v27 = vsel %vm7867_vm10, %v1285_v37, %v1297_v26  ;;  %v1544_v33 = vsel %vm8022_vm1, %v5450_v45, %v5436_v31  ;;  %v1550_v37 = vmul.f32 %v1545_v6, %v4806_v48 }
 0x419   : > { %1594 = vmatprep.subr.mxu0 %v1346_v52  ;;  %v1315_v26 = vmul.f32 %v1300_v46, %v5024_v8  ;;  %v1314_v35 = vmul.f32 %v1309_v27, %v5027_v51  ;;  %v1548_v46 = vmul.f32 %v1544_v33, %v4806_v48 }
 0x41a   : > { %1595 = vmatpush1.msra.mxu0 %v1345_v40 }
 0x41b   : > { %v5532_v60 = vpop.permute.xlu0 %1460  ;;  %v1492_v54 = vpop.permute.xlu1 %1491  ;;  %1596 = vmatprep.subr.mxu0 %v1344_v38 }
 0x41c   : > { %1597 = vmatpush1.msra.mxu0 %v1343_v5  ;;  %v1500_v40 = vsel %vm8027_vm11, %v1492_v54, %v5502_v44 }
 0x41d   : > { %1598 = vmatprep.subr.mxu0 %v1315_v26 }
 0x41e   : > { %1599 = vmatpush1.msra.mxu0 %v1314_v35 }
 0x41f   : > { %v1531_v3 = vpop.permute.xlu0 %1530  ;;  %v1488_v18 = vpop.permute.xlu1 %1487  ;;  %1600 = vmatprep.subr.mxu0 %v1313_v14 }
 0x420   : > { %v1534_v13 = vsel %vm8019_vm7, %v5472_v63, %v1531_v3  ;;  %v1546_v50 = vsel %vm8020_vm14, %v1531_v3, %v5472_v63  ;;  %1601 = vmatpush1.msra.mxu0 %v1312_v10  ;;  %v1532_v63 = vsel %vm8023_vm4, %v5436_v31, %v5450_v45  ;;  %v1512_v31 = vsel %vm8026_vm2, %v5502_v44, %v1492_v54 }
 0x421   : > { %1602 = vmatprep.subr.mxu0 %v1311_v39  ;;  %v1552_v17 = vmul.f32 %v1546_v50, %v4806_v48  ;;  %v1551_v9 = vmul.f32 %v1534_v13, %v4811_v49  ;;  %v1547_v45 = vmul.f32 %v1532_v63, %v4811_v49  ;;  %v1499_v7 = vsel %vm8029_vm0, %v1488_v18, %v5518_v61 }
 0x422   : > { %1603 = vmatpush1.msra.mxu0 %v1310_v53  ;;  %v1517_v26 = vmul.f32 %v1512_v31, %v4837_v58  ;;  %v1516_v44 = vmul.f32 %v1500_v40, %v4849_v62  ;;  %vm8030_vm7 = vcmask 924672  }
 0x423   : > { %v1498_v43 = vpop.permute.xlu0 %1497  ;;  %v1463_v29 = vpop.permute.xlu1 %1462  ;;  %1614 = vmatprep.subr.mxu0 %v1552_v17  ;;  %vm8031_vm14 = vmmov %vm8030_vm7 }
 0x424   : > { %v1513_v57 = vsel %vm8024_vm13, %v1498_v43, %v5490_v56  ;;  %1615 = vmatpush2.msra.mxu0 %v1551_v9  ;;  %v1501_v52 = vsel %vm8025_vm12, %v5490_v56, %v1498_v43  ;;  %v1511_v56 = vsel %vm8028_vm9, %v5518_v61, %v1488_v18  ;;  %vm8032_vm5 = vmmov %vm8030_vm7  ;;  %v1514_v61 = vmul.f32 %v1499_v7, %v4849_v62 }
 0x425   : > { %1616 = vmatprep.subr.mxu0 %v1550_v37  ;;  %v1519_v34 = vmul.f32 %v1513_v57, %v4837_v58  ;;  %v1518_v5 = vmul.f32 %v1501_v52, %v4849_v62  ;;  %v1515_v35 = vmul.f32 %v1511_v56, %v4837_v58  ;;  %vm8033_vm1 = vmmov %vm8032_vm5 }
 0x426   : > { %1617 = vmatpush2.msra.mxu0 %v1549_v15  ;;  %vm8034_vm4 = vmmov %vm8033_vm1 }
 0x427   : > { %v1457_v27 = vpop.permute.xlu0 %1456  ;;  %v1459_v38 = vpop.permute.xlu1 %1458  ;;  %1618 = vmatprep.subr.mxu0 %v1548_v46  ;;  %vm8035_vm13 = vmmov %vm8033_vm1 }
 0x428   : > { %1619 = vmatpush2.msra.mxu0 %v1547_v45  ;;  %v1479_v12 = vsel %vm8030_vm7, %v5532_v60, %v1459_v38  ;;  %v1467_v3 = vsel %vm8033_vm1, %v1459_v38, %v5532_v60  ;;  %v5610_v45 = vld [vmem:[%s4623_s22] sm:$0xff] }
 0x429   : > { %1620 = vmatprep.subr.mxu0 %v1519_v34  ;;  %v1484_v55 = vmul.f32 %v1479_v12, %v4862_v1  ;;  %v1483_v60 = vmul.f32 %v1467_v3, %v4867_v2  ;;  %v5614_v40 = vcombine.high %v5610_v45, %v5610_v45 }
 0x42a   : > { %1621 = vmatpush2.msra.mxu0 %v1518_v5 }
 0x42b   : > { %v1465_v54 = vpop.permute.xlu0 %1464  ;;  %v1455_v30 = vpop.permute.xlu1 %1454  ;;  %1622 = vmatprep.subr.mxu0 %v1517_v26  ;;  %2128 = vmatprep.mubr.f32.mxu1 %v5614_v40 }
 0x42c   : > { %v1468_v14 = vsel %vm8031_vm14, %v1463_v29, %v1465_v54  ;;  %v1480_v10 = vsel %vm8032_vm5, %v1465_v54, %v1463_v29  ;;  %1623 = vmatpush2.msra.mxu0 %v1516_v44  ;;  %v1478_v6 = vsel %vm8034_vm4, %v1457_v27, %v1455_v30  ;;  %v1466_v13 = vsel %vm8035_vm13, %v1455_v30, %v1457_v27 }
 0x42d   : > { %1624 = vmatprep.subr.mxu0 %v1515_v35  ;;  %v1486_v18 = vmul.f32 %v1480_v10, %v4862_v1  ;;  %v1485_v39 = vmul.f32 %v1468_v14, %v4867_v2  ;;  %v1482_v33 = vmul.f32 %v1478_v6, %v4862_v1  ;;  %v1481_v63 = vmul.f32 %v1466_v13, %v4867_v2 }
 0x42e   : > { %1625 = vmatpush2.msra.mxu0 %v1514_v61  ;;  %v5623_v35 = vshrl.u32 %v538_v11, 7 }
 0x42f   : > { %v1432_v50 = vpop.permute.xlu0 %1431  ;;  %v1430_v53 = vpop.permute.xlu1 %1429  ;;  %1626 = vmatprep.subr.mxu0 %v1486_v18 }
 0x430   : > { %v1447_v17 = vsel %vm7872_vm8, %v1432_v50, %v1430_v53  ;;  %1627 = vmatpush2.msra.mxu0 %v1485_v39  ;;  %v1435_v9 = vsel %vm7872_vm8, %v1430_v53, %v1432_v50  ;;  %v1691_v6 = vadd.s32 120, %v5623_v35  ;;  %v1695_v47 = vadd.s32 152, %v5623_v35 }
 0x431   : > { %1628 = vmatprep.subr.mxu0 %v1484_v55  ;;  %v1453_v37 = vmul.f32 %v1447_v17, %v4909_v19  ;;  %v1452_v52 = vmul.f32 %v1435_v9, %v4914_v22 }
 0x432   : > { %1629 = vmatpush2.msra.mxu0 %v1483_v60 }
 0x433   : > { %v1428_v43 = vpop.permute.xlu0 %1427  ;;  %v1426_v29 = vpop.permute.xlu1 %1425  ;;  %1630 = vmatprep.subr.mxu0 %v1482_v33 }
 0x434   : > { %v1434_v57 = vsel %vm7872_vm8, %v1426_v29, %v1428_v43  ;;  %v1446_v15 = vsel %vm7872_vm8, %v1428_v43, %v1426_v29  ;;  %1631 = vmatpush2.msra.mxu0 %v1481_v63  ;;  %v1689_v43 = vadd.s32 104, %v5623_v35 }
 0x435   : > { %1632 = vmatprep.subr.mxu0 %v1453_v37  ;;  %v1451_v46 = vmul.f32 %v1446_v15, %v4909_v19  ;;  %v1450_v31 = vmul.f32 %v1434_v57, %v4914_v22 }
 0x436   : > { %1633 = vmatpush2.msra.mxu0 %v1452_v52 }
 0x437   : > { %1634 = vmatprep.subr.mxu0 %v1451_v46 }
 0x438   : > { %1635 = vmatpush2.msra.mxu0 %v1450_v31 }
 0x439   : > { %1637 = vmatmul.mubr.f32.vlgmr.msra.gmra.mxu0 %v5409_v16 }
 0x43a   : > { %2199 = vmatprep.mubr.f32.mxu0 %v5614_v40 }
 0x440   : > { %v1558_v27 = vpop.permute.xlu1 %1557 }
 0x4f9   : > { %v1638_v38 = vpop.f32.mrf.mxu0 }
 0x4fa   : > { %v1639_v34 = vadd.f32 %v1638_v38, %v1558_v27 }
 0x4fb   : > { %v1640_v56 = vpop.f32.mrf.mxu0 }
 0x4fc   : > { %v1643_v5 = vadd.f32 %v1639_v34, %v4693_v24  ;;  %v1649_v7 = vadd.f32 %v1639_v34, %v4687_v20  ;;  %v1641_v26 = vadd.f32 %v1640_v56, %v1558_v27  ;;  %v5626_v20 = vsub.s32 1, %v5623_v35 }
 0x4fe   : > { %v1645_v16 = vmax.f32 %v1643_v5, 0.0  ;;  %v1651_v44 = vmax.f32 %v1649_v7, 0.0  ;;  %v1644_v54 = vadd.f32 %v1641_v26, %v4695_v25  ;;  %v1650_v30 = vadd.f32 %v1641_v26, %v4689_v21 }
 0x4ff   : > { %v1690_v25 = vadd.s32 112, %v5623_v35  ;;  %v5631_v26 = vcvt.s32.f32 %v1691_v6 }
 0x500   : > { %v1647_v12 = vmin.f32 %v1645_v16, 15.0  ;;  %v1653_v14 = vmin.f32 %v1651_v44, 15.0  ;;  %v1646_v10 = vmax.f32 %v1644_v54, 0.0  ;;  %v1652_v61 = vmax.f32 %v1650_v30, 0.0 }
 0x501   : > { %v5633_v16 = vcvt.s32.f32 %v1690_v25 }
 0x502   : > { %v1655_v3 = vfloor.f32 %v1647_v12  ;;  %v1657_v18 = vfloor.f32 %v1653_v14  ;;  %v1648_v39 = vmin.f32 %v1646_v10, 15.0  ;;  %v1654_v24 = vmin.f32 %v1652_v61, 15.0 }
 0x504   : > { %v1659_v13 = vsub.f32 %v1647_v12, %v1655_v3  ;;  %v1663_v21 = vsub.f32 %v1653_v14, %v1657_v18  ;;  %v1667_v50 = vadd.f32 1.0, %v1655_v3  ;;  %v1671_v11 = vadd.f32 1.0, %v1657_v18 }
 0x505   : > { %v1748_v53 = vmul.f32 16.0, %v1657_v18  ;;  %v1752_v55 = vrot.slane %v1655_v3, 7  ;;  %v1656_v17 = vfloor.f32 %v1648_v39  ;;  %v1658_v60 = vfloor.f32 %v1654_v24 }
 0x506   : > { %v1661_v9 = vsub.f32 1.0, %v1659_v13  ;;  %v1669_v33 = vmin.f32 %v1667_v50, 15.0  ;;  %v1673_v63 = vmin.f32 %v1671_v11, 15.0  ;;  %v1665_v29 = vsub.f32 1.0, %v1663_v21 }
 0x507   : > { %v1756_v37 = vadd.f32 %v1752_v55, %v1748_v53  ;;  %v1904_v57 = vrot.slane %v1659_v13, 7  ;;  %v1660_v15 = vsub.f32 %v1648_v39, %v1656_v17  ;;  %v1664_v27 = vsub.f32 %v1654_v24, %v1658_v60 }
 0x508   : > { %v1742_v52 = vrot.slane %v1661_v9, 7  ;;  %v1912_v46 = vrot.slane %v1669_v33, 7  ;;  %v2208_v31 = vmul.f32 16.0, %v1673_v63  ;;  %v1668_v56 = vadd.f32 1.0, %v1656_v17 }
 0x509   : > { %v2429_v38 = vmul.f32 %v1904_v57, %v1663_v21  ;;  %v1662_v34 = vsub.f32 1.0, %v1660_v15  ;;  %v5636_v44 = vrot.slane %v1756_v37, %v5626_v20  ;;  %v5641_v12 = vcvt.s32.f32 %v1689_v43 }
 0x50a   : > { %v2206_v5 = vmul.f32 %v1742_v52, %v1663_v21  ;;  %v2210_v7 = vadd.f32 %v2208_v31, %v1752_v55  ;;  %v2431_v54 = vadd.f32 %v2208_v31, %v1912_v46  ;;  %v1908_v14 = vmul.f32 %v1904_v57, %v1665_v29 }
 0x50b   : > { %v5639_v30 = vrot.slane %v2429_v38, %v5626_v20  ;;  %v1666_v3 = vsub.f32 1.0, %v1664_v27  ;;  %v1670_v39 = vmin.f32 %v1668_v56, 15.0  ;;  %v1672_v24 = vadd.f32 1.0, %v1658_v60 }
 0x50c   : > { %v5644_v10 = vrot.slane %v2210_v7, %v5626_v20  ;;  %v5647_v61 = vrot.slane %v2206_v5, %v5626_v20  ;;  %v5650_v18 = vrot.slane %v2431_v54, %v5626_v20  ;;  %v1743_v6 = vrot.slane %v1662_v34, 7 }
 0x50d   : > { %v1916_v25 = vadd.f32 %v1912_v46, %v1748_v53  ;;  %v1749_v13 = vmul.f32 16.0, %v1658_v60  ;;  %v1753_v21 = vrot.slane %v1656_v17, 7  ;;  %v1905_v50 = vrot.slane %v1660_v15, 7 }
 0x50e   : > { %v1674_v11 = vmin.f32 %v1672_v24, 15.0  ;;  %v1747_v55 = vmul.f32 %v1743_v6, %v1666_v3  ;;  %v1913_v9 = vrot.slane %v1670_v39, 7  ;;  %v2207_v33 = vmul.f32 %v1743_v6, %v1664_v27 }
 0x50f   : > { %v1746_v63 = vmul.f32 %v1742_v52, %v1665_v29  ;;  %v1757_v43 = vadd.f32 %v1753_v21, %v1749_v13  ;;  %v1909_v37 = vmul.f32 %v1905_v50, %v1666_v3  ;;  %v2430_v57 = vmul.f32 %v1905_v50, %v1664_v27 }
 0x510   : > { %v5653_v31 = vrot.slane %v1747_v55, %v5626_v20  ;;  %v1917_v38 = vadd.f32 %v1913_v9, %v1749_v13  ;;  %v2209_v5 = vmul.f32 16.0, %v1674_v11  ;;  %v5656_v56 = vrot.slane %v2207_v33, %v5626_v20 }
 0x511   : > { %v5659_v53 = vrot.slane %v1916_v25, %v5626_v20  ;;  %v5662_v17 = vrot.slane %v1757_v43, %v5626_v20  ;;  %v5665_v60 = vrot.slane %v2430_v57, %v5626_v20  ;;  %v1688_v29 = vadd.s32 96, %v5623_v35 }
 0x512   : > { %v5669_v15 = vrot.slane %v1917_v38, %v5626_v20  ;;  %v2211_v52 = vadd.f32 %v2209_v5, %v1753_v21  ;;  %v2432_v46 = vadd.f32 %v2209_v5, %v1913_v9  ;;  %v1687_v27 = vadd.s32 88, %v5623_v35 }
 0x513   : > { %v5673_v34 = vrot.slane %v1746_v63, %v5626_v20  ;;  %v5676_v7 = vrot.slane %v1908_v14, %v5626_v20  ;;  %v5679_v54 = vrot.slane %v1909_v37, %v5626_v20  ;;  %vm1797_vm12 = vcmp.eq.f32.partialorder %v5631_v26, %v5662_v17 }
 0x514   : > { %v5684_v3 = vrot.slane %v2211_v52, %v5626_v20  ;;  %v5687_v39 = vrot.slane %v2432_v46, %v5626_v20  ;;  %3923 = vmatprep.subr.msk.mxu0 %vm1797_vm12, %v5653_v31  ;;  %vm1957_vm2 = vcmp.eq.f32.partialorder %v5631_v26, %v5669_v15  ;;  %vm1796_vm11 = vcmp.eq.f32.partialorder %v5631_v26, %v5636_v44 }
 0x515   : > { %3859 = vmatprep.subr.msk.mxu1 %vm1957_vm2, %v5679_v54  ;;  %3924 = vmatpush1.msk.msra.mxu0 %vm1796_vm11, %v5673_v34  ;;  %vm1956_vm9 = vcmp.eq.f32.partialorder %v5631_v26, %v5659_v53  ;;  %vm1795_vm0 = vcmp.eq.f32.partialorder %v5633_v16, %v5662_v17  ;;  %vm1955_vm7 = vcmp.eq.f32.partialorder %v5633_v16, %v5669_v15  ;;  %v5706_v20 = vcvt.s32.f32 %v1688_v29 }
 0x516   : > { %3860 = vmatpush1.msk.msra.mxu1 %vm1956_vm9, %v5676_v7  ;;  %3925 = vmatprep.subr.msk.mxu0 %vm1795_vm0, %v5653_v31  ;;  %vm1794_vm14 = vcmp.eq.f32.partialorder %v5633_v16, %v5636_v44  ;;  %v1686_v14 = vadd.s32 80, %v5623_v35  ;;  %vm1954_vm5 = vcmp.eq.f32.partialorder %v5633_v16, %v5659_v53  ;;  %vm1793_vm1 = vcmp.eq.f32.partialorder %v5641_v12, %v5662_v17 }
 0x517   : > { %3861 = vmatprep.subr.msk.mxu1 %vm1955_vm7, %v5679_v54  ;;  %3926 = vmatpush1.msk.msra.mxu0 %vm1794_vm14, %v5673_v34  ;;  %vm1953_vm4 = vcmp.eq.f32.partialorder %v5641_v12, %v5669_v15  ;;  %vm1792_vm13 = vcmp.eq.f32.partialorder %v5641_v12, %v5636_v44  ;;  %v5721_v24 = vcvt.s32.f32 %v1687_v27  ;;  %v1685_v6 = vadd.s32 72, %v5623_v35 }
 0x518   : > { %3862 = vmatpush1.msk.msra.mxu1 %vm1954_vm5, %v5676_v7  ;;  %3927 = vmatprep.subr.msk.mxu0 %vm1793_vm1, %v5653_v31  ;;  %vm1952_vm12 = vcmp.eq.f32.partialorder %v5641_v12, %v5659_v53  ;;  %vm1791_vm2 = vcmp.eq.f32.partialorder %v5706_v20, %v5662_v17  ;;  %vm1951_vm11 = vcmp.eq.f32.partialorder %v5706_v20, %v5669_v15  ;;  %v5736_v25 = vcvt.s32.f32 %v1686_v14 }
 0x519   : > { %3863 = vmatprep.subr.msk.mxu1 %vm1953_vm4, %v5679_v54  ;;  %3928 = vmatpush1.msk.msra.mxu0 %vm1792_vm13, %v5673_v34  ;;  %vm1790_vm9 = vcmp.eq.f32.partialorder %v5706_v20, %v5636_v44  ;;  %v1684_v13 = vadd.s32 64, %v5623_v35  ;;  %vm1950_vm0 = vcmp.eq.f32.partialorder %v5706_v20, %v5659_v53  ;;  %vm1789_vm7 = vcmp.eq.f32.partialorder %v5721_v24, %v5662_v17 }
 0x51a   : > { %3864 = vmatpush1.msk.msra.mxu1 %vm1952_vm12, %v5676_v7  ;;  %3929 = vmatprep.subr.msk.mxu0 %vm1791_vm2, %v5653_v31  ;;  %vm1949_vm14 = vcmp.eq.f32.partialorder %v5721_v24, %v5669_v15  ;;  %vm1788_vm5 = vcmp.eq.f32.partialorder %v5721_v24, %v5636_v44  ;;  %v5751_v21 = vcvt.s32.f32 %v1685_v6  ;;  %v1683_v50 = vadd.s32 56, %v5623_v35 }
 0x51b   : > { %3865 = vmatprep.subr.msk.mxu1 %vm1951_vm11, %v5679_v54  ;;  %3930 = vmatpush1.msk.msra.mxu0 %vm1790_vm9, %v5673_v34  ;;  %vm1948_vm1 = vcmp.eq.f32.partialorder %v5721_v24, %v5659_v53  ;;  %vm1787_vm4 = vcmp.eq.f32.partialorder %v5736_v25, %v5662_v17  ;;  %vm1947_vm13 = vcmp.eq.f32.partialorder %v5736_v25, %v5669_v15  ;;  %v5766_v11 = vcvt.s32.f32 %v1684_v13 }
 0x51c   : > { %3866 = vmatpush1.msk.msra.mxu1 %vm1950_vm0, %v5676_v7  ;;  %3931 = vmatprep.subr.msk.mxu0 %vm1789_vm7, %v5653_v31  ;;  %vm1786_vm12 = vcmp.eq.f32.partialorder %v5736_v25, %v5636_v44  ;;  %v1682_v55 = vadd.s32 48, %v5623_v35  ;;  %vm1946_vm2 = vcmp.eq.f32.partialorder %v5736_v25, %v5659_v53  ;;  %vm1785_vm11 = vcmp.eq.f32.partialorder %v5751_v21, %v5662_v17 }
 0x51d   : > { %3867 = vmatprep.subr.msk.mxu1 %vm1949_vm14, %v5679_v54  ;;  %3932 = vmatpush1.msk.msra.mxu0 %vm1788_vm5, %v5673_v34  ;;  %vm1945_vm9 = vcmp.eq.f32.partialorder %v5751_v21, %v5669_v15  ;;  %vm1784_vm0 = vcmp.eq.f32.partialorder %v5751_v21, %v5636_v44  ;;  %v5781_v9 = vcvt.s32.f32 %v1683_v50  ;;  %v1681_v33 = vadd.s32 40, %v5623_v35 }
 0x51e   : > { %3868 = vmatpush1.msk.msra.mxu1 %vm1948_vm1, %v5676_v7  ;;  %3933 = vmatprep.subr.msk.mxu0 %vm1787_vm4, %v5653_v31  ;;  %vm1944_vm7 = vcmp.eq.f32.partialorder %v5751_v21, %v5659_v53  ;;  %vm1783_vm14 = vcmp.eq.f32.partialorder %v5766_v11, %v5662_v17  ;;  %vm1943_vm5 = vcmp.eq.f32.partialorder %v5766_v11, %v5669_v15  ;;  %v5796_v63 = vcvt.s32.f32 %v1682_v55 }
 0x51f   : > { %3869 = vmatprep.subr.msk.mxu1 %vm1947_vm13, %v5679_v54  ;;  %3934 = vmatpush1.msk.msra.mxu0 %vm1786_vm12, %v5673_v34  ;;  %vm1782_vm1 = vcmp.eq.f32.partialorder %v5766_v11, %v5636_v44  ;;  %v1680_v43 = vadd.s32 32, %v5623_v35  ;;  %vm1942_vm4 = vcmp.eq.f32.partialorder %v5766_v11, %v5659_v53  ;;  %vm1781_vm13 = vcmp.eq.f32.partialorder %v5781_v9, %v5662_v17 }
 0x520   : > { %3870 = vmatpush1.msk.msra.mxu1 %vm1946_vm2, %v5676_v7  ;;  %3935 = vmatprep.subr.msk.mxu0 %vm1785_vm11, %v5653_v31  ;;  %v1679_v37 = vadd.s32 24, %v5623_v35  ;;  %vm1941_vm12 = vcmp.eq.f32.partialorder %v5781_v9, %v5669_v15  ;;  %vm1780_vm2 = vcmp.eq.f32.partialorder %v5781_v9, %v5636_v44  ;;  %v5812_v57 = vcvt.s32.f32 %v1681_v33 }
 0x521   : > { %3871 = vmatprep.subr.msk.mxu1 %vm1945_vm9, %v5679_v54  ;;  %3936 = vmatpush1.msk.msra.mxu0 %vm1784_vm0, %v5673_v34  ;;  %v1678_v38 = vadd.s32 16, %v5623_v35  ;;  %vm1940_vm11 = vcmp.eq.f32.partialorder %v5781_v9, %v5659_v53  ;;  %vm1779_vm9 = vcmp.eq.f32.partialorder %v5796_v63, %v5662_v17  ;;  %v1677_v5 = vadd.s32 8, %v5623_v35 }
 0x522   : > { %3872 = vmatpush1.msk.msra.mxu1 %vm1944_vm7, %v5676_v7  ;;  %3937 = vmatprep.subr.msk.mxu0 %vm1783_vm14, %v5653_v31  ;;  %vm1939_vm0 = vcmp.eq.f32.partialorder %v5796_v63, %v5669_v15  ;;  %vm1778_vm7 = vcmp.eq.f32.partialorder %v5796_v63, %v5636_v44  ;;  %v5828_v29 = vcvt.s32.f32 %v1680_v43  ;;  %v1707_v52 = vadd.s32 248, %v5623_v35 }
 0x523   : > { %3873 = vmatprep.subr.msk.mxu1 %vm1943_vm5, %v5679_v54  ;;  %3938 = vmatpush1.msk.msra.mxu0 %vm1782_vm1, %v5673_v34  ;;  %vm1938_vm14 = vcmp.eq.f32.partialorder %v5796_v63, %v5659_v53  ;;  %vm1777_vm5 = vcmp.eq.f32.partialorder %v5812_v57, %v5662_v17  ;;  %v5837_v46 = vcvt.s32.f32 %v1679_v37  ;;  %v1706_v27 = vadd.s32 240, %v5623_v35 }
 0x524   : > { %3874 = vmatpush1.msk.msra.mxu1 %vm1942_vm4, %v5676_v7  ;;  %3939 = vmatprep.subr.msk.mxu0 %vm1781_vm13, %v5653_v31  ;;  %vm1937_vm1 = vcmp.eq.f32.partialorder %v5812_v57, %v5669_v15  ;;  %vm1776_vm4 = vcmp.eq.f32.partialorder %v5812_v57, %v5636_v44  ;;  %v5846_v14 = vcvt.s32.f32 %v1678_v38  ;;  %v1705_v6 = vadd.s32 232, %v5623_v35 }
 0x525   : > { %3875 = vmatprep.subr.msk.mxu1 %vm1941_vm12, %v5679_v54  ;;  %3940 = vmatpush1.msk.msra.mxu0 %vm1780_vm2, %v5673_v34  ;;  %vm1936_vm13 = vcmp.eq.f32.partialorder %v5812_v57, %v5659_v53  ;;  %vm1775_vm12 = vcmp.eq.f32.partialorder %v5828_v29, %v5662_v17  ;;  %v5855_v13 = vcvt.s32.f32 %v1677_v5  ;;  %v5858_v50 = vcvt.s32.f32 %v5623_v35 }
 0x526   : > { %3876 = vmatpush1.msk.msra.mxu1 %vm1940_vm11, %v5676_v7  ;;  %3941 = vmatprep.subr.msk.mxu0 %vm1779_vm9, %v5653_v31  ;;  %vm1935_vm2 = vcmp.eq.f32.partialorder %v5828_v29, %v5669_v15  ;;  %vm1774_vm11 = vcmp.eq.f32.partialorder %v5828_v29, %v5636_v44  ;;  %v5866_v55 = vcvt.s32.f32 %v1707_v52  ;;  %v1704_v33 = vadd.s32 224, %v5623_v35 }
 0x527   : > { %3877 = vmatprep.subr.msk.mxu1 %vm1939_vm0, %v5679_v54  ;;  %3942 = vmatpush1.msk.msra.mxu0 %vm1778_vm7, %v5673_v34  ;;  %vm1934_vm9 = vcmp.eq.f32.partialorder %v5828_v29, %v5659_v53  ;;  %vm1773_vm0 = vcmp.eq.f32.partialorder %v5837_v46, %v5662_v17  ;;  %v5875_v43 = vcvt.s32.f32 %v1706_v27  ;;  %v1703_v37 = vadd.s32 216, %v5623_v35 }
 0x528   : > { %3878 = vmatpush1.msk.msra.mxu1 %vm1938_vm14, %v5676_v7  ;;  %3943 = vmatprep.subr.msk.mxu0 %vm1777_vm5, %v5653_v31  ;;  %vm1933_vm7 = vcmp.eq.f32.partialorder %v5837_v46, %v5669_v15  ;;  %vm1772_vm14 = vcmp.eq.f32.partialorder %v5837_v46, %v5636_v44  ;;  %vm1932_vm5 = vcmp.eq.f32.partialorder %v5837_v46, %v5659_v53  ;;  %v5886_v38 = vcvt.s32.f32 %v1705_v6 }
 0x529   : > { %3879 = vmatprep.subr.msk.mxu1 %vm1937_vm1, %v5679_v54  ;;  %3944 = vmatpush1.msk.msra.mxu0 %vm1776_vm4, %v5673_v34  ;;  %vm1771_vm1 = vcmp.eq.f32.partialorder %v5846_v14, %v5662_v17  ;;  %vm1931_vm4 = vcmp.eq.f32.partialorder %v5846_v14, %v5669_v15  ;;  %v1702_v5 = vadd.s32 208, %v5623_v35  ;;  %v5905_v52 = vcvt.s32.f32 %v1704_v33 }
 0x52a   : > { %3880 = vmatpush1.msk.msra.mxu1 %vm1936_vm13, %v5676_v7  ;;  %3945 = vmatprep.subr.msk.mxu0 %vm1775_vm12, %v5653_v31  ;;  %vm1770_vm13 = vcmp.eq.f32.partialorder %v5846_v14, %v5636_v44  ;;  %vm1930_vm12 = vcmp.eq.f32.partialorder %v5846_v14, %v5659_v53  ;;  %v5915_v27 = vcvt.s32.f32 %v1703_v37  ;;  %v1701_v6 = vadd.s32 200, %v5623_v35 }
 0x52b   : > { %3881 = vmatprep.subr.msk.mxu1 %vm1935_vm2, %v5679_v54  ;;  %3946 = vmatpush1.msk.msra.mxu0 %vm1774_vm11, %v5673_v34  ;;  %vm1769_vm2 = vcmp.eq.f32.partialorder %v5855_v13, %v5662_v17  ;;  %vm1929_vm11 = vcmp.eq.f32.partialorder %v5855_v13, %v5669_v15  ;;  %v5934_v33 = vcvt.s32.f32 %v1702_v5  ;;  %v1700_v37 = vadd.s32 192, %v5623_v35 }
 0x52c   : > { %3882 = vmatpush1.msk.msra.mxu1 %vm1934_vm9, %v5676_v7  ;;  %3947 = vmatprep.subr.msk.mxu0 %vm1773_vm0, %v5653_v31  ;;  %vm1768_vm9 = vcmp.eq.f32.partialorder %v5855_v13, %v5636_v44  ;;  %vm1928_vm0 = vcmp.eq.f32.partialorder %v5855_v13, %v5659_v53  ;;  %vm1825_vm10 = vcmp.eq.f32.partialorder %v5886_v38, %v5662_v17  ;;  %v1699_v5 = vadd.s32 184, %v5623_v35 }
 0x52d   : > { %3883 = vmatprep.subr.msk.mxu1 %vm1933_vm7, %v5679_v54  ;;  %3948 = vmatpush1.msk.msra.mxu0 %vm1772_vm14, %v5673_v34  ;;  %vm1767_vm7 = vcmp.eq.f32.partialorder %v5858_v50, %v5662_v17  ;;  %vm1927_vm14 = vcmp.eq.f32.partialorder %v5858_v50, %v5669_v15  ;;  %vm1984_vm3 = vcmp.eq.f32.partialorder %v5886_v38, %v5659_v53  ;;  %v5974_v0 = vcvt.s32.f32 %v1701_v6 }
 0x52e   : > { %3884 = vmatpush1.msk.msra.mxu1 %vm1932_vm5, %v5676_v7  ;;  %3949 = vmatprep.subr.msk.mxu0 %vm1771_vm1, %v5653_v31  ;;  %vm1766_vm5 = vcmp.eq.f32.partialorder %v5858_v50, %v5636_v44  ;;  %vm1926_vm1 = vcmp.eq.f32.partialorder %v5858_v50, %v5659_v53  ;;  %vm1822_vm6 = vcmp.eq.f32.partialorder %v5905_v52, %v5636_v44  ;;  %v1698_v6 = vadd.s32 176, %v5623_v35 }
 0x52f   : > { %3885 = vmatprep.subr.msk.mxu1 %vm1931_vm4, %v5679_v54  ;;  %3950 = vmatpush1.msk.msra.mxu0 %vm1770_vm13, %v5673_v34  ;;  %vm1829_vm4 = vcmp.eq.f32.partialorder %v5866_v55, %v5662_v17  ;;  %vm1989_vm13 = vcmp.eq.f32.partialorder %v5866_v55, %v5669_v15  ;;  %vm1981_vm8 = vcmp.eq.f32.partialorder %v5915_v27, %v5669_v15  ;;  %v6005_v51 = vcvt.s32.f32 %v1700_v37 }
 0x530   : > { %3886 = vmatpush1.msk.msra.mxu1 %vm1930_vm12, %v5676_v7  ;;  %3951 = vmatprep.subr.msk.mxu0 %vm1769_vm2, %v5653_v31  ;;  %vm1828_vm12 = vcmp.eq.f32.partialorder %v5866_v55, %v5636_v44  ;;  %vm1988_vm2 = vcmp.eq.f32.partialorder %v5866_v55, %v5659_v53  ;;  %v6021_v37 = vcvt.s32.f32 %v1699_v5  ;;  %v1697_v5 = vadd.s32 168, %v5623_v35 }
 0x531   : > { %3887 = vmatprep.subr.msk.mxu1 %vm1929_vm11, %v5679_v54  ;;  %3952 = vmatpush1.msk.msra.mxu0 %vm1768_vm9, %v5673_v34  ;;  %vm1827_vm11 = vcmp.eq.f32.partialorder %v5875_v43, %v5662_v17  ;;  %vm1987_vm9 = vcmp.eq.f32.partialorder %v5875_v43, %v5669_v15  ;;  %v6052_v8 = vcvt.s32.f32 %v1698_v6  ;;  %v1696_v6 = vadd.s32 160, %v5623_v35 }
 0x532   : > { %3888 = vmatpush1.msk.msra.mxu1 %vm1928_vm0, %v5676_v7  ;;  %3953 = vmatprep.subr.msk.mxu0 %vm1767_vm7, %v5653_v31  ;;  %vm1826_vm0 = vcmp.eq.f32.partialorder %v5875_v43, %v5636_v44  ;;  %vm1986_vm7 = vcmp.eq.f32.partialorder %v5875_v43, %v5659_v53  ;;  %v6096_v32 = vcvt.s32.f32 %v1697_v5  ;;  %v1694_v5 = vadd.s32 144, %v5623_v35 }
 0x533   : > { %3889 = vmatprep.subr.msk.mxu1 %vm1927_vm14, %v5679_v54  ;;  %3954 = vmatpush1.msk.msra.mxu0 %vm1766_vm5, %v5673_v34  ;;  %vm1985_vm14 = vcmp.eq.f32.partialorder %v5886_v38, %v5669_v15  ;;  %vm1824_vm5 = vcmp.eq.f32.partialorder %v5886_v38, %v5636_v44  ;;  %v6133_v36 = vcvt.s32.f32 %v1696_v6  ;;  %v6153_v6 = vcvt.s32.f32 %v1695_v47 }
 0x534   : > { %3890 = vmatpush1.msk.msra.mxu1 %vm1926_vm1, %v5676_v7  ;;  %3955 = vmatprep.subr.msk.mxu0 %vm1829_vm4, %v5653_v31  ;;  %vm1823_vm1 = vcmp.eq.f32.partialorder %v5905_v52, %v5662_v17  ;;  %vm1983_vm4 = vcmp.eq.f32.partialorder %v5905_v52, %v5669_v15  ;;  %v1693_v47 = vadd.s32 136, %v5623_v35  ;;  %v6192_v59 = vcvt.s32.f32 %v1694_v5 }
 0x535   : > { %3891 = vmatprep.subr.msk.mxu1 %vm1989_vm13, %v5679_v54  ;;  %3956 = vmatpush2.msk.msra.mxu0 %vm1828_vm12, %v5673_v34  ;;  %vm1982_vm13 = vcmp.eq.f32.partialorder %v5905_v52, %v5659_v53  ;;  %vm1821_vm12 = vcmp.eq.f32.partialorder %v5915_v27, %v5662_v17  ;;  %v1692_v5 = vadd.s32 128, %v5623_v35  ;;  %vm1804_vm15 = vcmp.eq.f32.partialorder %v6153_v6, %v5636_v44 }
 0x536   : > { %3892 = vmatpush2.msk.msra.mxu1 %vm1988_vm2, %v5676_v7  ;;  %3957 = vmatprep.subr.msk.mxu0 %vm1827_vm11, %v5653_v31  ;;  %vm1820_vm2 = vcmp.eq.f32.partialorder %v5915_v27, %v5636_v44  ;;  %vm1980_vm11 = vcmp.eq.f32.partialorder %v5915_v27, %v5659_v53  ;;  %v6249_v35 = vcvt.s32.f32 %v1693_v47 }
 0x537   : > { %3893 = vmatprep.subr.msk.mxu1 %vm1987_vm9, %v5679_v54  ;;  %3958 = vmatpush2.msk.msra.mxu0 %vm1826_vm0, %v5673_v34  ;;  %vm1979_vm9 = vcmp.eq.f32.partialorder %v5934_v33, %v5669_v15  ;;  %vm1818_vm0 = vcmp.eq.f32.partialorder %v5934_v33, %v5636_v44  ;;  %v6287_v47 = vcvt.s32.f32 %v1692_v5 }
 0x538   : > { %3894 = vmatpush2.msk.msra.mxu1 %vm1986_vm7, %v5676_v7  ;;  %3959 = vmatprep.subr.msk.mxu0 %vm1825_vm10, %v5653_v31  ;;  %vm1817_vm10 = vcmp.eq.f32.partialorder %v5974_v0, %v5662_v17  ;;  %vm1977_vm7 = vcmp.eq.f32.partialorder %v5974_v0, %v5669_v15 }
 0x539   : > { %3895 = vmatprep.subr.msk.mxu1 %vm1985_vm14, %v5679_v54  ;;  %3960 = vmatpush2.msk.msra.mxu0 %vm1824_vm5, %v5673_v34  ;;  %vm1976_vm14 = vcmp.eq.f32.partialorder %v5974_v0, %v5659_v53  ;;  %vm1815_vm5 = vcmp.eq.f32.partialorder %v6005_v51, %v5662_v17 }
 0x53a   : > { %3896 = vmatpush2.msk.msra.mxu1 %vm1984_vm3, %v5676_v7  ;;  %3961 = vmatprep.subr.msk.mxu0 %vm1823_vm1, %v5653_v31  ;;  %vm1814_vm3 = vcmp.eq.f32.partialorder %v6005_v51, %v5636_v44  ;;  %vm1810_vm1 = vcmp.eq.f32.partialorder %v6052_v8, %v5636_v44 }
 0x53b   : > { %3897 = vmatprep.subr.msk.mxu1 %vm1983_vm4, %v5679_v54  ;;  %3962 = vmatpush2.msk.msra.mxu0 %vm1822_vm6, %v5673_v34  ;;  %vm1973_vm6 = vcmp.eq.f32.partialorder %v6021_v37, %v5669_v15  ;;  %vm1812_vm4 = vcmp.eq.f32.partialorder %v6021_v37, %v5636_v44 }
 0x53c   : > { %3898 = vmatpush2.msk.msra.mxu1 %vm1982_vm13, %v5676_v7  ;;  %3963 = vmatprep.subr.msk.mxu0 %vm1821_vm12, %v5653_v31  ;;  %vm1972_vm13 = vcmp.eq.f32.partialorder %v6021_v37, %v5659_v53  ;;  %vm1971_vm12 = vcmp.eq.f32.partialorder %v6052_v8, %v5669_v15 }
 0x53d   : > { %3899 = vmatprep.subr.msk.mxu1 %vm1981_vm8, %v5679_v54  ;;  %3964 = vmatpush2.msk.msra.mxu0 %vm1820_vm2, %v5673_v34  ;;  %vm8036_vm2 = vcmp.eq.f32.partialorder %v5934_v33, %v5662_v17  ;;  %vm1969_vm8 = vcmp.eq.f32.partialorder %v6096_v32, %v5669_v15 }
 0x53e   : > { %3900 = vmatpush2.msk.msra.mxu1 %vm1980_vm11, %v5676_v7  ;;  %3965 = vmatprep.subr.msk.mxu0 %vm8036_vm2, %v5653_v31  ;;  %vm1970_vm2 = vcmp.eq.f32.partialorder %v6052_v8, %v5659_v53  ;;  %vm1968_vm11 = vcmp.eq.f32.partialorder %v6096_v32, %v5659_v53 }
 0x53f   : > { %3901 = vmatprep.subr.msk.mxu1 %vm1979_vm9, %v5679_v54  ;;  %3966 = vmatpush2.msk.msra.mxu0 %vm1818_vm0, %v5673_v34  ;;  %vm8037_vm0 = vcmp.eq.f32.partialorder %v5934_v33, %v5659_v53  ;;  %vm1807_vm9 = vcmp.eq.f32.partialorder %v6133_v36, %v5662_v17 }
 0x540   : > { %3902 = vmatpush2.msk.msra.mxu1 %vm8037_vm0, %v5676_v7  ;;  %3967 = vmatprep.subr.msk.mxu0 %vm1817_vm10, %v5653_v31  ;;  %vm8038_vm10 = vcmp.eq.f32.partialorder %v5974_v0, %v5636_v44  ;;  %vm1966_vm0 = vcmp.eq.f32.partialorder %v6133_v36, %v5659_v53 }
 0x541   : > { %3903 = vmatprep.subr.msk.mxu1 %vm1977_vm7, %v5679_v54  ;;  %3968 = vmatpush2.msk.msra.mxu0 %vm8038_vm10, %v5673_v34  ;;  %vm8040_vm10 = vcmp.eq.f32.partialorder %v6005_v51, %v5659_v53  ;;  %vm1965_vm7 = vcmp.eq.f32.partialorder %v6153_v6, %v5669_v15 }
 0x542   : > { %3904 = vmatpush2.msk.msra.mxu1 %vm1976_vm14, %v5676_v7  ;;  %3969 = vmatprep.subr.msk.mxu0 %vm1815_vm5, %v5653_v31  ;;  %vm8039_vm5 = vcmp.eq.f32.partialorder %v6005_v51, %v5669_v15  ;;  %vm1802_vm14 = vcmp.eq.f32.partialorder %v6192_v59, %v5636_v44 }
 0x543   : > { %3905 = vmatprep.subr.msk.mxu1 %vm8039_vm5, %v5679_v54  ;;  %3970 = vmatpush2.msk.msra.mxu0 %vm1814_vm3, %v5673_v34  ;;  %vm8041_vm3 = vcmp.eq.f32.partialorder %v6021_v37, %v5662_v17  ;;  %vm1963_vm5 = vcmp.eq.f32.partialorder %v6192_v59, %v5669_v15 }
 0x544   : > { %3906 = vmatpush2.msk.msra.mxu1 %vm8040_vm10, %v5676_v7  ;;  %3971 = vmatprep.subr.msk.mxu0 %vm8041_vm3, %v5653_v31  ;;  %vm1964_vm3 = vcmp.eq.f32.partialorder %v6153_v6, %v5659_v53  ;;  %vm1960_vm10 = vcmp.eq.f32.partialorder %v6249_v35, %v5659_v53 }
 0x545   : > { %3907 = vmatprep.subr.msk.mxu1 %vm1973_vm6, %v5679_v54  ;;  %3972 = vmatpush2.msk.msra.mxu0 %vm1812_vm4, %v5673_v34  ;;  %vm8042_vm4 = vcmp.eq.f32.partialorder %v6052_v8, %v5662_v17  ;;  %vm1961_vm6 = vcmp.eq.f32.partialorder %v6249_v35, %v5669_v15 }
 0x546   : > { %3908 = vmatpush2.msk.msra.mxu1 %vm1972_vm13, %v5676_v7  ;;  %3973 = vmatprep.subr.msk.mxu0 %vm8042_vm4, %v5653_v31  ;;  %vm1962_vm4 = vcmp.eq.f32.partialorder %v6192_v59, %v5659_v53  ;;  %vm8045_vm13 = vcmp.eq.f32.partialorder %v6133_v36, %v5669_v15 }
 0x547   : > { %3909 = vmatprep.subr.msk.mxu1 %vm1971_vm12, %v5679_v54  ;;  %3974 = vmatpush2.msk.msra.mxu0 %vm1810_vm1, %v5673_v34  ;;  %vm8043_vm1 = vcmp.eq.f32.partialorder %v6096_v32, %v5662_v17  ;;  %vm1958_vm12 = vcmp.eq.f32.partialorder %v6287_v47, %v5659_v53  ;;  %v3045_v53 = vld [vmem:[%s7826_s11 + $0x18] sm:$0xff] }
 0x548   : > { %3910 = vmatpush2.msk.msra.mxu1 %vm1970_vm2, %v5676_v7  ;;  %3975 = vmatprep.subr.msk.mxu0 %vm8043_vm1, %v5653_v31  ;;  %vm8044_vm1 = vcmp.eq.f32.partialorder %v6096_v32, %v5636_v44  ;;  %vm2446_vm2 = vcmp.eq.f32.partialorder %v5846_v14, %v5687_v39 }
 0x549   : > { %3911 = vmatprep.subr.msk.mxu1 %vm1969_vm8, %v5679_v54  ;;  %3976 = vmatpush2.msk.msra.mxu0 %vm8044_vm1, %v5673_v34  ;;  %vm1959_vm1 = vcmp.eq.f32.partialorder %v6287_v47, %v5669_v15  ;;  %vm2227_vm8 = vcmp.eq.f32.partialorder %v5837_v46, %v5684_v3  ;;  %v3043_v15 = vld [vmem:[%s7826_s11 + $0x8] sm:$0xff] }
 0x54a   : > { %3912 = vmatpush2.msk.msra.mxu1 %vm1968_vm11, %v5676_v7  ;;  %3977 = vmatprep.subr.msk.mxu0 %vm1807_vm9, %v5653_v31  ;;  %vm8046_vm9 = vcmp.eq.f32.partialorder %v6133_v36, %v5636_v44  ;;  %vm2449_vm11 = vcmp.eq.f32.partialorder %v5828_v29, %v5650_v18 }
 0x54b   : > { %3913 = vmatprep.subr.msk.mxu1 %vm8045_vm13, %v5679_v54  ;;  %3978 = vmatpush2.msk.msra.mxu0 %vm8046_vm9, %v5673_v34  ;;  %vm8047_vm13 = vcmp.eq.f32.partialorder %v6153_v6, %v5662_v17  ;;  %vm2228_vm9 = vcmp.eq.f32.partialorder %v5828_v29, %v5644_v10 }
 0x54c   : > { %3914 = vmatpush2.msk.msra.mxu1 %vm1966_vm0, %v5676_v7  ;;  %3979 = vmatprep.subr.msk.mxu0 %vm8047_vm13, %v5653_v31  ;;  %vm2224_vm13 = vcmp.eq.f32.partialorder %v5846_v14, %v5644_v10  ;;  %vm2443_vm0 = vcmp.eq.f32.partialorder %v5855_v13, %v5650_v18 }
 0x54d   : > { %3915 = vmatprep.subr.msk.mxu1 %vm1965_vm7, %v5679_v54  ;;  %3980 = vmatpush2.msk.msra.mxu0 %vm1804_vm15, %v5673_v34  ;;  %vm8048_vm7 = vcmp.eq.f32.partialorder %v6192_v59, %v5662_v17  ;;  %vm2225_vm15 = vcmp.eq.f32.partialorder %v5846_v14, %v5684_v3 }
 0x54e   : > { %3916 = vmatpush2.msk.msra.mxu1 %vm1964_vm3, %v5676_v7  ;;  %3981 = vmatprep.subr.msk.mxu0 %vm8048_vm7, %v5653_v31  ;;  %vm2221_vm7 = vcmp.eq.f32.partialorder %v5858_v50, %v5684_v3  ;;  %vm2504_vm3 = vcmp.eq.f32.partialorder %v5866_v55, %v5687_v39 }
 0x54f   : > { %3917 = vmatprep.subr.msk.mxu1 %vm1963_vm5, %v5679_v54  ;;  %3982 = vmatpush2.msk.msra.mxu0 %vm1802_vm14, %v5673_v34  ;;  %vm8049_vm5 = vcmp.eq.f32.partialorder %v6249_v35, %v5662_v17  ;;  %vm2282_vm14 = vcmp.eq.f32.partialorder %v5866_v55, %v5644_v10 }
 0x550   : > { %3918 = vmatpush2.msk.msra.mxu1 %vm1962_vm4, %v5676_v7  ;;  %3983 = vmatprep.subr.msk.mxu0 %vm8049_vm5, %v5653_v31  ;;  %vm8050_vm4 = vcmp.eq.f32.partialorder %v6249_v35, %v5636_v44  ;;  %vm8058_vm5 = vcmp.eq.f32.partialorder %v5633_v16, %v5684_v3 }
 0x551   : > { %3919 = vmatprep.subr.msk.mxu1 %vm1961_vm6, %v5679_v54  ;;  %3984 = vmatpush2.msk.msra.mxu0 %vm8050_vm4, %v5673_v34  ;;  %vm8051_vm6 = vcmp.eq.f32.partialorder %v6287_v47, %v5662_v17  ;;  %vm8055_vm4 = vcmp.eq.f32.partialorder %v5631_v26, %v5650_v18  ;;  %v2780_v17 = vld [vmem:[%s7824_s9 + $0x10] sm:$0xff] }
 0x552   : > { %3920 = vmatpush2.msk.msra.mxu1 %vm1960_vm10, %v5676_v7  ;;  %3985 = vmatprep.subr.msk.mxu0 %vm8051_vm6, %v5653_v31  ;;  %vm8052_vm10 = vcmp.eq.f32.partialorder %v6287_v47, %v5636_v44  ;;  %vm8054_vm6 = vcmp.eq.f32.partialorder %v5631_v26, %v5684_v3  ;;  %v7154_v31 = vld [vmem:[%s4615_s23] sm:$0xff]  ;;  %s535_s23 = scalar_lea.vmem [#allocation8], %s4611_s15 }
 0x553   : > { %3921 = vmatprep.subr.msk.mxu1 %vm1959_vm1, %v5679_v54  ;;  %3986 = vmatpush2.msk.msra.mxu0 %vm8052_vm10, %v5673_v34  ;;  %vm8053_vm1 = vcmp.eq.f32.partialorder %v5631_v26, %v5687_v39  ;;  %vm8062_vm10 = vcmp.eq.f32.partialorder %v5641_v12, %v5684_v3  ;;  %v2778_v34 = vld [vmem:[%s7824_s9] sm:$0xff]  ;;  %v2982_v54 = vpop.permute.xlu0 %2981 }
 0x554   : > { %3922 = vmatpush2.msk.msra.mxu1 %vm1958_vm12, %v5676_v7  ;;  %4051 = vmatprep.subr.msk.mxu0 %vm8053_vm1, %v5665_v60  ;;  %vm8056_vm1 = vcmp.eq.f32.partialorder %v5631_v26, %v5644_v10  ;;  %vm8060_vm12 = vcmp.eq.f32.partialorder %v5633_v16, %v5644_v10  ;;  %v3042_v7 = vld [vmem:[%s7826_s11] sm:$0xff] }
 0x555   : > { %2129 = vmatmul.mubr.f32.vlgmr.msra.gmra.mxu1 %v5610_v45  ;;  %2200 = vmatmul.mubr.f32.vlgmr.msra.gmra.mxu0 %v5610_v45 }
 0x556   : > { %3987 = vmatprep.subr.msk.mxu1 %vm8054_vm6, %v5656_v56  ;;  %4052 = vmatpush1.msk.msra.mxu0 %vm8055_vm4, %v5639_v30  ;;  %vm8057_vm6 = vcmp.eq.f32.partialorder %v5633_v16, %v5687_v39  ;;  %vm8064_vm4 = vcmp.eq.f32.partialorder %v5641_v12, %v5644_v10 }
 0x557   : > { %3988 = vmatpush1.msk.msra.mxu1 %vm8056_vm1, %v5647_v61  ;;  %4053 = vmatprep.subr.msk.mxu0 %vm8057_vm6, %v5665_v60  ;;  %vm8059_vm1 = vcmp.eq.f32.partialorder %v5633_v16, %v5650_v18  ;;  %vm8066_vm6 = vcmp.eq.f32.partialorder %v5706_v20, %v5684_v3 }
 0x558   : > { %3989 = vmatprep.subr.msk.mxu1 %vm8058_vm5, %v5656_v56  ;;  %4054 = vmatpush1.msk.msra.mxu0 %vm8059_vm1, %v5639_v30  ;;  %vm8061_vm5 = vcmp.eq.f32.partialorder %v5641_v12, %v5687_v39  ;;  %vm8068_vm1 = vcmp.eq.f32.partialorder %v5706_v20, %v5644_v10 }
 0x559   : > { %3990 = vmatpush1.msk.msra.mxu1 %vm8060_vm12, %v5647_v61  ;;  %4055 = vmatprep.subr.msk.mxu0 %vm8061_vm5, %v5665_v60  ;;  %vm8063_vm12 = vcmp.eq.f32.partialorder %v5641_v12, %v5650_v18  ;;  %vm8070_vm5 = vcmp.eq.f32.partialorder %v5721_v24, %v5684_v3 }
 0x55a   : > { %3991 = vmatprep.subr.msk.mxu1 %vm8062_vm10, %v5656_v56  ;;  %4056 = vmatpush1.msk.msra.mxu0 %vm8063_vm12, %v5639_v30  ;;  %vm8065_vm10 = vcmp.eq.f32.partialorder %v5706_v20, %v5687_v39  ;;  %vm8072_vm12 = vcmp.eq.f32.partialorder %v5721_v24, %v5644_v10 }
 0x55b   : > { %3992 = vmatpush1.msk.msra.mxu1 %vm8064_vm4, %v5647_v61  ;;  %4057 = vmatprep.subr.msk.mxu0 %vm8065_vm10, %v5665_v60  ;;  %vm8067_vm4 = vcmp.eq.f32.partialorder %v5706_v20, %v5650_v18  ;;  %vm8074_vm10 = vcmp.eq.f32.partialorder %v5736_v25, %v5684_v3 }
 0x55c   : > { %3993 = vmatprep.subr.msk.mxu1 %vm8066_vm6, %v5656_v56  ;;  %4058 = vmatpush1.msk.msra.mxu0 %vm8067_vm4, %v5639_v30  ;;  %vm8069_vm6 = vcmp.eq.f32.partialorder %v5721_v24, %v5687_v39  ;;  %vm8076_vm4 = vcmp.eq.f32.partialorder %v5736_v25, %v5644_v10 }
 0x55d   : > { %3994 = vmatpush1.msk.msra.mxu1 %vm8068_vm1, %v5647_v61  ;;  %4059 = vmatprep.subr.msk.mxu0 %vm8069_vm6, %v5665_v60  ;;  %vm8071_vm1 = vcmp.eq.f32.partialorder %v5721_v24, %v5650_v18  ;;  %vm8078_vm6 = vcmp.eq.f32.partialorder %v5751_v21, %v5684_v3 }
 0x55e   : > { %3995 = vmatprep.subr.msk.mxu1 %vm8070_vm5, %v5656_v56  ;;  %4060 = vmatpush1.msk.msra.mxu0 %vm8071_vm1, %v5639_v30  ;;  %vm8073_vm5 = vcmp.eq.f32.partialorder %v5736_v25, %v5687_v39  ;;  %vm8080_vm1 = vcmp.eq.f32.partialorder %v5751_v21, %v5644_v10 }
 0x55f   : > { %3996 = vmatpush1.msk.msra.mxu1 %vm8072_vm12, %v5647_v61  ;;  %4061 = vmatprep.subr.msk.mxu0 %vm8073_vm5, %v5665_v60  ;;  %vm8075_vm12 = vcmp.eq.f32.partialorder %v5736_v25, %v5650_v18  ;;  %vm8082_vm5 = vcmp.eq.f32.partialorder %v5766_v11, %v5684_v3 }
 0x560   : > { %3997 = vmatprep.subr.msk.mxu1 %vm8074_vm10, %v5656_v56  ;;  %4062 = vmatpush1.msk.msra.mxu0 %vm8075_vm12, %v5639_v30  ;;  %vm8077_vm10 = vcmp.eq.f32.partialorder %v5751_v21, %v5687_v39  ;;  %vm8084_vm12 = vcmp.eq.f32.partialorder %v5766_v11, %v5644_v10 }
 0x561   : > { %3998 = vmatpush1.msk.msra.mxu1 %vm8076_vm4, %v5647_v61  ;;  %4063 = vmatprep.subr.msk.mxu0 %vm8077_vm10, %v5665_v60  ;;  %vm8079_vm4 = vcmp.eq.f32.partialorder %v5751_v21, %v5650_v18  ;;  %vm8086_vm10 = vcmp.eq.f32.partialorder %v5781_v9, %v5684_v3 }
 0x562   : > { %3999 = vmatprep.subr.msk.mxu1 %vm8078_vm6, %v5656_v56  ;;  %4064 = vmatpush1.msk.msra.mxu0 %vm8079_vm4, %v5639_v30  ;;  %vm8081_vm6 = vcmp.eq.f32.partialorder %v5766_v11, %v5687_v39  ;;  %vm8088_vm4 = vcmp.eq.f32.partialorder %v5781_v9, %v5644_v10 }
 0x563   : > { %4000 = vmatpush1.msk.msra.mxu1 %vm8080_vm1, %v5647_v61  ;;  %4065 = vmatprep.subr.msk.mxu0 %vm8081_vm6, %v5665_v60  ;;  %vm8083_vm1 = vcmp.eq.f32.partialorder %v5766_v11, %v5650_v18  ;;  %vm8092_vm6 = vcmp.eq.f32.partialorder %v5796_v63, %v5644_v10 }
 0x564   : > { %4001 = vmatprep.subr.msk.mxu1 %vm8082_vm5, %v5656_v56  ;;  %4066 = vmatpush1.msk.msra.mxu0 %vm8083_vm1, %v5639_v30  ;;  %vm8085_vm5 = vcmp.eq.f32.partialorder %v5781_v9, %v5687_v39  ;;  %vm8091_vm1 = vcmp.eq.f32.partialorder %v5796_v63, %v5650_v18 }
 0x565   : > { %4002 = vmatpush1.msk.msra.mxu1 %vm8084_vm12, %v5647_v61  ;;  %4067 = vmatprep.subr.msk.mxu0 %vm8085_vm5, %v5665_v60  ;;  %vm8087_vm12 = vcmp.eq.f32.partialorder %v5781_v9, %v5650_v18  ;;  %vm2253_vm5 = vcmp.eq.f32.partialorder %v6287_v47, %v5684_v3 }
 0x566   : > { %4003 = vmatprep.subr.msk.mxu1 %vm8086_vm10, %v5656_v56  ;;  %4068 = vmatpush1.msk.msra.mxu0 %vm8087_vm12, %v5639_v30  ;;  %vm8089_vm10 = vcmp.eq.f32.partialorder %v5796_v63, %v5687_v39  ;;  %vm8090_vm12 = vcmp.eq.f32.partialorder %v5796_v63, %v5684_v3 }
 0x567   : > { %4004 = vmatpush1.msk.msra.mxu1 %vm8088_vm4, %v5647_v61  ;;  %4069 = vmatprep.subr.msk.mxu0 %vm8089_vm10, %v5665_v60  ;;  %vm8093_vm4 = vcmp.eq.f32.partialorder %v5812_v57, %v5687_v39  ;;  %vm8094_vm10 = vcmp.eq.f32.partialorder %v5812_v57, %v5684_v3 }
 0x568   : > { %4005 = vmatprep.subr.msk.mxu1 %vm8090_vm12, %v5656_v56  ;;  %4070 = vmatpush1.msk.msra.mxu0 %vm8091_vm1, %v5639_v30  ;;  %vm8095_vm12 = vcmp.eq.f32.partialorder %v5812_v57, %v5650_v18  ;;  %vm8096_vm1 = vcmp.eq.f32.partialorder %v5812_v57, %v5644_v10 }
 0x569   : > { %4006 = vmatpush1.msk.msra.mxu1 %vm8092_vm6, %v5647_v61  ;;  %4071 = vmatprep.subr.msk.mxu0 %vm8093_vm4, %v5665_v60  ;;  %vm8097_vm6 = vcmp.eq.f32.partialorder %v5828_v29, %v5687_v39  ;;  %vm8098_vm4 = vcmp.eq.f32.partialorder %v5828_v29, %v5684_v3 }
 0x56a   : > { %4007 = vmatprep.subr.msk.mxu1 %vm8094_vm10, %v5656_v56  ;;  %4072 = vmatpush1.msk.msra.mxu0 %vm8095_vm12, %v5639_v30  ;;  %vm8099_vm10 = vcmp.eq.f32.partialorder %v5837_v46, %v5687_v39  ;;  %vm8100_vm12 = vcmp.eq.f32.partialorder %v5837_v46, %v5650_v18 }
 0x56b   : > { %4008 = vmatpush1.msk.msra.mxu1 %vm8096_vm1, %v5647_v61  ;;  %4073 = vmatprep.subr.msk.mxu0 %vm8097_vm6, %v5665_v60  ;;  %vm8107_vm1 = vcmp.eq.f32.partialorder %v5858_v50, %v5650_v18  ;;  %vm8109_vm6 = vcmp.eq.f32.partialorder %v5866_v55, %v5684_v3 }
 0x56c   : > { %4009 = vmatprep.subr.msk.mxu1 %vm8098_vm4, %v5656_v56  ;;  %4074 = vmatpush1.msk.msra.mxu0 %vm2449_vm11, %v5639_v30  ;;  %vm8101_vm11 = vcmp.eq.f32.partialorder %v5837_v46, %v5644_v10  ;;  %vm8111_vm4 = vcmp.eq.f32.partialorder %v5875_v43, %v5687_v39 }
 0x56d   : > { %4010 = vmatpush1.msk.msra.mxu1 %vm2228_vm9, %v5647_v61  ;;  %4075 = vmatprep.subr.msk.mxu0 %vm8099_vm10, %v5665_v60  ;;  %vm8103_vm9 = vcmp.eq.f32.partialorder %v5855_v13, %v5687_v39  ;;  %vm8113_vm10 = vcmp.eq.f32.partialorder %v5875_v43, %v5650_v18 }
 0x56e   : > { %4011 = vmatprep.subr.msk.mxu1 %vm2227_vm8, %v5656_v56  ;;  %4076 = vmatpush1.msk.msra.mxu0 %vm8100_vm12, %v5639_v30  ;;  %vm8102_vm8 = vcmp.eq.f32.partialorder %v5846_v14, %v5650_v18  ;;  %vm8114_vm12 = vcmp.eq.f32.partialorder %v5875_v43, %v5644_v10 }
 0x56f   : > { %4012 = vmatpush1.msk.msra.mxu1 %vm8101_vm11, %v5647_v61  ;;  %4077 = vmatprep.subr.msk.mxu0 %vm2446_vm2, %v5665_v60  ;;  %vm8104_vm2 = vcmp.eq.f32.partialorder %v5855_v13, %v5684_v3  ;;  %vm8116_vm11 = vcmp.eq.f32.partialorder %v5886_v38, %v5684_v3 }
 0x570   : > { %4013 = vmatprep.subr.msk.mxu1 %vm2225_vm15, %v5656_v56  ;;  %4078 = vmatpush1.msk.msra.mxu0 %vm8102_vm8, %v5639_v30  ;;  %vm8105_vm15 = vcmp.eq.f32.partialorder %v5855_v13, %v5644_v10  ;;  %vm8117_vm8 = vcmp.eq.f32.partialorder %v5886_v38, %v5650_v18 }
 0x571   : > { %4014 = vmatpush1.msk.msra.mxu1 %vm2224_vm13, %v5647_v61  ;;  %4079 = vmatprep.subr.msk.mxu0 %vm8103_vm9, %v5665_v60  ;;  %vm8106_vm13 = vcmp.eq.f32.partialorder %v5858_v50, %v5687_v39  ;;  %vm8118_vm9 = vcmp.eq.f32.partialorder %v5886_v38, %v5644_v10 }
 0x572   : > { %4015 = vmatprep.subr.msk.mxu1 %vm8104_vm2, %v5656_v56  ;;  %4080 = vmatpush1.msk.msra.mxu0 %vm2443_vm0, %v5639_v30  ;;  %vm8108_vm0 = vcmp.eq.f32.partialorder %v5858_v50, %v5644_v10  ;;  %vm8119_vm2 = vcmp.eq.f32.partialorder %v5905_v52, %v5687_v39 }
 0x573   : > { %4016 = vmatpush1.msk.msra.mxu1 %vm8105_vm15, %v5647_v61  ;;  %4081 = vmatprep.subr.msk.mxu0 %vm8106_vm13, %v5665_v60  ;;  %vm8120_vm15 = vcmp.eq.f32.partialorder %v5905_v52, %v5684_v3  ;;  %vm8121_vm13 = vcmp.eq.f32.partialorder %v5905_v52, %v5650_v18 }
 0x574   : > { %4017 = vmatprep.subr.msk.mxu1 %vm2221_vm7, %v5656_v56  ;;  %4082 = vmatpush1.msk.msra.mxu0 %vm8107_vm1, %v5639_v30  ;;  %vm8110_vm7 = vcmp.eq.f32.partialorder %v5866_v55, %v5650_v18  ;;  %vm8122_vm1 = vcmp.eq.f32.partialorder %v5905_v52, %v5644_v10 }
 0x575   : > { %4018 = vmatpush1.msk.msra.mxu1 %vm8108_vm0, %v5647_v61  ;;  %4083 = vmatprep.subr.msk.mxu0 %vm2504_vm3, %v5665_v60  ;;  %vm8112_vm3 = vcmp.eq.f32.partialorder %v5875_v43, %v5684_v3  ;;  %vm8123_vm0 = vcmp.eq.f32.partialorder %v5915_v27, %v5687_v39 }
 0x576   : > { %4019 = vmatprep.subr.msk.mxu1 %vm8109_vm6, %v5656_v56  ;;  %4084 = vmatpush2.msk.msra.mxu0 %vm8110_vm7, %v5639_v30  ;;  %vm8124_vm6 = vcmp.eq.f32.partialorder %v5915_v27, %v5684_v3  ;;  %vm8125_vm7 = vcmp.eq.f32.partialorder %v5915_v27, %v5650_v18 }
 0x577   : > { %4020 = vmatpush2.msk.msra.mxu1 %vm2282_vm14, %v5647_v61  ;;  %4085 = vmatprep.subr.msk.mxu0 %vm8111_vm4, %v5665_v60  ;;  %vm8115_vm14 = vcmp.eq.f32.partialorder %v5886_v38, %v5687_v39  ;;  %vm8126_vm4 = vcmp.eq.f32.partialorder %v5915_v27, %v5644_v10 }
 0x578   : > { %4021 = vmatprep.subr.msk.mxu1 %vm8112_vm3, %v5656_v56  ;;  %4086 = vmatpush2.msk.msra.mxu0 %vm8113_vm10, %v5639_v30  ;;  %vm8127_vm3 = vcmp.eq.f32.partialorder %v5934_v33, %v5687_v39  ;;  %vm8128_vm10 = vcmp.eq.f32.partialorder %v5934_v33, %v5684_v3 }
 0x579   : > { %4022 = vmatpush2.msk.msra.mxu1 %vm8114_vm12, %v5647_v61  ;;  %4087 = vmatprep.subr.msk.mxu0 %vm8115_vm14, %v5665_v60  ;;  %vm8129_vm12 = vcmp.eq.f32.partialorder %v5934_v33, %v5650_v18  ;;  %vm8130_vm14 = vcmp.eq.f32.partialorder %v5934_v33, %v5644_v10 }
 0x57a   : > { %4023 = vmatprep.subr.msk.mxu1 %vm8116_vm11, %v5656_v56  ;;  %4088 = vmatpush2.msk.msra.mxu0 %vm8117_vm8, %v5639_v30  ;;  %vm8131_vm11 = vcmp.eq.f32.partialorder %v5974_v0, %v5687_v39  ;;  %vm8132_vm8 = vcmp.eq.f32.partialorder %v5974_v0, %v5684_v3 }
 0x57b   : > { %4024 = vmatpush2.msk.msra.mxu1 %vm8118_vm9, %v5647_v61  ;;  %4089 = vmatprep.subr.msk.mxu0 %vm8119_vm2, %v5665_v60  ;;  %vm8133_vm9 = vcmp.eq.f32.partialorder %v5974_v0, %v5650_v18  ;;  %vm8134_vm2 = vcmp.eq.f32.partialorder %v5974_v0, %v5644_v10  ;;  %v4218_v0 = vld [vmem:[%s4623_s22] sm:$0xff]  ;;  %s3734_s22 = sshll.u32 %s535_s23, 4  ;;  %s3735_s22 = int_to_ptr.vmem [resolvable:$true] %s3734_s22 }
 0x57c   : > { %4025 = vmatprep.subr.msk.mxu1 %vm8120_vm15, %v5656_v56  ;;  %4090 = vmatpush2.msk.msra.mxu0 %vm8121_vm13, %v5639_v30  ;;  %vm8135_vm15 = vcmp.eq.f32.partialorder %v6005_v51, %v5687_v39  ;;  %vm8136_vm13 = vcmp.eq.f32.partialorder %v6005_v51, %v5684_v3 }
 0x57d   : > { %4026 = vmatpush2.msk.msra.mxu1 %vm8122_vm1, %v5647_v61  ;;  %4091 = vmatprep.subr.msk.mxu0 %vm8123_vm0, %v5665_v60  ;;  %vm8137_vm1 = vcmp.eq.f32.partialorder %v6005_v51, %v5650_v18  ;;  %vm8138_vm0 = vcmp.eq.f32.partialorder %v6005_v51, %v5644_v10 }
 0x57e   : > { %4027 = vmatprep.subr.msk.mxu1 %vm8124_vm6, %v5656_v56  ;;  %4092 = vmatpush2.msk.msra.mxu0 %vm8125_vm7, %v5639_v30  ;;  %vm8139_vm6 = vcmp.eq.f32.partialorder %v6021_v37, %v5687_v39  ;;  %vm8140_vm7 = vcmp.eq.f32.partialorder %v6021_v37, %v5684_v3 }
 0x57f   : > { %4028 = vmatpush2.msk.msra.mxu1 %vm8126_vm4, %v5647_v61  ;;  %4093 = vmatprep.subr.msk.mxu0 %vm8127_vm3, %v5665_v60  ;;  %vm8141_vm4 = vcmp.eq.f32.partialorder %v6021_v37, %v5650_v18  ;;  %vm8142_vm3 = vcmp.eq.f32.partialorder %v6021_v37, %v5644_v10 }
 0x580   : > { %4029 = vmatprep.subr.msk.mxu1 %vm8128_vm10, %v5656_v56  ;;  %4094 = vmatpush2.msk.msra.mxu0 %vm8129_vm12, %v5639_v30  ;;  %vm8143_vm10 = vcmp.eq.f32.partialorder %v6052_v8, %v5687_v39  ;;  %vm8144_vm12 = vcmp.eq.f32.partialorder %v6052_v8, %v5684_v3 }
 0x581   : > { %4030 = vmatpush2.msk.msra.mxu1 %vm8130_vm14, %v5647_v61  ;;  %4095 = vmatprep.subr.msk.mxu0 %vm8131_vm11, %v5665_v60  ;;  %vm8145_vm14 = vcmp.eq.f32.partialorder %v6052_v8, %v5650_v18  ;;  %vm8146_vm11 = vcmp.eq.f32.partialorder %v6052_v8, %v5644_v10 }
 0x582   : > { %4031 = vmatprep.subr.msk.mxu1 %vm8132_vm8, %v5656_v56  ;;  %4096 = vmatpush2.msk.msra.mxu0 %vm8133_vm9, %v5639_v30  ;;  %vm8147_vm8 = vcmp.eq.f32.partialorder %v6096_v32, %v5687_v39  ;;  %vm8148_vm9 = vcmp.eq.f32.partialorder %v6096_v32, %v5684_v3 }
 0x583   : > { %4032 = vmatpush2.msk.msra.mxu1 %vm8134_vm2, %v5647_v61  ;;  %4097 = vmatprep.subr.msk.mxu0 %vm8135_vm15, %v5665_v60  ;;  %vm8149_vm2 = vcmp.eq.f32.partialorder %v6096_v32, %v5650_v18  ;;  %vm8150_vm15 = vcmp.eq.f32.partialorder %v6096_v32, %v5644_v10  ;;  %v8170_v32 = vmov 0.0  }
 0x584   : > { %4033 = vmatprep.subr.msk.mxu1 %vm8136_vm13, %v5656_v56  ;;  %4098 = vmatpush2.msk.msra.mxu0 %vm8137_vm1, %v5639_v30  ;;  %vm8151_vm13 = vcmp.eq.f32.partialorder %v6133_v36, %v5687_v39  ;;  %vm8152_vm1 = vcmp.eq.f32.partialorder %v6133_v36, %v5684_v3 }
 0x585   : > { %4034 = vmatpush2.msk.msra.mxu1 %vm8138_vm0, %v5647_v61  ;;  %4099 = vmatprep.subr.msk.mxu0 %vm8139_vm6, %v5665_v60  ;;  %vm8153_vm0 = vcmp.eq.f32.partialorder %v6133_v36, %v5650_v18  ;;  %vm8154_vm6 = vcmp.eq.f32.partialorder %v6133_v36, %v5644_v10 }
 0x586   : > { %4035 = vmatprep.subr.msk.mxu1 %vm8140_vm7, %v5656_v56  ;;  %4100 = vmatpush2.msk.msra.mxu0 %vm8141_vm4, %v5639_v30  ;;  %vm8155_vm7 = vcmp.eq.f32.partialorder %v6153_v6, %v5687_v39  ;;  %vm8156_vm4 = vcmp.eq.f32.partialorder %v6153_v6, %v5684_v3 }
 0x587   : > { %4036 = vmatpush2.msk.msra.mxu1 %vm8142_vm3, %v5647_v61  ;;  %4101 = vmatprep.subr.msk.mxu0 %vm8143_vm10, %v5665_v60  ;;  %vm8157_vm3 = vcmp.eq.f32.partialorder %v6153_v6, %v5650_v18  ;;  %vm8158_vm10 = vcmp.eq.f32.partialorder %v6153_v6, %v5644_v10 }
 0x588   : > { %4037 = vmatprep.subr.msk.mxu1 %vm8144_vm12, %v5656_v56  ;;  %4102 = vmatpush2.msk.msra.mxu0 %vm8145_vm14, %v5639_v30  ;;  %vm8159_vm12 = vcmp.eq.f32.partialorder %v6192_v59, %v5687_v39  ;;  %vm8160_vm14 = vcmp.eq.f32.partialorder %v6192_v59, %v5684_v3 }
 0x589   : > { %4038 = vmatpush2.msk.msra.mxu1 %vm8146_vm11, %v5647_v61  ;;  %4103 = vmatprep.subr.msk.mxu0 %vm8147_vm8, %v5665_v60  ;;  %vm8161_vm11 = vcmp.eq.f32.partialorder %v6192_v59, %v5650_v18  ;;  %vm8162_vm8 = vcmp.eq.f32.partialorder %v6192_v59, %v5644_v10 }
 0x58a   : > { %4039 = vmatprep.subr.msk.mxu1 %vm8148_vm9, %v5656_v56  ;;  %4104 = vmatpush2.msk.msra.mxu0 %vm8149_vm2, %v5639_v30  ;;  %vm8163_vm9 = vcmp.eq.f32.partialorder %v6249_v35, %v5687_v39  ;;  %vm8164_vm2 = vcmp.eq.f32.partialorder %v6249_v35, %v5684_v3  ;;  %v2993_v3 = vpop.permute.xlu0 %2992 }
 0x58b   : > { %4040 = vmatpush2.msk.msra.mxu1 %vm8150_vm15, %v5647_v61  ;;  %4105 = vmatprep.subr.msk.mxu0 %vm8151_vm13, %v5665_v60  ;;  %vm8165_vm15 = vcmp.eq.f32.partialorder %v6249_v35, %v5650_v18  ;;  %vm8166_vm13 = vcmp.eq.f32.partialorder %v6249_v35, %v5644_v10 }
 0x58c   : > { %4041 = vmatprep.subr.msk.mxu1 %vm8152_vm1, %v5656_v56  ;;  %4106 = vmatpush2.msk.msra.mxu0 %vm8153_vm0, %v5639_v30  ;;  %vm8167_vm1 = vcmp.eq.f32.partialorder %v6287_v47, %v5687_v39  ;;  %vm8168_vm0 = vcmp.eq.f32.partialorder %v6287_v47, %v5650_v18  ;;  %v2984_v39 = vpop.permute.xlu1 %2983 }
 0x58d   : > { %4042 = vmatpush2.msk.msra.mxu1 %vm8154_vm6, %v5647_v61  ;;  %4107 = vmatprep.subr.msk.mxu0 %vm8155_vm7, %v5665_v60  ;;  %vm8169_vm6 = vcmp.eq.f32.partialorder %v6287_v47, %v5644_v10 }
 0x58e   : > { %4043 = vmatprep.subr.msk.mxu1 %vm8156_vm4, %v5656_v56  ;;  %4108 = vmatpush2.msk.msra.mxu0 %vm8157_vm3, %v5639_v30  ;;  %v7216_v20 = vpop.permute.xlu0 %2959  ;;  %vm8173_vm4 = vcmask 908288  }
 0x58f   : > { %4044 = vmatpush2.msk.msra.mxu1 %vm8158_vm10, %v5647_v61  ;;  %4109 = vmatprep.subr.msk.mxu0 %vm8159_vm12, %v5665_v60  ;;  %vm8174_vm3 = vmmov %vm8173_vm4 }
 0x590   : > { %4045 = vmatprep.subr.msk.mxu1 %vm8160_vm14, %v5656_v56  ;;  %4110 = vmatpush2.msk.msra.mxu0 %vm8161_vm11, %v5639_v30  ;;  %v2995_v24 = vpop.permute.xlu1 %2994  ;;  %vm8177_vm14 = vcmask 1043456   ;;  %vm8178_vm11 = vcmask 7168  }
 0x591   : > { %4046 = vmatpush2.msk.msra.mxu1 %vm8162_vm8, %v5647_v61  ;;  %4111 = vmatprep.subr.msk.mxu0 %vm8163_vm9, %v5665_v60  ;;  %vm8179_vm8 = vcmask 1039360  }
 0x592   : > { %4047 = vmatprep.subr.msk.mxu1 %vm8164_vm2, %v5656_v56  ;;  %4112 = vmatpush2.msk.msra.mxu0 %vm8165_vm15, %v5639_v30  ;;  %vm8180_vm9 = vmmov %vm8179_vm8 }
 0x593   : > { %4048 = vmatpush2.msk.msra.mxu1 %vm8166_vm13, %v5647_v61  ;;  %4113 = vmatprep.subr.msk.mxu0 %vm8167_vm1, %v5665_v60  ;;  %v2779_v60 = vld [vmem:[%s7824_s9 + $0x8] sm:$0xff]  ;;  %vm8181_vm2 = vmmov %vm8177_vm14 }
 0x594   : > { %4049 = vmatprep.subr.msk.mxu1 %vm2253_vm5, %v5656_v56  ;;  %4114 = vmatpush2.msk.msra.mxu0 %vm8168_vm0, %v5639_v30  ;;  %v2781_v56 = vld [vmem:[%s7824_s9 + $0x18] sm:$0xff]  ;;  %vm8171_vm5 = vcmask 916480   ;;  %vm8182_vm15 = vmmov %vm8174_vm3  ;;  %vm8185_vm0 = vcmask 130048  }
 0x595   : > { %4050 = vmatpush2.msk.msra.mxu1 %vm8169_vm6, %v5647_v61  ;;  %2420 = vmatprep.mubr.f32.mxu1 %v5614_v40  ;;  %vm8172_vm7 = vmmov %vm8171_vm5 }
 0x596   : > { %2641 = vmatprep.mubr.f32.mxu0 %v5614_v40  ;;  %2421 = vmatmul.mubr.f32.vlgmr.msra.gmra.mxu1 %v4218_v0  ;;  %vm8175_vm10 = vmmov %vm8171_vm5 }
 0x597   : > { %2642 = vmatmul.mubr.f32.vlgmr.msra.gmra.mxu0 %v4218_v0  ;;  %2885 = vmatprep.mubr.f32.mxu1 %v8170_v32  ;;  %v2985_v33 = vsel %vm8175_vm10, %v2982_v54, %v2984_v39  ;;  %vm8176_vm12 = vmmov %vm8171_vm5 }
 0x598   : > { %v2989_v5 = vsel %vm8176_vm12, %v2984_v39, %v2982_v54  ;;  %vm8183_vm13 = vmmov %vm8174_vm3 }
 0x599   : > { %vm8184_vm1 = vmmov %vm8178_vm11 }
 0x59a   : > { %vm8186_vm6 = vmmov %vm8185_vm0 }
 0x59b   : > { %vm8194_vm10 = vmmov %vm8181_vm2 }
 0x59c   : > { %vm8195_vm12 = vmmov %vm8181_vm2 }
 0x615   : > { %v2130_v36 = vpop.f32.mrf.mxu1  ;;  %v2201_v59 = vpop.f32.mrf.mxu0 }
 0x616   : > { %v2202_v51 = vadd.f32 %v2201_v59, %v2130_v36  ;;  %v7232_v59 = vmul.f32 %v2985_v33, %v4849_v62 }
 0x617   : > { %v2132_v8 = vpop.f32.mrf.mxu1  ;;  %v2203_v45 = vpop.f32.mrf.mxu0 }
 0x618   : > { %v2204_v12 = vadd.f32 %v2203_v45, %v2132_v8 }
 0x656   : > { %v2422_v26 = vpop.f32.mrf.mxu1 }
 0x657   : > { %v2427_v16 = vadd.f32 %v2422_v26, %v2202_v51  ;;  %v2643_v44 = vpop.f32.mrf.mxu0  ;;  %v7239_v26 = vmul.f32 %v2989_v5, %v4837_v58 }
 0x658   : > { %v2424_v40 = vpop.f32.mrf.mxu1 }
 0x659   : > { %v7131_v30 = vadd.f32 %v2643_v44, %v2427_v16  ;;  %v2428_v10 = vadd.f32 %v2424_v40, %v2204_v12  ;;  %v2645_v61 = vpop.f32.mrf.mxu0  ;;  %v7242_v16 = vsel %vm8182_vm15, %v2993_v3, %v2995_v24  ;;  %v3000_v44 = vsel %vm8183_vm13, %v2995_v24, %v2993_v3  ;;  %vm8202_vm15 = vmmov %vm8181_vm2 }
 0x65a   : > { %vm8203_vm13 = vmmov %vm8181_vm2 }
 0x65b   : > { %2688 = vrot.lane.b32.xlu1 %v7131_v30, %s4386_s14  ;;  %2720 = vrot.lane.b32.xlu0 %v7131_v30, %s8016_s19  ;;  %v7149_v18 = vadd.f32 %v2645_v61, %v2428_v10 }
 0x65d   : > { %v2697_v61 = vmul.f32 %v7149_v18, %v4919_v23 }
 0x65f   : > { %2666 = vrot.lane.b32.xlu1 %v7131_v30, %s4388_s2  ;;  %2731 = vrot.lane.b32.xlu0 %v7131_v30, %s7886_s28 }
 0x663   : > { %2677 = vrot.lane.b32.xlu1 %v7131_v30, %s4387_s27  ;;  %2698 = vrot.lane.b32.xlu0 %v7131_v30, %s7888_s13 }
 0x667   : > { %2655 = vrot.lane.b32.xlu1 %v7131_v30, %s4389_s12  ;;  %2709 = vrot.lane.b32.xlu0 %v7131_v30, %s8017_s18 }
 0x66b   : > { %2722 = vrot.lane.b32.xlu1 %v7149_v18, %s8016_s19  ;;  %2970 = vrot.lane.b32.xlu0 %v7154_v31, %s8017_s18 }
 0x66f   : > { %2733 = vrot.lane.b32.xlu1 %v7149_v18, %s7886_s28  ;;  %2685 = vrot.lane.b32.xlu0 %v7149_v18, %s4386_s14  ;;  %s8226_s28 = sld [smem:[#allocation27_spill]] }
 0x673   : > { %2700 = vrot.lane.b32.xlu1 %v7149_v18, %s7888_s13  ;;  %2663 = vrot.lane.b32.xlu0 %v7149_v18, %s4388_s2 }
 0x677   : > { %2711 = vrot.lane.b32.xlu1 %v7149_v18, %s8017_s18  ;;  %2674 = vrot.lane.b32.xlu0 %v7149_v18, %s4387_s27 }
 0x67b   : > { %2961 = vrot.lane.b32.xlu1 %v4636_v4, %s7888_s13  ;;  %2651 = vrot.lane.b32.xlu0 %v7149_v18, %s4389_s12 }
 0x67f   : > { %2972 = vrot.lane.b32.xlu1 %v4636_v4, %s8017_s18  ;;  %2943 = vrot.lane.b32.xlu0 %v4636_v4, %s4386_s14 }
 0x683   : > { %2946 = vrot.lane.b32.xlu1 %v7154_v31, %s4386_s14  ;;  %2921 = vrot.lane.b32.xlu0 %v4636_v4, %s4388_s2 }
 0x687   : > { %2924 = vrot.lane.b32.xlu1 %v7154_v31, %s4388_s2  ;;  %2932 = vrot.lane.b32.xlu0 %v4636_v4, %s4387_s27 }
 0x68b   : > { %2935 = vrot.lane.b32.xlu1 %v7154_v31, %s4387_s27  ;;  %2910 = vrot.lane.b32.xlu0 %v4636_v4, %s4389_s12  ;;  %v3044_v4 = vld [vmem:[%s7826_s11 + $0x10] sm:$0xff] }
 0x68f   : > { %2913 = vrot.lane.b32.xlu1 %v7154_v31, %s4389_s12  ;;  %2799 = vperm.xlu0 %4210, %v2781_v56   ;;  %v2696_v56 = vmul.f32 %v7131_v30, %v4929_v28 }
 0x693   : > { %3063 = vperm.xlu1 %4211, %v3045_v53   ;;  %2794 = vperm.xlu0 %4210, %v2780_v17  }
 0x697   : > { %3058 = vperm.xlu1 %4211, %v3044_v4   ;;  %2789 = vperm.xlu0 %4210, %v2779_v60  }
 0x69b   : > { %3053 = vperm.xlu1 %4211, %v3043_v15   ;;  %2784 = vperm.xlu0 %4210, %v2778_v34  }
 0x69f   : > { %3048 = vperm.xlu1 %4211, %v3042_v7  }
 0x6cd   : > { %v2689_v25 = vpop.permute.xlu1 %2688  ;;  %v2721_v21 = vpop.permute.xlu0 %2720 }
 0x6d1   : > { %v2667_v11 = vpop.permute.xlu1 %2666  ;;  %v2732_v9 = vpop.permute.xlu0 %2731 }
 0x6d5   : > { %v2678_v63 = vpop.permute.xlu1 %2677  ;;  %v2699_v57 = vpop.permute.xlu0 %2698 }
 0x6d9   : > { %v2656_v29 = vpop.permute.xlu1 %2655  ;;  %v2710_v46 = vpop.permute.xlu0 %2709 }
 0x6dd   : > { %v2723_v14 = vpop.permute.xlu1 %2722  ;;  %v7218_v13 = vpop.permute.xlu0 %2970 }
 0x6de   : > { %v2724_v50 = vsel %vm8171_vm5, %v2721_v21, %v2723_v14  ;;  %v2728_v38 = vsel %vm8172_vm7, %v2723_v14, %v2721_v21  ;;  %vm8187_vm5 = vcmask 924672  }
 0x6df   : > { %v2729_v35 = vmul.f32 %v2724_v50, %v4849_v62  ;;  %v2730_v47 = vmul.f32 %v2728_v38, %v4837_v58  ;;  %vm8188_vm7 = vmmov %vm8187_vm5  ;;  %v8192_v50 = vld [vmem:[#allocation21_spill] sm:$0xff] }
 0x6e1   : > { %v2734_v55 = vpop.permute.xlu1 %2733  ;;  %v2686_v43 = vpop.permute.xlu0 %2685  ;;  %v2762_v12 = vrot.slane %v2729_v35, 4  ;;  %v2763_v53 = vrot.slane %v2730_v47, 4 }
 0x6e2   : > { %v2735_v52 = vsel %vm8173_vm4, %v2732_v9, %v2734_v55  ;;  %v2739_v27 = vsel %vm8174_vm3, %v2734_v55, %v2732_v9  ;;  %v2690_v8 = vsel %vm8178_vm11, %v2689_v25, %v2686_v43  ;;  %v2693_v17 = vsel %vm8184_vm1, %v2686_v43, %v2689_v25  ;;  %vm8204_vm1 = vmmov %vm8187_vm5 }
 0x6e3   : > { %v2740_v37 = vmul.f32 %v2735_v52, %v4811_v49  ;;  %v2741_v6 = vmul.f32 %v2739_v27, %v4806_v48  ;;  %v2695_v4 = vmul.f32 %v2690_v8, %v4960_v41  ;;  %vm8189_vm4 = vcmask 121856  }
 0x6e4   : > { %vm8190_vm3 = vmmov %vm8189_vm4  ;;  %v2694_v21 = vmul.f32 %v2693_v17, %v4963_v42  ;;  %vm8198_vm11 = vcmask 138240  }
 0x6e5   : > { %v2701_v0 = vpop.permute.xlu1 %2700  ;;  %4115 = vmatprep.subr.msk.mxu1 %vm8177_vm14, %v2741_v6  ;;  %v2664_v36 = vpop.permute.xlu0 %2663  ;;  %vm8197_vm14 = vmmov %vm8179_vm8  ;;  %v2751_v47 = vrot.slane %v2695_v4, 4 }
 0x6e6   : > { %v2702_v51 = vsel %vm8179_vm8, %v2699_v57, %v2701_v0  ;;  %v2706_v45 = vsel %vm8180_vm9, %v2701_v0, %v2699_v57  ;;  %4116 = vmatpush1.msk.msra.mxu1 %vm8181_vm2, %v2740_v37  ;;  %v2671_v60 = vsel %vm8185_vm0, %v2664_v36, %v2667_v11  ;;  %v2668_v7 = vsel %vm8186_vm6, %v2667_v11, %v2664_v36  ;;  %v8191_v57 = vld [vmem:[#allocation22_spill] sm:$0xff]  ;;  %v8196_v37 = vld [vmem:[#allocation20_spill] sm:$0xff]  ;;  %vm8199_vm8 = vmmov %vm8198_vm11 }
 0x6e7   : > { %v2708_v40 = vmul.f32 %v2706_v45, %v4909_v19  ;;  %v2707_v10 = vmul.f32 %v2702_v51, %v4914_v22  ;;  %v2672_v14 = vmul.f32 %v2671_v60, %v8191_v57  ;;  %v2956_v11 = vcombine.low %v4929_v28, %v4919_v23  ;;  %v8200_v36 = vld [vmem:[#allocation23_spill] sm:$0xff]  ;;  %vm8205_vm0 = vmmov %vm8204_vm1 }
 0x6e8   : > { %v2673_v55 = vmul.f32 %v2668_v7, %v8192_v50  ;;  %v2750_v45 = vrot.slane %v2694_v21, 4  ;;  %vm8206_vm6 = vmmov %vm8181_vm2 }
 0x6e9   : > { %v2712_v15 = vpop.permute.xlu1 %2711  ;;  %v2675_v34 = vpop.permute.xlu0 %2674  ;;  %v2757_v39 = vrot.slane %v2708_v40, 4  ;;  %v2756_v9 = vrot.slane %v2707_v10, 4  ;;  %v8201_v40 = vld [vmem:[#allocation24_spill] sm:$0xff]  ;;  %v2744_v17 = vrot.slane %v2672_v14, 4 }
 0x6ea   : > { %v2713_v54 = vsel %vm8187_vm5, %v2710_v46, %v2712_v15  ;;  %v2717_v3 = vsel %vm8188_vm7, %v2712_v15, %v2710_v46  ;;  %v2679_v18 = vsel %vm8189_vm4, %v2678_v63, %v2675_v34  ;;  %v2682_v25 = vsel %vm8190_vm3, %v2675_v34, %v2678_v63  ;;  %v8193_v46 = vld [vmem:[#allocation19_spill] sm:$0xff]  ;;  %vm8207_vm5 = vmmov %vm8181_vm2 }
 0x6eb   : > { %v2718_v30 = vmul.f32 %v2713_v54, %v4867_v2  ;;  %v2719_v24 = vmul.f32 %v2717_v3, %v4862_v1  ;;  %v2684_v43 = vmul.f32 %v2679_v18, %v8193_v46  ;;  %v2683_v63 = vmul.f32 %v2682_v25, %v8196_v37  ;;  %v2774_v3 = vld [vmem:[%s7823_s8] sm:$0xff]  ;;  %vm8208_vm4 = vmmov %vm8181_vm2 }
 0x6ec   : > { %v2771_v51 = vsel %vm8181_vm2, %v2697_v61, %v2757_v39  ;;  %v2770_v10 = vsel %vm8202_vm15, %v2696_v56, %v2756_v9  ;;  %vm2802_vm7 = vcmask 293888   ;;  %v3002_v18 = vmul.f32 %v3000_v44, %v4806_v48  ;;  %vm8209_vm3 = vmmov %vm8181_vm2 }
 0x6ed   : > { %v2962_v38 = vpop.permute.xlu1 %2961  ;;  %v2652_v52 = vpop.permute.xlu0 %2651  ;;  %v2773_v27 = vsel %vm8194_vm10, %v2719_v24, %v2763_v53  ;;  %v2772_v33 = vsel %vm8195_vm12, %v2718_v30, %v2762_v12  ;;  %v2958_v53 = vmul.f32 %v7154_v31, %v2956_v11  ;;  %v2768_v31 = vsel %vm8206_vm6, %v2683_v63, %v2750_v45  ;;  %vm8220_vm6 = vmmov %vm8181_vm2 }
 0x6ee   : > { %v2967_v6 = vsel %vm8197_vm14, %v2962_v38, %v7216_v20  ;;  %v2657_v5 = vsel %vm8198_vm11, %v2656_v29, %v2652_v52  ;;  %v2660_v35 = vsel %vm8199_vm8, %v2652_v52, %v2656_v29  ;;  %2845 = vmatprep.subr.mxu1 %v2773_v27  ;;  %v2963_v0 = vsel %vm8180_vm9, %v7216_v20, %v2962_v38  ;;  %vm8212_vm14 = vmmov %vm8181_vm2 }
 0x6ef   : > { %v2662_v8 = vmul.f32 %v2657_v5, %v8200_v36  ;;  %2846 = vmatpush1.msra.mxu1 %v2772_v33  ;;  %v2661_v12 = vmul.f32 %v2660_v35, %v8201_v40  ;;  %v2745_v29 = vrot.slane %v2673_v55, 4  ;;  %v2969_v4 = vmul.f32 %v2967_v6, %v4909_v19  ;;  %vm8213_vm11 = vmmov %vm8181_vm2  ;;  %v2776_v5 = vld [vmem:[%s7823_s8 + $0x10] sm:$0xff] }
 0x6f0   : > { %2847 = vmatprep.subr.mxu1 %v2771_v51  ;;  %v2769_v20 = vsel %vm8203_vm13, %v2684_v43, %v2751_v47  ;;  %v2968_v34 = vmul.f32 %v2963_v0, %v4914_v22  ;;  %v3027_v30 = vrot.slane %v7239_v26, 4  ;;  %v3001_v24 = vmul.f32 %v7242_v16, %v4811_v49  ;;  %v2775_v16 = vld [vmem:[%s7823_s8 + $0x8] sm:$0xff]  ;;  %vm8214_vm8 = vmmov %vm8181_vm2 }
 0x6f1   : > { %v2973_v60 = vpop.permute.xlu1 %2972  ;;  %2848 = vmatpush1.msra.mxu1 %v2770_v10  ;;  %v2944_v15 = vpop.permute.xlu0 %2943  ;;  %v2767_v54 = vsel %vm8207_vm5, %v2662_v8, %v2745_v29  ;;  %v3021_v25 = vrot.slane %v2969_v4, 4  ;;  %v3016_v14 = vcombine.high %v2958_v53, %v2958_v53  ;;  %v3026_v11 = vrot.slane %v7232_v59, 4  ;;  %vm8215_vm9 = vmmov %vm8181_vm2 }
 0x6f2   : > { %v2974_v61 = vsel %vm8204_vm1, %v7218_v13, %v2973_v60  ;;  %v2978_v7 = vsel %vm8205_vm0, %v2973_v60, %v7218_v13  ;;  %2849 = vmatprep.subr.mxu1 %v2769_v20  ;;  %v2766_v13 = vsel %vm8208_vm4, %v2661_v12, %v2744_v17  ;;  %v3020_v55 = vrot.slane %v2968_v34, 4  ;;  %v2777_v60 = vld [vmem:[%s7823_s8 + $0x18] sm:$0xff]  ;;  %vm8221_vm5 = vmmov %vm8181_vm2 }
 0x6f3   : > { %v2980_v56 = vmul.f32 %v2978_v7, %v4862_v1  ;;  %2850 = vmatpush1.msra.mxu1 %v2768_v31  ;;  %v2979_v39 = vmul.f32 %v2974_v61, %v4867_v2  ;;  %vm8210_vm10 = vcmask 7168   ;;  %v3035_v52 = vsel %vm8215_vm9, %v3016_v14, %v3021_v25  ;;  %v3041_v25 = vld [vmem:[%s8226_s28 + $0x18] sm:$0xff] }
 0x6f4   : > { %2851 = vmatprep.subr.mxu1 %v2767_v54  ;;  %vm8211_vm12 = vmmov %vm8210_vm10  ;;  %v3034_v6 = vsel %vm8181_vm2, %v2958_v53, %v3020_v55  ;;  %vm8216_vm15 = vcmask 130048   ;;  %vm8218_vm1 = vcmask 121856   ;;  %vm8222_vm4 = vcmask 138240  }
 0x6f5   : > { %v2947_v21 = vpop.permute.xlu1 %2946  ;;  %2852 = vmatpush1.msra.mxu1 %v2766_v13  ;;  %v2922_v9 = vpop.permute.xlu0 %2921  ;;  %v3037_v26 = vsel %vm8213_vm11, %v2980_v56, %v3027_v30  ;;  %v3036_v59 = vsel %vm8214_vm8, %v2979_v39, %v3026_v11  ;;  %vm8217_vm13 = vmmov %vm8216_vm15  ;;  %v3038_v13 = vld [vmem:[%s8226_s28] sm:$0xff]  ;;  %v3039_v30 = vld [vmem:[%s8226_s28 + $0x8] sm:$0xff] }
 0x6f6   : > { %4117 = vmatmul.mubr.msk.f32.vlgmr.msra.gmra.mxu1 %vm2802_vm7, %v2774_v3  ;;  %4121 = vmatprep.subr.msk.mxu1 %vm8209_vm3, %v3002_v18  ;;  %v2948_v44 = vsel %vm8210_vm10, %v2947_v21, %v2944_v15  ;;  %v2951_v43 = vsel %vm8211_vm12, %v2944_v15, %v2947_v21  ;;  %vm8219_vm0 = vmmov %vm8218_vm1 }
 0x6f7   : > { %4122 = vmatpush1.msk.msra.mxu1 %vm8212_vm14, %v3001_v24  ;;  %2891 = vmatprep.mubr.f32.mxu1 %v8170_v32  ;;  %v2952_v33 = vmul.f32 %v2951_v43, %v4963_v42  ;;  %v2953_v63 = vmul.f32 %v2948_v44, %v4960_v41  ;;  %vm8223_vm3 = vmmov %vm8222_vm4  ;;  %v3040_v24 = vld [vmem:[%s8226_s28 + $0x10] sm:$0xff] }
 0x6f8   : > { %3108 = vmatprep.subr.mxu1 %v3037_v26  ;;  %vm8224_vm10 = vmmov %vm8181_vm2 }
 0x6f9   : > { %v2925_v38 = vpop.permute.xlu1 %2924  ;;  %3109 = vmatpush1.msra.mxu1 %v3036_v59  ;;  %v2933_v27 = vpop.permute.xlu0 %2932  ;;  %v3011_v8 = vrot.slane %v2952_v33, 4  ;;  %v3012_v51 = vrot.slane %v2953_v63, 4  ;;  %vm8225_vm12 = vmmov %vm8181_vm2 }
 0x6fa   : > { %4118 = vmatmul.mubr.msk.f32.gmra.mxu1 %vm2802_vm7, %v2775_v16  ;;  %3110 = vmatprep.subr.mxu1 %v3035_v52  ;;  %v2926_v35 = vsel %vm8216_vm15, %v2925_v38, %v2922_v9  ;;  %v2929_v47 = vsel %vm8217_vm13, %v2922_v9, %v2925_v38  ;;  %vm8239_vm11 = vmmov %vm8219_vm0 }
 0x6fb   : > { %3111 = vmatpush1.msra.mxu1 %v3034_v6  ;;  %2897 = vmatprep.mubr.f32.mxu1 %v8170_v32  ;;  %v2930_v10 = vmul.f32 %v2929_v47, %v8191_v57  ;;  %v2931_v53 = vmul.f32 %v2926_v35, %v8192_v50  ;;  %vm8240_vm8 = vmmov %vm8219_vm0 }
 0x6fc   : > { %vm8241_vm9 = vmmov %vm8217_vm13 }
 0x6fd   : > { %v2936_v0 = vpop.permute.xlu1 %2935  ;;  %v2911_v4 = vpop.permute.xlu0 %2910  ;;  %v3005_v31 = vrot.slane %v2930_v10, 4  ;;  %v3006_v56 = vrot.slane %v2931_v53, 4  ;;  %vm8242_vm2 = vmmov %vm8241_vm9 }
 0x6fe   : > { %v2937_v45 = vsel %vm8218_vm1, %v2936_v0, %v2933_v27  ;;  %v2940_v12 = vsel %vm8219_vm0, %v2933_v27, %v2936_v0  ;;  %4119 = vmatmul.mubr.msk.f32.gmra.mxu1 %vm2802_vm7, %v2776_v5  ;;  %vm8244_vm15 = vmmov %vm8223_vm3  ;;  %vm8246_vm1 = vcmask 916480  }
 0x6ff   : > { %v2941_v17 = vmul.f32 %v2940_v12, %v8196_v37  ;;  %v2942_v29 = vmul.f32 %v2937_v45, %v8193_v46  ;;  %2903 = vmatprep.mubr.f32.mxu1 %v8170_v32  ;;  %vm8245_vm13 = vmmov %vm8223_vm3 }
 0x700   : > { %vm8247_vm0 = vmmov %vm8246_vm1 }
 0x701   : > { %v2914_v20 = vpop.permute.xlu1 %2913  ;;  %v3033_v15 = vsel %vm8220_vm6, %v2942_v29, %v3012_v51  ;;  %v3032_v34 = vsel %vm8221_vm5, %v2941_v17, %v3011_v8 }
 0x702   : > { %v2915_v61 = vsel %vm8222_vm4, %v2914_v20, %v2911_v4  ;;  %v2918_v7 = vsel %vm8223_vm3, %v2911_v4, %v2914_v20  ;;  %4120 = vmatmul.mubr.msk.f32.gmra.mxu1 %vm2802_vm7, %v2777_v60  ;;  %3112 = vmatprep.subr.mxu1 %v3033_v15 }
 0x703   : > { %v2919_v54 = vmul.f32 %v2918_v7, %v8201_v40  ;;  %v2920_v3 = vmul.f32 %v2915_v61, %v8200_v36  ;;  %3113 = vmatpush1.msra.mxu1 %v3032_v34  ;;  %3148 = vmatprep.mubr.f32.mxu1 %v8170_v32 }
 0x705   : > { %v3031_v18 = vsel %vm8224_vm10, %v2920_v3, %v3006_v56  ;;  %v3030_v39 = vsel %vm8225_vm12, %v2919_v54, %v3005_v31 }
 0x706   : > { %3114 = vmatprep.subr.mxu1 %v3031_v18 }
 0x707   : > { %3115 = vmatpush1.msra.mxu1 %v3030_v39 }
 0x708   : > { %4123 = vmatmul.mubr.msk.f32.vlgmr.msra.gmra.mxu1 %vm2802_vm7, %v3038_v13 }
 0x709   : > { %3154 = vmatprep.mubr.f32.mxu1 %v8170_v32 }
 0x70a   : > { %v7364_v21 = vpop.permute.xlu0 %2799 }
 0x70c   : > { %4124 = vmatmul.mubr.msk.f32.gmra.mxu1 %vm2802_vm7, %v3039_v30 }
 0x70d   : > { %3160 = vmatprep.mubr.f32.mxu1 %v8170_v32 }
 0x70e   : > { %v7366_v9 = vpop.permute.xlu1 %3063  ;;  %v2795_v44 = vpop.permute.xlu0 %2794 }
 0x710   : > { %4125 = vmatmul.mubr.msk.f32.gmra.mxu1 %vm2802_vm7, %v3040_v24 }
 0x711   : > { %3166 = vmatprep.mubr.f32.mxu1 %v8170_v32 }
 0x712   : > { %v3059_v43 = vpop.permute.xlu1 %3058  ;;  %v2790_v38 = vpop.permute.xlu0 %2789 }
 0x714   : > { %4126 = vmatmul.mubr.msk.f32.gmra.mxu1 %vm2802_vm7, %v3041_v25  ;;  %vm8237_vm7 = vcmask 7168  }
 0x715   : > { %3707 = vmatprep.mubr.f32.mxu1 %v8170_v32  ;;  %vm8238_vm14 = vmmov %vm8237_vm7 }
 0x716   : > { %v3054_v52 = vpop.permute.xlu1 %3053  ;;  %v2785_v63 = vpop.permute.xlu0 %2784  ;;  %vm8248_vm6 = vmmov %vm8237_vm7 }
 0x717   : > { %vm8249_vm5 = vmmov %vm8248_vm6 }
 0x718   : > { %vm8250_vm4 = vmmov %vm8249_vm5 }
 0x719   : > { %vm8251_vm3 = vmmov %vm8250_vm4 }
 0x71a   : > { %v3049_v6 = vpop.permute.xlu1 %3048  ;;  %vm8252_vm10 = vmmov %vm8251_vm3 }
 0x71b   : > { %vm8253_vm12 = vmmov %vm8251_vm3 }
 0x7b6   : > { %v2887_v14 = vpop.f32.mrf.mxu1 }
 0x7b7   : > { %v2888_v5 = vadd.f32 %v2887_v14, %v2785_v63 }
 0x7b8   : > { %v2889_v11 = vpop.f32.mrf.mxu1 }
 0x7b9   : > { %v2890_v0 = vadd.f32 %v2889_v11, %v2785_v63 }
 0x7ba   : > { %v2893_v55 = vpop.f32.mrf.mxu1 }
 0x7bb   : > { %v2894_v29 = vadd.f32 %v2893_v55, %v2790_v38 }
 0x7bc   : > { %v2895_v26 = vpop.f32.mrf.mxu1 }
 0x7bd   : > { %v2896_v15 = vadd.f32 %v2895_v26, %v2790_v38 }
 0x7be   : > { %v2899_v16 = vpop.f32.mrf.mxu1 }
 0x7bf   : > { %v2900_v54 = vadd.f32 %v2899_v16, %v2795_v44 }
 0x7c0   : > { %v2901_v59 = vpop.f32.mrf.mxu1 }
 0x7c1   : > { %v2902_v13 = vadd.f32 %v2901_v59, %v2795_v44 }
 0x7c2   : > { %v2905_v27 = vpop.f32.mrf.mxu1 }
 0x7c3   : > { %v2906_v55 = vadd.f32 %v2905_v27, %v7364_v21 }
 0x7c4   : > { %v7368_v33 = vpop.f32.mrf.mxu1 }
 0x7c5   : > { %v2908_v16 = vadd.f32 %v7368_v33, %v7364_v21 }
 0x7c8   : > { %v3150_v32 = vpop.f32.mrf.mxu1 }
 0x7c9   : > { %v3151_v35 = vadd.f32 %v3150_v32, %v3049_v6 }
 0x7ca   : > { %v3152_v47 = vpop.f32.mrf.mxu1 }
 0x7cb   : > { %v3173_v8 = vadd.f32 %v3151_v35, %v2888_v5  ;;  %v3153_v51 = vadd.f32 %v3152_v47, %v3049_v6 }
 0x7cc   : > { %v3156_v53 = vpop.f32.mrf.mxu1 }
 0x7cd   : > { %v7370_v45 = vmax.f32 %v3173_v8, 0.0  ;;  %v3174_v12 = vadd.f32 %v3153_v51, %v2890_v0  ;;  %v3157_v17 = vadd.f32 %v3156_v53, %v3054_v52 }
 0x7ce   : > { %v3158_v4 = vpop.f32.mrf.mxu1 }
 0x7cf   : > { %8227 = vst [vmem:[#allocation22_spill] sm:$0xff] %v7370_v45  ;;  %v7372_v10 = vmax.f32 %v3174_v12, 0.0  ;;  %3341 = vrot.lane.b32.xlu1 %v7370_v45, %s4386_s14  ;;  %v3175_v60 = vadd.f32 %v3157_v17, %v2894_v29  ;;  %v3159_v20 = vadd.f32 %v3158_v4, %v3054_v52  ;;  %v3559_v17 = vld [vmem:[%s8243_s21] sm:$0xf]  ;;  %s4306_s21 = sshll.u32 %s4391_s24, 4  ;;  %s4307_s21 = int_to_ptr.vmem [resolvable:$false] %s4306_s21 }
 0x7d0   : > { %v3162_v31 = vpop.f32.mrf.mxu1  ;;  %s4308_s17 = scalar_lea.vmem %s4307_s21, 256  ;;  %p4309_p13 = scmp.lt.s32.totalorder %s3735_s22, %s4307_s21 }
 0x7d1   : > { %8228 = vst [vmem:[#allocation21_spill] sm:$0xff] %v7372_v10  ;;  %3329 = vrot.lane.b32.xlu0 %v7372_v10, %s4386_s14  ;;  %v7388_v34 = vmax.f32 %v3175_v60, 0.0  ;;  %v3176_v61 = vadd.f32 %v3159_v20, %v2896_v15  ;;  %v3163_v56 = vadd.f32 %v3162_v31, %v3059_v43 }
 0x7d2   : > { %v3164_v3 = vpop.f32.mrf.mxu1 }
 0x7d3   : > { %3297 = vrot.lane.b32.xlu1 %v7370_v45, %s4387_s27  ;;  %8229 = vst [vmem:[#allocation19_spill] sm:$0xff] %v7388_v34  ;;  %v7396_v7 = vmax.f32 %v3176_v61, 0.0  ;;  %v3177_v18 = vadd.f32 %v3163_v56, %v2900_v54  ;;  %v3165_v39 = vadd.f32 %v3164_v3, %v3059_v43 }
 0x7d4   : > { %v3168_v14 = vpop.f32.mrf.mxu1 }
 0x7d5   : > { %3285 = vrot.lane.b32.xlu0 %v7372_v10, %s4387_s27  ;;  %8230 = vst [vmem:[#allocation20_spill] sm:$0xff] %v7396_v7  ;;  %v7412_v30 = vmax.f32 %v3177_v18, 0.0  ;;  %v3178_v24 = vadd.f32 %v3165_v39, %v2902_v13  ;;  %v3169_v11 = vadd.f32 %v3168_v14, %v7366_v9 }
 0x7d6   : > { %v3170_v44 = vpop.f32.mrf.mxu1 }
 0x7d7   : > { %3253 = vrot.lane.b32.xlu1 %v7370_v45, %s4388_s2  ;;  %8231 = vst [vmem:[#allocation23_spill] sm:$0xff] %v7412_v30  ;;  %v7420_v25 = vmax.f32 %v3178_v24, 0.0  ;;  %v3179_v43 = vadd.f32 %v3169_v11, %v2906_v55  ;;  %v3171_v26 = vadd.f32 %v3170_v44, %v7366_v9 }
 0x7d9   : > { %3241 = vrot.lane.b32.xlu0 %v7372_v10, %s4388_s2  ;;  %8232 = vst [vmem:[#allocation24_spill] sm:$0xff] %v7420_v25  ;;  %v7441_v59 = vmax.f32 %v3179_v43, 0.0  ;;  %v3180_v38 = vadd.f32 %v3171_v26, %v2908_v16 }
 0x7db   : > { %3209 = vrot.lane.b32.xlu1 %v7370_v45, %s4389_s12  ;;  %v7449_v52 = vmax.f32 %v3180_v38, 0.0 }
 0x7dd   : > { %3193 = vrot.lane.b32.xlu0 %v7372_v10, %s4389_s12 }
 0x7df   : > { %3343 = vrot.lane.b32.xlu1 %v7388_v34, %s4386_s14 }
 0x7e1   : > { %3473 = vrot.lane.b32.xlu0 %v7388_v34, %s8016_s19 }
 0x7e3   : > { %3299 = vrot.lane.b32.xlu1 %v7388_v34, %s4387_s27 }
 0x7e5   : > { %3331 = vrot.lane.b32.xlu0 %v7396_v7, %s4386_s14 }
 0x7e7   : > { %3255 = vrot.lane.b32.xlu1 %v7388_v34, %s4388_s2 }
 0x7e9   : > { %3287 = vrot.lane.b32.xlu0 %v7396_v7, %s4387_s27 }
 0x7eb   : > { %3211 = vrot.lane.b32.xlu1 %v7388_v34, %s4389_s12 }
 0x7ed   : > { %3243 = vrot.lane.b32.xlu0 %v7396_v7, %s4388_s2 }
 0x7ef   : > { %3475 = vrot.lane.b32.xlu1 %v7396_v7, %s8016_s19 }
 0x7f1   : > { %3195 = vrot.lane.b32.xlu0 %v7396_v7, %s4389_s12 }
 0x7f3   : > { %3345 = vrot.lane.b32.xlu1 %v7412_v30, %s4386_s14 }
 0x7f5   : > { %3477 = vrot.lane.b32.xlu0 %v7412_v30, %s8016_s19 }
 0x7f7   : > { %3301 = vrot.lane.b32.xlu1 %v7412_v30, %s4387_s27 }
 0x7f9   : > { %3333 = vrot.lane.b32.xlu0 %v7420_v25, %s4386_s14 }
 0x7fb   : > { %3257 = vrot.lane.b32.xlu1 %v7412_v30, %s4388_s2 }
 0x7fd   : > { %3289 = vrot.lane.b32.xlu0 %v7420_v25, %s4387_s27 }
 0x7ff   : > { %3213 = vrot.lane.b32.xlu1 %v7412_v30, %s4389_s12 }
 0x801   : > { %3245 = vrot.lane.b32.xlu0 %v7420_v25, %s4388_s2 }
 0x803   : > { %3479 = vrot.lane.b32.xlu1 %v7420_v25, %s8016_s19 }
 0x805   : > { %3197 = vrot.lane.b32.xlu0 %v7420_v25, %s4389_s12 }
 0x807   : > { %3347 = vrot.lane.b32.xlu1 %v7441_v59, %s4386_s14 }
 0x809   : > { %3481 = vrot.lane.b32.xlu0 %v7441_v59, %s8016_s19 }
 0x80b   : > { %3303 = vrot.lane.b32.xlu1 %v7441_v59, %s4387_s27 }
 0x80d   : > { %3335 = vrot.lane.b32.xlu0 %v7449_v52, %s4386_s14  ;;  %s8233_s14 = smov 127  }
 0x80f   : > { %3259 = vrot.lane.b32.xlu1 %v7441_v59, %s4388_s2 }
 0x811   : > { %3469 = vrot.lane.b32.xlu0 %v7370_v45, %s8016_s19 }
 0x813   : > { %3215 = vrot.lane.b32.xlu1 %v7441_v59, %s4389_s12 }
 0x815   : > { %3291 = vrot.lane.b32.xlu0 %v7449_v52, %s4387_s27  ;;  %s8234_s27 = smov 111  }
 0x817   : > { %3471 = vrot.lane.b32.xlu1 %v7372_v10, %s8016_s19 }
 0x819   : > { %3437 = vrot.lane.b32.xlu0 %v7441_v59, %s8017_s18 }
 0x81b   : > { %3435 = vrot.lane.b32.xlu1 %v7420_v25, %s8017_s18 }
 0x81d   : > { %3247 = vrot.lane.b32.xlu0 %v7449_v52, %s4388_s2 }
 0x81f   : > { %3431 = vrot.lane.b32.xlu1 %v7396_v7, %s8017_s18 }
 0x821   : > { %3433 = vrot.lane.b32.xlu0 %v7412_v30, %s8017_s18 }
 0x823   : > { %3427 = vrot.lane.b32.xlu1 %v7372_v10, %s8017_s18 }
 0x825   : > { %3199 = vrot.lane.b32.xlu0 %v7449_v52, %s4389_s12  ;;  %s3720_s12 = scalar_lea.sflag [#allocation4], %s4608_s29 }
 0x827   : > { %3391 = vrot.lane.b32.xlu1 %v7420_v25, %s8233_s14 }
 0x829   : > { %3429 = vrot.lane.b32.xlu0 %v7388_v34, %s8017_s18 }
 0x82b   : > { %3483 = vrot.lane.b32.xlu1 %v7449_v52, %s8016_s19  ;;  %s8235_s19 = sld [smem:[#allocation28_spill]] }
 0x82d   : > { %3425 = vrot.lane.b32.xlu0 %v7370_v45, %s8017_s18 }
 0x82f   : > { %3387 = vrot.lane.b32.xlu1 %v7396_v7, %s8233_s14 }
 0x831   : > { %3393 = vrot.lane.b32.xlu0 %v7441_v59, %s8233_s14  ;;  %v7510_v9 = vld [vmem:[%s8235_s19] sm:$0xff] }
 0x832   : > { %8236 = vst [vmem:[#allocation25_spill] sm:$0xff] %v7510_v9  ;;  %v3567_v33 = vcombine.high %v7510_v9, %v7510_v9 }
 0x833   : > { %3439 = vrot.lane.b32.xlu1 %v7449_v52, %s8017_s18  ;;  %s4302_s18 = scalar_lea.vmem %s3735_s22, 128 }
 0x834   : > { %3636 = vmatprep.mubr.f32.mxu0 %v3567_v33  ;;  %p4303_p3 = scmp.ne.s32.totalorder %s3735_s22, %s4302_s18  ;;  %p4310_p0 = scmp.lt.s32.totalorder %s4308_s17, %s4302_s18 }
 0x835   : > { %3389 = vrot.lane.b32.xlu0 %v7412_v30, %s8233_s14 }
 0x836   : > { %p4304_p10 = pnand %p4303_p3, %p8311_p12  ;;  %p4311_p5 = por %p4310_p0, %p4309_p13 }
 0x837   : > { %3383 = vrot.lane.b32.xlu1 %v7372_v10, %s8233_s14 }
 0x838   : > { %p4305_p2 = pneg %p4304_p10 }
 0x839   : > { %3385 = vrot.lane.b32.xlu0 %v7388_v34, %s8233_s14 }
 0x83a   : > { %p4312_p9 = pnand %p4311_p5, %p4305_p2 }
 0x83b   : > { %3395 = vrot.lane.b32.xlu1 %v7449_v52, %s8233_s14 }
 0x83d   : > { %3381 = vrot.lane.b32.xlu0 %v7370_v45, %s8233_s14 }
 0x83f   : > { %3523 = vrot.lane.b32.xlu1 %v7420_v25, %s8234_s27 }
 0x841   : > { %3525 = vrot.lane.b32.xlu0 %v7441_v59, %s8234_s27  ;;  %v3342_v21 = vpop.permute.xlu1 %3341 }
 0x843   : > { %v3330_v27 = vpop.permute.xlu0 %3329  ;;  %3527 = vrot.lane.b32.xlu1 %v7449_v52, %s8234_s27 }
 0x844   : > { %v7517_v63 = vsel %vm8237_vm7, %v3342_v21, %v3330_v27  ;;  %v7520_v6 = vsel %vm8238_vm14, %v3330_v27, %v3342_v21  ;;  %vm8254_vm7 = vmmov %vm8240_vm8 }
 0x845   : > { %3521 = vrot.lane.b32.xlu0 %v7412_v30, %s8234_s27  ;;  %v3298_v32 = vpop.permute.xlu1 %3297  ;;  %vm8255_vm14 = vmmov %vm8254_vm7 }
 0x847   : > { %v3286_v5 = vpop.permute.xlu0 %3285  ;;  %3519 = vrot.lane.b32.xlu1 %v7396_v7, %s8234_s27 }
 0x848   : > { %v7527_v35 = vsel %vm8239_vm11, %v3298_v32, %v3286_v5  ;;  %v7530_v47 = vsel %vm8240_vm8, %v3286_v5, %v3298_v32  ;;  %vm8256_vm11 = vmmov %vm8254_vm7 }
 0x849   : > { %3517 = vrot.lane.b32.xlu0 %v7388_v34, %s8234_s27  ;;  %v3254_v0 = vpop.permute.xlu1 %3253  ;;  %vm8257_vm8 = vmmov %vm8254_vm7 }
 0x84b   : > { %v3242_v8 = vpop.permute.xlu0 %3241  ;;  %3515 = vrot.lane.b32.xlu1 %v7372_v10, %s8234_s27 }
 0x84c   : > { %v7537_v51 = vsel %vm8241_vm9, %v3254_v0, %v3242_v8  ;;  %v7540_v12 = vsel %vm8242_vm2, %v3242_v8, %v3254_v0  ;;  %vm8258_vm9 = vmmov %vm8254_vm7 }
 0x84d   : > { %3513 = vrot.lane.b32.xlu0 %v7370_v45, %s8234_s27  ;;  %v3210_v53 = vpop.permute.xlu1 %3209  ;;  %vm8259_vm2 = vmmov %vm8254_vm7  ;;  %s8310_s27 = sld [smem:[#allocation30_spill]] }
 0x84f   : > { %v3194_v29 = vpop.permute.xlu0 %3193 }
 0x850   : > { %v7548_v4 = vsel %vm8244_vm15, %v3210_v53, %v3194_v29  ;;  %v7551_v60 = vsel %vm8245_vm13, %v3194_v29, %v3210_v53  ;;  %vm8260_vm15 = vcmask 130048  }
 0x851   : > { %3562 = vperm.xlu0 %4210, %v3559_v17   ;;  %v3344_v20 = vpop.permute.xlu1 %3343  ;;  %vm8261_vm13 = vmmov %vm8260_vm15 }
 0x853   : > { %v3474_v15 = vpop.permute.xlu0 %3473  ;;  %s3732_s2 = scalar_lea.hbm %s8310_s27, %s4135_s25 }
 0x855   : > { %v3300_v61 = vpop.permute.xlu1 %3299 }
 0x857   : > { %v3332_v31 = vpop.permute.xlu0 %3331 }
 0x858   : > { %v3350_v10 = vsel %vm8252_vm10, %v3344_v20, %v3332_v31  ;;  %v3362_v34 = vsel %vm8253_vm12, %v3332_v31, %v3344_v20  ;;  %v3365_v20 = vmul.f32 %v7520_v6, %v4963_v42 }
 0x859   : > { %v7553_v56 = vpop.permute.xlu1 %3255 }
 0x85b   : > { %v3288_v54 = vpop.permute.xlu0 %3287 }
 0x85d   : > { %v7555_v3 = vpop.permute.xlu1 %3211 }
 0x85f   : > { %v7557_v18 = vpop.permute.xlu0 %3243 }
 0x861   : > { %v3476_v39 = vpop.permute.xlu1 %3475 }
 0x862   : > { %v7560_v13 = vsel %vm8246_vm1, %v3474_v15, %v3476_v39  ;;  %v7563_v24 = vsel %vm8247_vm0, %v3476_v39, %v3474_v15  ;;  %vm8262_vm1 = vmmov %vm8261_vm13 }
 0x863   : > { %v7565_v14 = vpop.permute.xlu0 %3195  ;;  %vm8263_vm0 = vmmov %vm8262_vm1 }
 0x865   : > { %v3346_v11 = vpop.permute.xlu1 %3345 }
 0x867   : > { %v7567_v55 = vpop.permute.xlu0 %3477 }
 0x869   : > { %v3302_v44 = vpop.permute.xlu1 %3301 }
 0x86b   : > { %v3334_v43 = vpop.permute.xlu0 %3333 }
 0x86c   : > { %v3351_v53 = vsel %vm8248_vm6, %v3346_v11, %v3334_v43  ;;  %v3363_v15 = vsel %vm8251_vm3, %v3334_v43, %v3346_v11  ;;  %v3367_v43 = vmul.f32 %v3362_v34, %v4963_v42  ;;  %vm8264_vm6 = vmmov %vm8263_vm0 }
 0x86d   : > { %v7569_v26 = vpop.permute.xlu1 %3257  ;;  %v3370_v7 = vmul.f32 %v3351_v53, %v4960_v41  ;;  %v3369_v25 = vmul.f32 %v3363_v15, %v4963_v42  ;;  %v3322_v15 = vmul.f32 %v7527_v35, %v8193_v46 }
 0x86f   : > { %v3290_v16 = vpop.permute.xlu0 %3289 }
 0x871   : > { %v7571_v38 = vpop.permute.xlu1 %3213 }
 0x873   : > { %v3246_v21 = vpop.permute.xlu0 %3245 }
 0x875   : > { %v7573_v27 = vpop.permute.xlu1 %3479 }
 0x877   : > { %v7575_v33 = vpop.permute.xlu0 %3197 }
 0x879   : > { %v3348_v32 = vpop.permute.xlu1 %3347 }
 0x87b   : > { %v7577_v5 = vpop.permute.xlu0 %3481 }
 0x87d   : > { %v3304_v0 = vpop.permute.xlu1 %3303 }
 0x87f   : > { %v3336_v8 = vpop.permute.xlu0 %3335 }
 0x880   : > { %v3352_v17 = vsel %vm8249_vm5, %v3348_v32, %v3336_v8  ;;  %v3364_v29 = vsel %vm8250_vm4, %v3336_v8, %v3348_v32  ;;  %v3368_v32 = vmul.f32 %v3350_v10, %v4960_v41  ;;  %v3366_v8 = vmul.f32 %v7517_v63, %v4960_v41  ;;  %vm8265_vm5 = vmmov %vm8263_vm0 }
 0x881   : > { %v3371_v39 = vmul.f32 %v3364_v29, %v4963_v42  ;;  %v3372_v9 = vmul.f32 %v3352_v17, %v4960_v41  ;;  %v3260_v45 = vpop.permute.xlu1 %3259  ;;  %v3319_v10 = vsel %vm8257_vm8, %v3290_v16, %v3302_v44  ;;  %v3318_v42 = vsel %vm8259_vm2, %v3288_v54, %v3300_v61 }
 0x882   : > { %v3323_v29 = vmul.f32 %v3318_v42, %v8196_v37  ;;  %vm8266_vm4 = vcmask 138240  }
 0x883   : > { %v7588_v30 = vpop.permute.xlu0 %3469  ;;  %3572 = vmatprep.subr.mxu0 %v3372_v9  ;;  %v3307_v9 = vsel %vm8254_vm7, %v3302_v44, %v3290_v16  ;;  %vm8267_vm3 = vmmov %vm8266_vm4 }
 0x884   : > { %3573 = vmatpush1.msra.mxu0 %v3371_v39  ;;  %v3326_v63 = vmul.f32 %v3307_v9, %v8193_v46  ;;  %v3263_v39 = vsel %vm8260_vm15, %v7569_v26, %v3246_v21  ;;  %vm8268_vm10 = vmmov %vm8267_vm3 }
 0x885   : > { %3574 = vmatprep.subr.mxu0 %v3370_v7  ;;  %v3216_v11 = vpop.permute.xlu1 %3215  ;;  %vm8269_vm12 = vmmov %vm8267_vm3 }
 0x886   : > { %3575 = vmatpush1.msra.mxu0 %v3369_v25  ;;  %v3306_v25 = vsel %vm8258_vm9, %v3300_v61, %v3288_v54  ;;  %v3321_v54 = vmul.f32 %v7530_v47, %v8196_v37  ;;  %v3282_v47 = vmul.f32 %v3263_v39, %v8192_v50  ;;  %vm8270_vm7 = vmmov %vm8267_vm3 }
 0x887   : > { %v3292_v17 = vpop.permute.xlu0 %3291  ;;  %3576 = vmatprep.subr.mxu0 %v3368_v32  ;;  %v3324_v44 = vmul.f32 %v3306_v25, %v8193_v46  ;;  %v3231_v25 = vsel %vm8269_vm12, %v7575_v33, %v7571_v38 }
 0x888   : > { %v3308_v31 = vsel %vm8255_vm14, %v3304_v0, %v3292_v17  ;;  %v3320_v53 = vsel %vm8256_vm11, %v3292_v17, %v3304_v0  ;;  %3577 = vmatpush1.msra.mxu0 %v3367_v43  ;;  %v3325_v0 = vmul.f32 %v3319_v10, %v8196_v37  ;;  %v3219_v10 = vsel %vm8266_vm4, %v7571_v38, %v7575_v33  ;;  %vm8271_vm14 = vmmov %vm8267_vm3 }
 0x889   : > { %v3327_v34 = vmul.f32 %v3320_v53, %v8196_v37  ;;  %v3328_v7 = vmul.f32 %v3308_v31, %v8193_v46  ;;  %3578 = vmatprep.subr.mxu0 %v3366_v8  ;;  %v7603_v41 = vpop.permute.xlu1 %3471  ;;  %v3275_v8 = vsel %vm8263_vm0, %v3246_v21, %v7569_v26  ;;  %v3262_v37 = vsel %vm8264_vm6, %v7553_v56, %v7557_v18 }
 0x88a   : > { %3579 = vmatpush1.msra.mxu0 %v3365_v20  ;;  %v3281_v26 = vmul.f32 %v3275_v8, %v8191_v57  ;;  %v3280_v21 = vmul.f32 %v3262_v37, %v8192_v50  ;;  %v3278_v53 = vmul.f32 %v7537_v51, %v8192_v50  ;;  %v3237_v38 = vmul.f32 %v3231_v25, %v8201_v40 }
 0x88b   : > { %v7608_v6 = vpop.permute.xlu0 %3437  ;;  %3580 = vmatprep.subr.mxu0 %v3328_v7  ;;  %vm8272_vm11 = vcmask 916480  }
 0x88c   : > { %3581 = vmatpush1.msra.mxu0 %v3327_v34  ;;  %vm8273_vm8 = vmmov %vm8272_vm11 }
 0x88d   : > { %3582 = vmatprep.subr.mxu0 %v3326_v63  ;;  %v7612_v16 = vpop.permute.xlu1 %3435  ;;  %vm8274_vm9 = vmmov %vm8273_vm8 }
 0x88e   : > { %3583 = vmatpush1.msra.mxu0 %v3325_v0  ;;  %vm8275_vm2 = vmmov %vm8273_vm8 }
 0x88f   : > { %v3248_v61 = vpop.permute.xlu0 %3247  ;;  %3584 = vmatprep.subr.mxu0 %v3324_v44  ;;  %v3487_v39 = vsel %vm8275_vm2, %v7567_v55, %v7573_v27  ;;  %vm8276_vm15 = vmmov %vm8275_vm2 }
 0x890   : > { %v3264_v32 = vsel %vm8261_vm13, %v3260_v45, %v3248_v61  ;;  %v3276_v43 = vsel %vm8262_vm1, %v3248_v61, %v3260_v45  ;;  %3585 = vmatpush1.msra.mxu0 %v3323_v29  ;;  %v3274_v45 = vsel %vm8265_vm5, %v7557_v18, %v7553_v56  ;;  %v3277_v18 = vmul.f32 %v7540_v12, %v8191_v57  ;;  %vm8277_vm13 = vmmov %vm8275_vm2 }
 0x891   : > { %v3283_v17 = vmul.f32 %v3276_v43, %v8191_v57  ;;  %v3284_v46 = vmul.f32 %v3264_v32, %v8192_v50  ;;  %3586 = vmatprep.subr.mxu0 %v3322_v15  ;;  %v7627_v35 = vpop.permute.xlu1 %3431  ;;  %v3279_v31 = vmul.f32 %v3274_v45, %v8191_v57  ;;  %v3218_v57 = vsel %vm8270_vm7, %v7555_v3, %v7565_v14 }
 0x892   : > { %3587 = vmatpush1.msra.mxu0 %v3321_v54  ;;  %v3230_v12 = vsel %vm8271_vm14, %v7565_v14, %v7555_v3  ;;  %v3236_v33 = vmul.f32 %v3218_v57, %v8200_v36  ;;  %v3234_v3 = vmul.f32 %v7548_v4, %v8200_v36  ;;  %v3233_v61 = vmul.f32 %v7551_v60, %v8201_v40 }
 0x893   : > { %v7636_v20 = vpop.permute.xlu0 %3433  ;;  %3588 = vmatprep.subr.mxu0 %v3284_v46  ;;  %v3235_v44 = vmul.f32 %v3230_v12, %v8201_v40  ;;  %v3503_v54 = vsel %vm8274_vm9, %v7573_v27, %v7567_v55  ;;  %v3501_v60 = vsel %vm8276_vm15, %v7603_v41, %v7588_v30  ;;  %v3508_v55 = vmul.f32 %v7563_v24, %v4837_v58 }
 0x894   : > { %3589 = vmatpush1.msra.mxu0 %v3283_v17  ;;  %v3485_v27 = vsel %vm8277_vm13, %v7588_v30, %v7603_v41  ;;  %v3507_v17 = vmul.f32 %v7560_v13, %v4849_v62  ;;  %vm8278_vm1 = vcmask 924672   ;;  %v3506_v37 = vmul.f32 %v3501_v60, %v4837_v58 }
 0x895   : > { %3590 = vmatprep.subr.mxu0 %v3282_v47  ;;  %v7640_v9 = vpop.permute.xlu1 %3427  ;;  %vm8279_vm0 = vmmov %vm8278_vm1  ;;  %v3505_v24 = vmul.f32 %v3485_v27, %v4849_v62  ;;  %vm8286_vm7 = vcmask 1039360   ;;  %v3380_v60 = vmul.f32 %v7449_v52, %v4919_v23  ;;  %v8298_v27 = vld [vmem:[#allocation24_spill] sm:$0xff] }
 0x896   : > { %3591 = vmatpush1.msra.mxu0 %v3281_v26  ;;  %vm8280_vm6 = vmmov %vm8279_vm0 }
 0x897   : > { %v3200_v56 = vpop.permute.xlu0 %3199  ;;  %3592 = vmatprep.subr.mxu0 %v3280_v21  ;;  %v3459_v30 = vsel %vm8280_vm6, %v7612_v16, %v7636_v20  ;;  %vm8281_vm5 = vmmov %vm8279_vm0 }
 0x898   : > { %v3220_v34 = vsel %vm8267_vm3, %v3216_v11, %v3200_v56  ;;  %v3232_v7 = vsel %vm8268_vm10, %v3200_v56, %v3216_v11  ;;  %3593 = vmatpush1.msra.mxu0 %v3279_v31  ;;  %v3238_v11 = vmul.f32 %v3219_v10, %v8200_v36  ;;  %v3443_v13 = vsel %vm8281_vm5, %v7636_v20, %v7612_v16  ;;  %vm8282_vm4 = vmmov %vm8279_vm0 }
 0x899   : > { %v3239_v50 = vmul.f32 %v3232_v7, %v8201_v40  ;;  %v3240_v51 = vmul.f32 %v3220_v34, %v8200_v36  ;;  %3594 = vmatprep.subr.mxu0 %v3278_v53  ;;  %v7657_v42 = vpop.permute.xlu1 %3391  ;;  %v3509_v40 = vmul.f32 %v3487_v39, %v4849_v62  ;;  %vm8283_vm3 = vmmov %vm8279_vm0  ;;  %v3465_v53 = vmul.f32 %v3443_v13, %v4867_v2 }
 0x89a   : > { %3595 = vmatpush1.msra.mxu0 %v3277_v18  ;;  %vm8284_vm10 = vmmov %vm8279_vm0 }
 0x89b   : > { %v3430_v63 = vpop.permute.xlu0 %3429  ;;  %3596 = vmatprep.subr.mxu0 %v3240_v51  ;;  %vm8285_vm12 = vmmov %vm8279_vm0 }
 0x89c   : > { %3597 = vmatpush1.msra.mxu0 %v3239_v50  ;;  %v3442_v21 = vsel %vm8283_vm3, %v3430_v63, %v7627_v35  ;;  %vm8287_vm14 = vmmov %vm8286_vm7 }
 0x89d   : > { %3598 = vmatprep.subr.mxu0 %v3238_v11  ;;  %v3484_v0 = vpop.permute.xlu1 %3483  ;;  %v3463_v10 = vmul.f32 %v3442_v21, %v4867_v2  ;;  %vm8290_vm9 = vmmov %vm8286_vm7 }
 0x89e   : > { %v3504_v29 = vsel %vm8272_vm11, %v3484_v0, %v7577_v5  ;;  %3599 = vmatpush1.msra.mxu0 %v3237_v38  ;;  %v3488_v14 = vsel %vm8273_vm8, %v7577_v5, %v3484_v0  ;;  %v3510_v5 = vmul.f32 %v3503_v54, %v4837_v58  ;;  %vm8288_vm11 = vmmov %vm8286_vm7 }
 0x89f   : > { %v3426_v15 = vpop.permute.xlu0 %3425  ;;  %3600 = vmatprep.subr.mxu0 %v3236_v33  ;;  %v3512_v32 = vmul.f32 %v3504_v29, %v4837_v58  ;;  %v3511_v4 = vmul.f32 %v3488_v14, %v4849_v62  ;;  %v3466_v62 = vmul.f32 %v3459_v30, %v4862_v1  ;;  %vm8289_vm8 = vmmov %vm8286_vm7  ;;  %v8303_v30 = vld [vmem:[#allocation19_spill] sm:$0xff] }
 0x8a0   : > { %3601 = vmatpush1.msra.mxu0 %v3235_v44  ;;  %v3457_v16 = vsel %vm8284_vm10, %v7640_v9, %v3426_v15  ;;  %v3441_v56 = vsel %vm8285_vm12, %v3426_v15, %v7640_v9  ;;  %vm8291_vm2 = vmmov %vm8286_vm7  ;;  %v3375_v13 = vmul.f32 %v8303_v30, %v4929_v28 }
 0x8a1   : > { %3602 = vmatprep.subr.mxu0 %v3234_v3  ;;  %v3388_v36 = vpop.permute.xlu1 %3387  ;;  %v3461_v50 = vmul.f32 %v3441_v56, %v4867_v2  ;;  %vm8292_vm15 = vmmov %vm8291_vm2  ;;  %v8308_v56 = vld [vmem:[#allocation25_spill] sm:$0xff] }
 0x8a2   : > { %3603 = vmatpush1.msra.mxu0 %v3233_v61  ;;  %vm8293_vm13 = vmmov %vm8291_vm2 }
 0x8a3   : > { %v3394_v43 = vpop.permute.xlu0 %3393  ;;  %3604 = vmatprep.subr.mxu0 %v3512_v32 }
 0x8a4   : > { %3605 = vmatpush2.msra.mxu0 %v3511_v4 }
 0x8a5   : > { %3606 = vmatprep.subr.mxu0 %v3510_v5  ;;  %v3440_v8 = vpop.permute.xlu1 %3439 }
 0x8a6   : > { %v3460_v46 = vsel %vm8278_vm1, %v3440_v8, %v7608_v6  ;;  %3607 = vmatpush2.msra.mxu0 %v3509_v40  ;;  %v3444_v45 = vsel %vm8279_vm0, %v7608_v6, %v3440_v8  ;;  %v3458_v6 = vsel %vm8282_vm4, %v7627_v35, %v3430_v63  ;;  %v3462_v35 = vmul.f32 %v3457_v16, %v4862_v1 }
 0x8a7   : > { %v3390_v47 = vpop.permute.xlu0 %3389  ;;  %3608 = vmatprep.subr.mxu0 %v3508_v55  ;;  %v3468_v41 = vmul.f32 %v3460_v46, %v4862_v1  ;;  %v3467_v26 = vmul.f32 %v3444_v45, %v4867_v2  ;;  %v3464_v20 = vmul.f32 %v3458_v6, %v4862_v1  ;;  %vm8294_vm1 = vcmask 908288   ;;  %v8304_v6 = vld [vmem:[#allocation21_spill] sm:$0xff] }
 0x8a8   : > { %3609 = vmatpush2.msra.mxu0 %v3507_v17  ;;  %v3415_v51 = vsel %vm8288_vm11, %v7657_v42, %v3390_v47  ;;  %v3399_v9 = vsel %vm8289_vm8, %v3390_v47, %v7657_v42  ;;  %vm8295_vm0 = vmmov %vm8294_vm1  ;;  %v3378_v8 = vmul.f32 %v8298_v27, %v4919_v23 }
 0x8a9   : > { %3610 = vmatprep.subr.mxu0 %v3506_v37  ;;  %v3384_v58 = vpop.permute.xlu1 %3383  ;;  %v3422_v63 = vmul.f32 %v3415_v51, %v4909_v19  ;;  %v3421_v33 = vmul.f32 %v3399_v9, %v4914_v22  ;;  %vm8296_vm6 = vmmov %vm8295_vm0  ;;  %v8301_v37 = vld [vmem:[#allocation23_spill] sm:$0xff] }
 0x8aa   : > { %3611 = vmatpush2.msra.mxu0 %v3505_v24  ;;  %vm8297_vm5 = vmmov %vm8295_vm0  ;;  %v3377_v52 = vmul.f32 %v8301_v37, %v4929_v28 }
 0x8ab   : > { %v3386_v31 = vpop.permute.xlu0 %3385  ;;  %3612 = vmatprep.subr.mxu0 %v3468_v41  ;;  %vm8299_vm4 = vmmov %vm8295_vm0 }
 0x8ac   : > { %3613 = vmatpush2.msra.mxu0 %v3467_v26  ;;  %v3414_v11 = vsel %vm8290_vm9, %v3388_v36, %v3386_v31  ;;  %v3398_v2 = vsel %vm8291_vm2, %v3386_v31, %v3388_v36  ;;  %vm8300_vm3 = vmmov %vm8295_vm0  ;;  %v3374_v26 = vmul.f32 %v8304_v6, %v4919_v23  ;;  %v8307_v31 = vld [vmem:[#allocation22_spill] sm:$0xff] }
 0x8ad   : > { %3614 = vmatprep.subr.mxu0 %v3466_v62  ;;  %v3396_v18 = vpop.permute.xlu1 %3395  ;;  %v3420_v42 = vmul.f32 %v3414_v11, %v4909_v19  ;;  %v3419_v3 = vmul.f32 %v3398_v2, %v4914_v22  ;;  %vm8305_vm10 = vmmov %vm8295_vm0 }
 0x8ae   : > { %v3416_v34 = vsel %vm8286_vm7, %v3396_v18, %v3394_v43  ;;  %3615 = vmatpush2.msra.mxu0 %v3465_v53  ;;  %v3400_v7 = vsel %vm8287_vm14, %v3394_v43, %v3396_v18  ;;  %vm8306_vm12 = vmmov %vm8295_vm0  ;;  %v3373_v53 = vmul.f32 %v8307_v31, %v4929_v28  ;;  %vm3569_vm7 = vcmask 261120  }
 0x8af   : > { %v3382_v25 = vpop.permute.xlu0 %3381  ;;  %3616 = vmatprep.subr.mxu0 %v3464_v20  ;;  %v3424_v57 = vmul.f32 %v3416_v34, %v4909_v19  ;;  %v3423_v1 = vmul.f32 %v3400_v7, %v4914_v22 }
 0x8b0   : > { %3617 = vmatpush2.msra.mxu0 %v3463_v10  ;;  %v3413_v0 = vsel %vm8292_vm15, %v3384_v58, %v3382_v25  ;;  %v3397_v44 = vsel %vm8293_vm13, %v3382_v25, %v3384_v58 }
 0x8b1   : > { %3618 = vmatprep.subr.mxu0 %v3462_v35  ;;  %v3524_v12 = vpop.permute.xlu1 %3523  ;;  %v3418_v61 = vmul.f32 %v3413_v0, %v4909_v19  ;;  %v3417_v36 = vmul.f32 %v3397_v44, %v4914_v22  ;;  %v3379_v22 = vmul.f32 %v7441_v59, %v4929_v28  ;;  %v8302_v59 = vld [vmem:[#allocation20_spill] sm:$0xff] }
 0x8b2   : > { %3619 = vmatpush2.msra.mxu0 %v3461_v50  ;;  %v3376_v24 = vmul.f32 %v8302_v59, %v4919_v23  ;;  %v3558_v23 = vld [vmem:[%s8235_s19 + $0x8] sm:$0xf] }
 0x8b3   : > { %v3526_v38 = vpop.permute.xlu0 %3525  ;;  %3620 = vmatprep.subr.mxu0 %v3424_v57 }
 0x8b4   : > { %3621 = vmatpush2.msra.mxu0 %v3423_v1 }
 0x8b5   : > { %3622 = vmatprep.subr.mxu0 %v3422_v63  ;;  %v3528_v29 = vpop.permute.xlu1 %3527 }
 0x8b6   : > { %v3532_v14 = vsel %vm8294_vm1, %v3526_v38, %v3528_v29  ;;  %v3548_v15 = vsel %vm8295_vm0, %v3528_v29, %v3526_v38  ;;  %3623 = vmatpush2.msra.mxu0 %v3421_v33 }
 0x8b7   : > { %v3555_v54 = vmul.f32 %v3532_v14, %v4811_v49  ;;  %v3556_v39 = vmul.f32 %v3548_v15, %v4806_v48  ;;  %v3522_v32 = vpop.permute.xlu0 %3521  ;;  %3624 = vmatprep.subr.mxu0 %v3420_v42 }
 0x8b8   : > { %v3531_v4 = vsel %vm8296_vm6, %v3522_v32, %v3524_v12  ;;  %v3547_v5 = vsel %vm8297_vm5, %v3524_v12, %v3522_v32  ;;  %3625 = vmatpush2.msra.mxu0 %v3419_v3 }
 0x8b9   : > { %v3553_v43 = vmul.f32 %v3531_v4, %v4811_v49  ;;  %v3554_v40 = vmul.f32 %v3547_v5, %v4806_v48  ;;  %3626 = vmatprep.subr.mxu0 %v3418_v61  ;;  %3667 = vmatprep.subr.mxu1 %v3556_v39  ;;  %v3520_v19 = vpop.permute.xlu1 %3519 }
 0x8ba   : > { %3627 = vmatpush2.msra.mxu0 %v3417_v36  ;;  %3668 = vmatpush1.msra.mxu1 %v3555_v54 }
 0x8bb   : > { %v3518_v55 = vpop.permute.xlu0 %3517  ;;  %3628 = vmatprep.subr.mxu0 %v3380_v60  ;;  %3669 = vmatprep.subr.mxu1 %v3554_v40 }
 0x8bc   : > { %v3530_v17 = vsel %vm8299_vm4, %v3518_v55, %v3520_v19  ;;  %v3546_v46 = vsel %vm8300_vm3, %v3520_v19, %v3518_v55  ;;  %3629 = vmatpush2.msra.mxu0 %v3379_v22  ;;  %3670 = vmatpush1.msra.mxu1 %v3553_v43 }
 0x8bd   : > { %v3551_v45 = vmul.f32 %v3530_v17, %v4811_v49  ;;  %v3552_v47 = vmul.f32 %v3546_v46, %v4806_v48  ;;  %3630 = vmatprep.subr.mxu0 %v3378_v8  ;;  %v3516_v41 = vpop.permute.xlu1 %3515 }
 0x8be   : > { %3631 = vmatpush2.msra.mxu0 %v3377_v52 }
 0x8bf   : > { %v3514_v58 = vpop.permute.xlu0 %3513  ;;  %3632 = vmatprep.subr.mxu0 %v3376_v24  ;;  %3671 = vmatprep.subr.mxu1 %v3552_v47 }
 0x8c0   : > { %v3529_v62 = vsel %vm8305_vm10, %v3514_v58, %v3516_v41  ;;  %v3545_v21 = vsel %vm8306_vm12, %v3516_v41, %v3514_v58  ;;  %3633 = vmatpush2.msra.mxu0 %v3375_v13  ;;  %3672 = vmatpush1.msra.mxu1 %v3551_v45 }
 0x8c1   : > { %v3549_v16 = vmul.f32 %v3529_v62, %v4811_v49  ;;  %v3550_v20 = vmul.f32 %v3545_v21, %v4806_v48  ;;  %3634 = vmatprep.subr.mxu0 %v3374_v26 }
 0x8c2   : > { %3635 = vmatpush2.msra.mxu0 %v3373_v53 }
 0x8c3   : > { %3637 = vmatmul.mubr.f32.vlgmr.msra.gmra.mxu0 %v8308_v56  ;;  %3673 = vmatprep.subr.mxu1 %v3550_v20 }
 0x8c4   : > { %3674 = vmatpush1.msra.mxu1 %v3549_v16 }
 0x8c5   : > { %4127 = vmatmul.mubr.msk.f32.vlgmr.msra.gmra.mxu1 %vm3569_vm7, %v3558_v23 }
 0x8cc   : > { %v3563_v18 = vpop.permute.xlu0 %3562 }
 0x983   : > { %v3638_v28 = vpop.f32.mrf.mxu0 }
 0x984   : > { %v3639_v49 = vadd.f32 %v3638_v28, %v3563_v18 }
 0x985   : > { %v3640_v10 = vpop.f32.mrf.mxu0  ;;  %v3709_v48 = vpop.f32.mrf.mxu1 }
 0x986   : > { %v3641_v34 = vadd.f32 %v3640_v10, %v3563_v18  ;;  %v3710_v7 = vadd.f32 %v3709_v48, %v3639_v49 }
 0x987   : > { %v3711_v35 = vpop.f32.mrf.mxu1 }
 0x988   : > { %v3712_v25 = vadd.f32 %v3711_v35, %v3641_v34 }
 0x98a   : > { %v3716_v50 = vcombine.low %v3710_v7, %v3712_v25 }
 0x98c   : > { %3718 = vst [vmem:[%s535_s23] sm:$0xff] %v3716_v50 }
 0x98d   : > { %4315 = shalt.err (!%p4312_p9)
}
 0x98e   : > { %s4316_s15 = scalar_lea.hbm %s3732_s2, 128  ;;  %s4320_s13 = scalar_lea.hbm %s8310_s27, 256 }
 0x98f   : > { %p4317_p1 = scmp.ne.s32.totalorder %s3732_s2, %s4316_s15  ;;  %p4321_p7 = scmp.lt.s32.totalorder %s3732_s2, %s8310_s27 }
 0x990   : > { %p4322_p11 = scmp.lt.s32.totalorder %s4320_s13, %s4316_s15 }
 0x991   : > { %p4318_p4 = pnand %p4317_p1, %p8311_p12 }
 0x992   : > { %p4323_p8 = por %p4322_p11, %p4321_p7 }
 0x993   : > { %p4319_p6 = pneg %p4318_p4 }
 0x995   : > { %p4324_p3 = pnand %p4323_p8, %p4319_p6 }
 0x997   : > { %4327 = shalt.err (!%p4324_p3)
}
 0x998   : > { %4144 = dma.vmem_to_hbm [thread:$0]  (%p8311_p12), %s3735_s22, 128, %s3732_s2, %s3720_s12  }
 0x999 PF: > { %s8312_s10 = sld [smem:[#allocation13_spill]]  ;;  %p8315_p2 = scmp.ge.s32.totalorder %s4374_s16, 2 }
 0x99a   : > { %s8313_s14 = sld [smem:[#allocation15_spill]] }
 0x99f   : > { %s3746_s18 = sand.u32 1, %s8312_s10  }
 0x9a0   : > { %p8314_p10 = scmp.ne.s32.totalorder %s8313_s14, 0  ;;  %s3747_s24 = scalar_lea.sflag [#allocation4], %s3746_s18 }
 0x9a2   : > { %p4158_p13 = pnand %p8315_p2, %p8314_p10 }
 0x9a4   : > { %p4159_p0 = pneg %p4158_p13 }
 0x9a6   : > { %4357 = dma.done.wait (%p4159_p0), %s3747_s24, 128  }
 0x9a7   : > { %4359 = vsyncadd (%p4159_p0), %s3747_s24, 4294967168  ;;  %s8316_s16 = sld [smem:[#allocation16_spill]]  ;;  %s8319_s29 = smov %s4366_s30 }
 0x9a8   : > { %s8317_s21 = sld [smem:[#allocation14_spill]] }
 0x9a9   : > { %s8318_s15 = sld [smem:[#allocation17_spill]] }
 0x9ad   : > { %p30_p5 = scmp.ge.s32.totalorder %s8316_s16, 4  }
 0x9ae   : > { %s8320_s30 = smov %s8317_s21 }
 0x9af   :  { %32 = sbr.rel (!%p30_p5) target bundleno = 13 (0xd), region = 138 }
 0x9b4   :  { %3752 = vsyncpa [#allocation3], 1 }
 0x9b5   :  { %3754 = vsyncpa [#allocation3 + $0x1], 1 }
 0x9b6   :  { %3755 = vsyncpa [#allocation6], 1 }
 0x9b7   :  { %3757 = vsyncpa [#allocation6 + $0x1], 1 }
 0x9b8   :  { %3758 = vsyncpa [#allocation4], 1 }
 0x9b9   :  { %3760 = vsyncpa [#allocation4 + $0x1], 1 }

</bundles_post_ra>
